<compile_context>
chip_gen: v6e
topology: v6e:2x2x1
jax: 0.10.0
libtpu: 0.0.40
codegen_flags: <defaults>
</compile_context>

<pallas_src>
import jax
import jax.numpy as jnp
from jax.experimental import pallas as pl
from jax.experimental.pallas import tpu as pltpu


# ----------------------------------------------------------------------------
# Model configuration (small, deterministic)
# ----------------------------------------------------------------------------
NOTE_SIZE = (12, 10)          # vocab per track
INPUT_DIM = 16                # embedding dim
LSTM_HIDDEN = 32              # encoder LSTM hidden (per direction)
LATENT_DIM = 8
COND_HIDDEN = 32
COND_OUT = 16                 # conductor input-projection dim
DEC_HIDDEN = 32
BATCH = 2
SEQ_LEN = 8                   # encoder input sequence length
DEC_LEN = 32                  # decoder length (forward() passes length=32)
NUM_SEGMENTS = 2              # conductor steps (32 / 2 = 16 notes per segment)
STEPS = DEC_LEN // NUM_SEGMENTS
UB = NUM_SEGMENTS * BATCH     # decoder segments folded into the batch axis
OUT_PAD = 128                 # lane-dense padding for the fused output heads
STATS_PAD = 128               # lane-dense padding for the mu|logvar output


# ----------------------------------------------------------------------------
# LSTM step helper (gate-major [I | F | O | G] column layout)
# ----------------------------------------------------------------------------
def _lstm_step(xw, h, c, whh_ref, nh):
    """One LSTM step.  `xw` already contains x@Wih + b.  Column layout of the
    gates is [I | F | O | G], each `nh` lanes wide, so sigmoid and tanh each
    run once over the whole gate vector (2 EUP pushes/step instead of 4)."""
    gates = xw + jnp.dot(h, whh_ref[...], preferred_element_type=jnp.float32)
    sg = jax.nn.sigmoid(gates)
    tg = jnp.tanh(gates)
    i_g = sg[:, 0 * nh:1 * nh]
    f_g = sg[:, 1 * nh:2 * nh]
    o_g = sg[:, 2 * nh:3 * nh]
    g_g = tg[:, 3 * nh:4 * nh]
    c_new = f_g * c + i_g * g_g
    h_new = o_g * jnp.tanh(c_new)
    return h_new, c_new


# ----------------------------------------------------------------------------
# The single fused forward kernel
# ----------------------------------------------------------------------------
def fused_forward_kernel(
    x_enc_ref,       # (S*B, 2D)       fwd|bwd encoder embeddings, time-major
    prev_emb_ref,    # (steps*U*B, D)  folded teacher-forcing embeddings
    noise_ref,       # (B, latent)
    enc_wih_ref, enc_whh_ref, enc_b_ref,         # block-diag fused bi-LSTM
    mulv_w_ref, mulv_b_ref,                      # mu|logvar padded to 128
    condproj_w_ref, condproj_b_ref,              # cond input | cond h0
    cond_wih_ref, cond_whh_ref, cond_b_ref,      # conductor LSTM
    dec_init_w_ref, dec_init_b_ref,              # decoder h0 projection
    dec_wih_ref, dec_whh_ref, dec_b_ref,         # bottom decoder LSTM
    out_w_ref, out_b_ref,                        # fused output heads (128)
    stats_ref,       # out: (B, 128)   lanes [0:8]=mu, [8:16]=logvar
    logits_ref,      # out: (steps*U*B, 128) lane-dense logits
):
    f32 = jnp.float32
    b = BATCH
    eh = 2 * LSTM_HIDDEN    # fused (fwd|bwd) per-gate width

    # --- bidirectional encoder (fwd/bwd fused block-diagonally) -------------
    # One MXU call for every timestep's input projection (+ bias).
    xw_enc = (jnp.dot(x_enc_ref[...], enc_wih_ref[...],
                      preferred_element_type=f32)
              + enc_b_ref[...])                               # (S*B, 8H)
    h = jnp.zeros((b, eh), f32)
    c = jnp.zeros((b, eh), f32)
    for t in range(SEQ_LEN):
        h, c = _lstm_step(xw_enc[t * b:(t + 1) * b, :], h, c, enc_whh_ref, eh)
    # h == [h_fwd_final | h_bwd_final]  -> (B, 2H); kept in vregs, never stored

    # --- latent block: mu|logvar (lane-dense), z, conductor projections -----
    ml = (jnp.dot(h, mulv_w_ref[...], preferred_element_type=f32)
          + mulv_b_ref[...])                                  # (B, 128)
    stats_ref[...] = ml                                       # one dense store
    mu = ml[:, :LATENT_DIM]
    lv = ml[:, LATENT_DIM:2 * LATENT_DIM]
    z = mu + lv * noise_ref[...]        # matches reference forward() exactly
    cz = jnp.tanh(jnp.dot(z, condproj_w_ref[...],
                          preferred_element_type=f32) + condproj_b_ref[...])
    cond_in = cz[:, :COND_OUT]          # (B, 16) conductor input
    ch = cz[:, COND_OUT:]               # (B, 32) conductor initial hidden

    # --- conductor LSTM (same projected-z input at every segment step) ------
    cond_xw = (jnp.dot(cond_in, cond_wih_ref[...],
                       preferred_element_type=f32) + cond_b_ref[...])  # (B,128)
    cc = jnp.zeros((b, COND_HIDDEN), f32)
    seg_states = []
    for _ in range(NUM_SEGMENTS):
        ch, cc = _lstm_step(cond_xw, ch, cc, cond_whh_ref, COND_HIDDEN)
        seg_states.append(ch)
    c_fold = jnp.concatenate(seg_states, axis=0)              # (U*B, Ch)

    # --- bottom decoder (segments folded into batch) + fused output head ----
    dec_h = jnp.tanh(jnp.dot(c_fold, dec_init_w_ref[...],
                             preferred_element_type=f32) + dec_init_b_ref[...])
    dec_c = jnp.zeros((UB, DEC_HIDDEN), f32)
    # Conductor-state contribution to the gates is time-invariant; the
    # previous-token contribution is one matmul over all steps.
    w_c = dec_wih_ref[0:COND_HIDDEN, :]
    w_p = dec_wih_ref[COND_HIDDEN:COND_HIDDEN + INPUT_DIM, :]
    gate_c = (jnp.dot(c_fold, w_c, preferred_element_type=f32)
              + dec_b_ref[...])                               # (U*B, 128)
    gate_p = jnp.dot(prev_emb_ref[...], w_p,
                     preferred_element_type=f32)              # (steps*U*B, 128)
    out_w = out_w_ref[...]
    out_b = out_b_ref[...]
    for t in range(STEPS):
        xw_t = gate_c + gate_p[t * UB:(t + 1) * UB, :]
        dec_h, dec_c = _lstm_step(xw_t, dec_h, dec_c, dec_whh_ref, DEC_HIDDEN)
        # Output head fused into the step: lane-dense (U*B, 128) store.
        logits_ref[t * UB:(t + 1) * UB, :] = (
            jnp.dot(dec_h, out_w, preferred_element_type=f32) + out_b)


def fused_forward(x_enc, prev_emb, noise, p):
    vmem = pl.BlockSpec(memory_space=pltpu.MemorySpace.VMEM)
    return pl.pallas_call(
        fused_forward_kernel,
        out_shape=(
            jax.ShapeDtypeStruct((BATCH, STATS_PAD), jnp.float32),
            jax.ShapeDtypeStruct((STEPS * UB, OUT_PAD), jnp.float32),
        ),
        in_specs=[vmem] * 20,
        out_specs=(vmem, vmem),
    )(x_enc, prev_emb, noise,
      p["enc_wih"], p["enc_whh"], p["enc_b"],
      p["mulv_w"], p["mulv_b"],
      p["condproj_w"], p["condproj_b"],
      p["cond_wih"], p["cond_whh"], p["cond_b"],
      p["dec_init_w"], p["dec_init_b"],
      p["dec_wih"], p["dec_whh"], p["dec_b"],
      p["out_w"], p["out_b"])


# ----------------------------------------------------------------------------
# Parameters (pre-fused layouts matching the kernel)
# ----------------------------------------------------------------------------
def init_params(key):
    def nrm(k, shape, scale=0.1):
        return scale * jax.random.normal(k, shape, dtype=jnp.float32)

    keys = iter(jax.random.split(key, 64))
    p = {}
    for k, vocab in enumerate(NOTE_SIZE):
        p[f"emb_{k}"] = nrm(next(keys), (vocab, INPUT_DIM))

    # Bidirectional encoder fused block-diagonally, gate-major layout:
    # columns are [ I(fwd|bwd) | F(fwd|bwd) | O(fwd|bwd) | G(fwd|bwd) ].
    h, d = LSTM_HIDDEN, INPUT_DIM
    wih_f = nrm(next(keys), (d, 4 * h))
    wih_b = nrm(next(keys), (d, 4 * h))
    whh_f = nrm(next(keys), (h, 4 * h))
    whh_b = nrm(next(keys), (h, 4 * h))
    enc_wih = jnp.zeros((2 * d, 8 * h), jnp.float32)
    enc_whh = jnp.zeros((2 * h, 8 * h), jnp.float32)
    for g in range(4):
        enc_wih = enc_wih.at[:d, 2 * g * h:(2 * g + 1) * h].set(
            wih_f[:, g * h:(g + 1) * h])
        enc_wih = enc_wih.at[d:, (2 * g + 1) * h:(2 * g + 2) * h].set(
            wih_b[:, g * h:(g + 1) * h])
        enc_whh = enc_whh.at[:h, 2 * g * h:(2 * g + 1) * h].set(
            whh_f[:, g * h:(g + 1) * h])
        enc_whh = enc_whh.at[h:, (2 * g + 1) * h:(2 * g + 2) * h].set(
            whh_b[:, g * h:(g + 1) * h])
    p["enc_wih"] = enc_wih
    p["enc_whh"] = enc_whh
    p["enc_b"] = jnp.zeros((1, 8 * h), jnp.float32)

    # mu | logvar fused projection, padded to 128 lanes (lane-dense store).
    mulv_w = jnp.zeros((2 * h, STATS_PAD), jnp.float32)
    mulv_w = mulv_w.at[:, :2 * LATENT_DIM].set(
        nrm(next(keys), (2 * h, 2 * LATENT_DIM)))
    p["mulv_w"] = mulv_w
    p["mulv_b"] = jnp.zeros((1, STATS_PAD), jnp.float32)

    # Conductor input projection + conductor initial-state projection fused.
    p["condproj_w"] = nrm(next(keys), (LATENT_DIM, COND_OUT + COND_HIDDEN))
    p["condproj_b"] = jnp.zeros((1, COND_OUT + COND_HIDDEN), jnp.float32)

    # Conductor LSTM (gate-major [I|F|O|G] columns).
    p["cond_wih"] = nrm(next(keys), (COND_OUT, 4 * COND_HIDDEN))
    p["cond_whh"] = nrm(next(keys), (COND_HIDDEN, 4 * COND_HIDDEN))
    p["cond_b"] = jnp.zeros((1, 4 * COND_HIDDEN), jnp.float32)

    # Bottom-decoder initial-state projection.
    p["dec_init_w"] = nrm(next(keys), (COND_HIDDEN, DEC_HIDDEN))
    p["dec_init_b"] = jnp.zeros((1, DEC_HIDDEN), jnp.float32)

    # Bottom-decoder LSTM: rows [0:32] conductor-state part, [32:48] prev-emb.
    p["dec_wih"] = nrm(next(keys),
                       (COND_HIDDEN + INPUT_DIM, 4 * DEC_HIDDEN))
    p["dec_whh"] = nrm(next(keys), (DEC_HIDDEN, 4 * DEC_HIDDEN))
    p["dec_b"] = jnp.zeros((1, 4 * DEC_HIDDEN), jnp.float32)

    # Per-track output heads fused & padded to 128 lanes (lane-dense stores).
    w_out = jnp.zeros((DEC_HIDDEN, OUT_PAD), jnp.float32)
    off = 0
    for k, vocab in enumerate(NOTE_SIZE):
        w_out = w_out.at[:, off:off + vocab].set(
            nrm(next(keys), (DEC_HIDDEN, vocab)))
        off += vocab
    p["out_w"] = w_out
    p["out_b"] = jnp.zeros((1, OUT_PAD), jnp.float32)
    return p


# ----------------------------------------------------------------------------
# Forward pass (ONE Pallas launch; embedding gathers / argmax fused by jit)
# ----------------------------------------------------------------------------
def music_vae_forward(params, x, truth, noise):
    """
    x:     (B, S, K)   int32 note indices (K tracks)
    truth: (K, B, 32)  int32 target note indices (teacher forcing)
    noise: (B, latent) reparameterization noise (~N(0,1))
    Returns (reconstruct, song, mu, logvar) matching the PyTorch module.
    """
    bsz = x.shape[0]
    num_tracks = len(NOTE_SIZE)

    # --- embedding gathers (XLA glue; summed across tracks) ----------------
    x_emb = sum(jnp.take(params[f"emb_{k}"], x[:, :, k], axis=0)
                for k in range(num_tracks))                    # (B, S, D)
    xt = jnp.transpose(x_emb, (1, 0, 2))                       # (S, B, D)
    x_enc = jnp.concatenate([xt, xt[::-1]], axis=-1)           # (S, B, 2D)
    x_enc = x_enc.reshape(SEQ_LEN * bsz, 2 * INPUT_DIM)

    # Teacher-forcing previous-token embeddings, folded (segments -> batch).
    prev_tok = truth[:, :, :DEC_LEN - 1]                       # (K, B, 31)
    prev_emb = sum(jnp.take(params[f"emb_{k}"], prev_tok[k], axis=0)
                   for k in range(num_tracks))                 # (B, 31, D)
    prev_emb = jnp.transpose(prev_emb, (1, 0, 2))              # (31, B, D)
    prev_emb = jnp.concatenate(
        [jnp.zeros((1, bsz, INPUT_DIM), jnp.float32), prev_emb], axis=0)
    # TODO(synk): verify the reference decoder does not reset the previous
    # token to a start token at each conductor-segment boundary.
    prev_emb = prev_emb.reshape(NUM_SEGMENTS, STEPS, bsz, INPUT_DIM)
    prev_emb = jnp.transpose(prev_emb, (1, 0, 2, 3)).reshape(
        STEPS * NUM_SEGMENTS * bsz, INPUT_DIM)                 # (steps*U*B, D)

    # --- single fused Pallas launch -----------------------------------------
    stats, logits_flat = fused_forward(x_enc, prev_emb, noise, params)

    mu = stats[:, :LATENT_DIM]
    logvar = stats[:, LATENT_DIM:2 * LATENT_DIM]

    logits = logits_flat.reshape(STEPS, NUM_SEGMENTS, bsz, OUT_PAD)
    logits = jnp.transpose(logits, (1, 0, 2, 3)).reshape(DEC_LEN, bsz, OUT_PAD)
    reconstruct = []
    off = 0
    for k, vocab in enumerate(NOTE_SIZE):
        lg = jnp.transpose(logits[:, :, off:off + vocab], (1, 0, 2))  # (B,32,V)
        reconstruct.append(lg)
        off += vocab
    song = jnp.stack([jnp.argmax(o, axis=-1) for o in reconstruct])   # (K,B,32)
    return reconstruct, song, mu, logvar


# ----------------------------------------------------------------------------
if __name__ == "__main__":
    root = jax.random.PRNGKey(0)
    k_par, k_x, k_t, k_n = jax.random.split(root, 4)

    params = init_params(k_par)

    # encoder input: (B, S, num_tracks) int indices, per-track vocab bound
    kx = jax.random.split(k_x, len(NOTE_SIZE))
    x = jnp.stack(
        [jax.random.randint(kx[k], (BATCH, SEQ_LEN), 0, NOTE_SIZE[k])
         for k in range(len(NOTE_SIZE))], axis=-1).astype(jnp.int32)

    # teacher-forcing targets: (num_tracks, B, 32)
    kt = jax.random.split(k_t, len(NOTE_SIZE))
    truth = jnp.stack(
        [jax.random.randint(kt[k], (BATCH, DEC_LEN), 0, NOTE_SIZE[k])
         for k in range(len(NOTE_SIZE))], axis=0).astype(jnp.int32)

    noise = jax.random.normal(k_n, (BATCH, LATENT_DIM), dtype=jnp.float32)

    forward = jax.jit(music_vae_forward)
    reconstruct, song, mu, logvar = forward(params, x, truth, noise)
    jax.block_until_ready((reconstruct, song, mu, logvar))

    assert song.shape == (len(NOTE_SIZE), BATCH, DEC_LEN)
    assert mu.shape == (BATCH, LATENT_DIM)
    assert logvar.shape == (BATCH, LATENT_DIM)
    for k, vocab in enumerate(NOTE_SIZE):
        assert reconstruct[k].shape == (BATCH, DEC_LEN, vocab)

    print("KERNEL_OK")
</pallas_src>

<mosaic_0001>
module attributes {stable_mosaic.version = 11 : i64} {
  func.func @fused_forward_kernel(%arg0: memref<16x32xf32, #tpu.memory_space<vmem>>, %arg1: memref<64x16xf32, #tpu.memory_space<vmem>>, %arg2: memref<2x8xf32, #tpu.memory_space<vmem>>, %arg3: memref<32x256xf32, #tpu.memory_space<vmem>>, %arg4: memref<64x256xf32, #tpu.memory_space<vmem>>, %arg5: memref<1x256xf32, #tpu.memory_space<vmem>>, %arg6: memref<64x128xf32, #tpu.memory_space<vmem>>, %arg7: memref<1x128xf32, #tpu.memory_space<vmem>>, %arg8: memref<8x48xf32, #tpu.memory_space<vmem>>, %arg9: memref<1x48xf32, #tpu.memory_space<vmem>>, %arg10: memref<16x128xf32, #tpu.memory_space<vmem>>, %arg11: memref<32x128xf32, #tpu.memory_space<vmem>>, %arg12: memref<1x128xf32, #tpu.memory_space<vmem>>, %arg13: memref<32x32xf32, #tpu.memory_space<vmem>>, %arg14: memref<1x32xf32, #tpu.memory_space<vmem>>, %arg15: memref<48x128xf32, #tpu.memory_space<vmem>>, %arg16: memref<32x128xf32, #tpu.memory_space<vmem>>, %arg17: memref<1x128xf32, #tpu.memory_space<vmem>>, %arg18: memref<32x128xf32, #tpu.memory_space<vmem>>, %arg19: memref<1x128xf32, #tpu.memory_space<vmem>>, %arg20: memref<2x128xf32, #tpu.memory_space<vmem>>, %arg21: memref<64x128xf32, #tpu.memory_space<vmem>>) attributes {dimension_semantics = [], scalar_prefetch = 0 : i64, scratch_operands = 0 : i64, tpu.core_type = #tpu.core_type<tc>} {
    %c0 = arith.constant 0 : index
    %c0_0 = arith.constant 0 : index
    %0 = vector.load %arg0[%c0, %c0_0] : memref<16x32xf32, #tpu.memory_space<vmem>>, vector<16x32xf32>
    %c0_1 = arith.constant 0 : index
    %c0_2 = arith.constant 0 : index
    %1 = vector.load %arg3[%c0_1, %c0_2] : memref<32x256xf32, #tpu.memory_space<vmem>>, vector<32x256xf32>
    %cst = arith.constant dense<0.000000e+00> : vector<16x256xf32>
    %2 = tpu.matmul %0, %1, %cst {dimension_numbers = #tpu.dot_dimension_numbers<[1], [0], [0], [1], [0, 0, 1, 1], [], []>} : vector<16x32xf32>, vector<32x256xf32>, vector<16x256xf32> -> vector<16x256xf32>
    %c0_3 = arith.constant 0 : index
    %c0_4 = arith.constant 0 : index
    %3 = vector.load %arg5[%c0_3, %c0_4] : memref<1x256xf32, #tpu.memory_space<vmem>>, vector<1x256xf32>
    %4 = vector.broadcast %3 : vector<1x256xf32> to vector<16x256xf32>
    %5 = arith.addf %2, %4 : vector<16x256xf32>
    %cst_5 = arith.constant 0.000000e+00 : f32
    %6 = vector.broadcast %cst_5 : f32 to vector<2x64xf32>
    %cst_6 = arith.constant 0.000000e+00 : f32
    %7 = vector.broadcast %cst_6 : f32 to vector<2x64xf32>
    %8 = vector.extract_strided_slice %5 {offsets = [0, 0], sizes = [2, 256], strides = [1, 1]} : vector<16x256xf32> to vector<2x256xf32>
    %c0_7 = arith.constant 0 : index
    %c0_8 = arith.constant 0 : index
    %9 = vector.load %arg4[%c0_7, %c0_8] : memref<64x256xf32, #tpu.memory_space<vmem>>, vector<64x256xf32>
    %cst_9 = arith.constant dense<0.000000e+00> : vector<2x256xf32>
    %10 = tpu.matmul %6, %9, %cst_9 {dimension_numbers = #tpu.dot_dimension_numbers<[1], [0], [0], [1], [0, 0, 1, 1], [], []>} : vector<2x64xf32>, vector<64x256xf32>, vector<2x256xf32> -> vector<2x256xf32>
    %11 = arith.addf %8, %10 : vector<2x256xf32>
    %12 = arith.negf %11 : vector<2x256xf32>
    %13 = math.exp %12 : vector<2x256xf32>
    %cst_10 = arith.constant 1.000000e+00 : f32
    %14 = vector.broadcast %cst_10 : f32 to vector<2x256xf32>
    %15 = arith.addf %14, %13 : vector<2x256xf32>
    %16 = arith.divf %14, %15 : vector<2x256xf32>
    %17 = math.tanh %11 : vector<2x256xf32>
    %18 = vector.extract_strided_slice %16 {offsets = [0, 0], sizes = [2, 64], strides = [1, 1]} : vector<2x256xf32> to vector<2x64xf32>
    %19 = vector.extract_strided_slice %16 {offsets = [0, 64], sizes = [2, 64], strides = [1, 1]} : vector<2x256xf32> to vector<2x64xf32>
    %20 = vector.extract_strided_slice %16 {offsets = [0, 128], sizes = [2, 64], strides = [1, 1]} : vector<2x256xf32> to vector<2x64xf32>
    %21 = vector.extract_strided_slice %17 {offsets = [0, 192], sizes = [2, 64], strides = [1, 1]} : vector<2x256xf32> to vector<2x64xf32>
    %22 = arith.mulf %19, %7 : vector<2x64xf32>
    %23 = arith.mulf %18, %21 : vector<2x64xf32>
    %24 = arith.addf %22, %23 : vector<2x64xf32>
    %25 = math.tanh %24 : vector<2x64xf32>
    %26 = arith.mulf %20, %25 : vector<2x64xf32>
    %27 = vector.extract_strided_slice %5 {offsets = [2, 0], sizes = [2, 256], strides = [1, 1]} : vector<16x256xf32> to vector<2x256xf32>
    %c0_11 = arith.constant 0 : index
    %c0_12 = arith.constant 0 : index
    %28 = vector.load %arg4[%c0_11, %c0_12] : memref<64x256xf32, #tpu.memory_space<vmem>>, vector<64x256xf32>
    %cst_13 = arith.constant dense<0.000000e+00> : vector<2x256xf32>
    %29 = tpu.matmul %26, %28, %cst_13 {dimension_numbers = #tpu.dot_dimension_numbers<[1], [0], [0], [1], [0, 0, 1, 1], [], []>} : vector<2x64xf32>, vector<64x256xf32>, vector<2x256xf32> -> vector<2x256xf32>
    %30 = arith.addf %27, %29 : vector<2x256xf32>
    %31 = arith.negf %30 : vector<2x256xf32>
    %32 = math.exp %31 : vector<2x256xf32>
    %cst_14 = arith.constant 1.000000e+00 : f32
    %33 = vector.broadcast %cst_14 : f32 to vector<2x256xf32>
    %34 = arith.addf %33, %32 : vector<2x256xf32>
    %35 = arith.divf %33, %34 : vector<2x256xf32>
    %36 = math.tanh %30 : vector<2x256xf32>
    %37 = vector.extract_strided_slice %35 {offsets = [0, 0], sizes = [2, 64], strides = [1, 1]} : vector<2x256xf32> to vector<2x64xf32>
    %38 = vector.extract_strided_slice %35 {offsets = [0, 64], sizes = [2, 64], strides = [1, 1]} : vector<2x256xf32> to vector<2x64xf32>
    %39 = vector.extract_strided_slice %35 {offsets = [0, 128], sizes = [2, 64], strides = [1, 1]} : vector<2x256xf32> to vector<2x64xf32>
    %40 = vector.extract_strided_slice %36 {offsets = [0, 192], sizes = [2, 64], strides = [1, 1]} : vector<2x256xf32> to vector<2x64xf32>
    %41 = arith.mulf %38, %24 : vector<2x64xf32>
    %42 = arith.mulf %37, %40 : vector<2x64xf32>
    %43 = arith.addf %41, %42 : vector<2x64xf32>
    %44 = math.tanh %43 : vector<2x64xf32>
    %45 = arith.mulf %39, %44 : vector<2x64xf32>
    %46 = vector.extract_strided_slice %5 {offsets = [4, 0], sizes = [2, 256], strides = [1, 1]} : vector<16x256xf32> to vector<2x256xf32>
    %c0_15 = arith.constant 0 : index
    %c0_16 = arith.constant 0 : index
    %47 = vector.load %arg4[%c0_15, %c0_16] : memref<64x256xf32, #tpu.memory_space<vmem>>, vector<64x256xf32>
    %cst_17 = arith.constant dense<0.000000e+00> : vector<2x256xf32>
    %48 = tpu.matmul %45, %47, %cst_17 {dimension_numbers = #tpu.dot_dimension_numbers<[1], [0], [0], [1], [0, 0, 1, 1], [], []>} : vector<2x64xf32>, vector<64x256xf32>, vector<2x256xf32> -> vector<2x256xf32>
    %49 = arith.addf %46, %48 : vector<2x256xf32>
    %50 = arith.negf %49 : vector<2x256xf32>
    %51 = math.exp %50 : vector<2x256xf32>
    %cst_18 = arith.constant 1.000000e+00 : f32
    %52 = vector.broadcast %cst_18 : f32 to vector<2x256xf32>
    %53 = arith.addf %52, %51 : vector<2x256xf32>
    %54 = arith.divf %52, %53 : vector<2x256xf32>
    %55 = math.tanh %49 : vector<2x256xf32>
    %56 = vector.extract_strided_slice %54 {offsets = [0, 0], sizes = [2, 64], strides = [1, 1]} : vector<2x256xf32> to vector<2x64xf32>
    %57 = vector.extract_strided_slice %54 {offsets = [0, 64], sizes = [2, 64], strides = [1, 1]} : vector<2x256xf32> to vector<2x64xf32>
    %58 = vector.extract_strided_slice %54 {offsets = [0, 128], sizes = [2, 64], strides = [1, 1]} : vector<2x256xf32> to vector<2x64xf32>
    %59 = vector.extract_strided_slice %55 {offsets = [0, 192], sizes = [2, 64], strides = [1, 1]} : vector<2x256xf32> to vector<2x64xf32>
    %60 = arith.mulf %57, %43 : vector<2x64xf32>
    %61 = arith.mulf %56, %59 : vector<2x64xf32>
    %62 = arith.addf %60, %61 : vector<2x64xf32>
    %63 = math.tanh %62 : vector<2x64xf32>
    %64 = arith.mulf %58, %63 : vector<2x64xf32>
    %65 = vector.extract_strided_slice %5 {offsets = [6, 0], sizes = [2, 256], strides = [1, 1]} : vector<16x256xf32> to vector<2x256xf32>
    %c0_19 = arith.constant 0 : index
    %c0_20 = arith.constant 0 : index
    %66 = vector.load %arg4[%c0_19, %c0_20] : memref<64x256xf32, #tpu.memory_space<vmem>>, vector<64x256xf32>
    %cst_21 = arith.constant dense<0.000000e+00> : vector<2x256xf32>
    %67 = tpu.matmul %64, %66, %cst_21 {dimension_numbers = #tpu.dot_dimension_numbers<[1], [0], [0], [1], [0, 0, 1, 1], [], []>} : vector<2x64xf32>, vector<64x256xf32>, vector<2x256xf32> -> vector<2x256xf32>
    %68 = arith.addf %65, %67 : vector<2x256xf32>
    %69 = arith.negf %68 : vector<2x256xf32>
    %70 = math.exp %69 : vector<2x256xf32>
    %cst_22 = arith.constant 1.000000e+00 : f32
    %71 = vector.broadcast %cst_22 : f32 to vector<2x256xf32>
    %72 = arith.addf %71, %70 : vector<2x256xf32>
    %73 = arith.divf %71, %72 : vector<2x256xf32>
    %74 = math.tanh %68 : vector<2x256xf32>
    %75 = vector.extract_strided_slice %73 {offsets = [0, 0], sizes = [2, 64], strides = [1, 1]} : vector<2x256xf32> to vector<2x64xf32>
    %76 = vector.extract_strided_slice %73 {offsets = [0, 64], sizes = [2, 64], strides = [1, 1]} : vector<2x256xf32> to vector<2x64xf32>
    %77 = vector.extract_strided_slice %73 {offsets = [0, 128], sizes = [2, 64], strides = [1, 1]} : vector<2x256xf32> to vector<2x64xf32>
    %78 = vector.extract_strided_slice %74 {offsets = [0, 192], sizes = [2, 64], strides = [1, 1]} : vector<2x256xf32> to vector<2x64xf32>
    %79 = arith.mulf %76, %62 : vector<2x64xf32>
    %80 = arith.mulf %75, %78 : vector<2x64xf32>
    %81 = arith.addf %79, %80 : vector<2x64xf32>
    %82 = math.tanh %81 : vector<2x64xf32>
    %83 = arith.mulf %77, %82 : vector<2x64xf32>
    %84 = vector.extract_strided_slice %5 {offsets = [8, 0], sizes = [2, 256], strides = [1, 1]} : vector<16x256xf32> to vector<2x256xf32>
    %c0_23 = arith.constant 0 : index
    %c0_24 = arith.constant 0 : index
    %85 = vector.load %arg4[%c0_23, %c0_24] : memref<64x256xf32, #tpu.memory_space<vmem>>, vector<64x256xf32>
    %cst_25 = arith.constant dense<0.000000e+00> : vector<2x256xf32>
    %86 = tpu.matmul %83, %85, %cst_25 {dimension_numbers = #tpu.dot_dimension_numbers<[1], [0], [0], [1], [0, 0, 1, 1], [], []>} : vector<2x64xf32>, vector<64x256xf32>, vector<2x256xf32> -> vector<2x256xf32>
    %87 = arith.addf %84, %86 : vector<2x256xf32>
    %88 = arith.negf %87 : vector<2x256xf32>
    %89 = math.exp %88 : vector<2x256xf32>
    %cst_26 = arith.constant 1.000000e+00 : f32
    %90 = vector.broadcast %cst_26 : f32 to vector<2x256xf32>
    %91 = arith.addf %90, %89 : vector<2x256xf32>
    %92 = arith.divf %90, %91 : vector<2x256xf32>
    %93 = math.tanh %87 : vector<2x256xf32>
    %94 = vector.extract_strided_slice %92 {offsets = [0, 0], sizes = [2, 64], strides = [1, 1]} : vector<2x256xf32> to vector<2x64xf32>
    %95 = vector.extract_strided_slice %92 {offsets = [0, 64], sizes = [2, 64], strides = [1, 1]} : vector<2x256xf32> to vector<2x64xf32>
    %96 = vector.extract_strided_slice %92 {offsets = [0, 128], sizes = [2, 64], strides = [1, 1]} : vector<2x256xf32> to vector<2x64xf32>
    %97 = vector.extract_strided_slice %93 {offsets = [0, 192], sizes = [2, 64], strides = [1, 1]} : vector<2x256xf32> to vector<2x64xf32>
    %98 = arith.mulf %95, %81 : vector<2x64xf32>
    %99 = arith.mulf %94, %97 : vector<2x64xf32>
    %100 = arith.addf %98, %99 : vector<2x64xf32>
    %101 = math.tanh %100 : vector<2x64xf32>
    %102 = arith.mulf %96, %101 : vector<2x64xf32>
    %103 = vector.extract_strided_slice %5 {offsets = [10, 0], sizes = [2, 256], strides = [1, 1]} : vector<16x256xf32> to vector<2x256xf32>
    %c0_27 = arith.constant 0 : index
    %c0_28 = arith.constant 0 : index
    %104 = vector.load %arg4[%c0_27, %c0_28] : memref<64x256xf32, #tpu.memory_space<vmem>>, vector<64x256xf32>
    %cst_29 = arith.constant dense<0.000000e+00> : vector<2x256xf32>
    %105 = tpu.matmul %102, %104, %cst_29 {dimension_numbers = #tpu.dot_dimension_numbers<[1], [0], [0], [1], [0, 0, 1, 1], [], []>} : vector<2x64xf32>, vector<64x256xf32>, vector<2x256xf32> -> vector<2x256xf32>
    %106 = arith.addf %103, %105 : vector<2x256xf32>
    %107 = arith.negf %106 : vector<2x256xf32>
    %108 = math.exp %107 : vector<2x256xf32>
    %cst_30 = arith.constant 1.000000e+00 : f32
    %109 = vector.broadcast %cst_30 : f32 to vector<2x256xf32>
    %110 = arith.addf %109, %108 : vector<2x256xf32>
    %111 = arith.divf %109, %110 : vector<2x256xf32>
    %112 = math.tanh %106 : vector<2x256xf32>
    %113 = vector.extract_strided_slice %111 {offsets = [0, 0], sizes = [2, 64], strides = [1, 1]} : vector<2x256xf32> to vector<2x64xf32>
    %114 = vector.extract_strided_slice %111 {offsets = [0, 64], sizes = [2, 64], strides = [1, 1]} : vector<2x256xf32> to vector<2x64xf32>
    %115 = vector.extract_strided_slice %111 {offsets = [0, 128], sizes = [2, 64], strides = [1, 1]} : vector<2x256xf32> to vector<2x64xf32>
    %116 = vector.extract_strided_slice %112 {offsets = [0, 192], sizes = [2, 64], strides = [1, 1]} : vector<2x256xf32> to vector<2x64xf32>
    %117 = arith.mulf %114, %100 : vector<2x64xf32>
    %118 = arith.mulf %113, %116 : vector<2x64xf32>
    %119 = arith.addf %117, %118 : vector<2x64xf32>
    %120 = math.tanh %119 : vector<2x64xf32>
    %121 = arith.mulf %115, %120 : vector<2x64xf32>
    %122 = vector.extract_strided_slice %5 {offsets = [12, 0], sizes = [2, 256], strides = [1, 1]} : vector<16x256xf32> to vector<2x256xf32>
    %c0_31 = arith.constant 0 : index
    %c0_32 = arith.constant 0 : index
    %123 = vector.load %arg4[%c0_31, %c0_32] : memref<64x256xf32, #tpu.memory_space<vmem>>, vector<64x256xf32>
    %cst_33 = arith.constant dense<0.000000e+00> : vector<2x256xf32>
    %124 = tpu.matmul %121, %123, %cst_33 {dimension_numbers = #tpu.dot_dimension_numbers<[1], [0], [0], [1], [0, 0, 1, 1], [], []>} : vector<2x64xf32>, vector<64x256xf32>, vector<2x256xf32> -> vector<2x256xf32>
    %125 = arith.addf %122, %124 : vector<2x256xf32>
    %126 = arith.negf %125 : vector<2x256xf32>
    %127 = math.exp %126 : vector<2x256xf32>
    %cst_34 = arith.constant 1.000000e+00 : f32
    %128 = vector.broadcast %cst_34 : f32 to vector<2x256xf32>
    %129 = arith.addf %128, %127 : vector<2x256xf32>
    %130 = arith.divf %128, %129 : vector<2x256xf32>
    %131 = math.tanh %125 : vector<2x256xf32>
    %132 = vector.extract_strided_slice %130 {offsets = [0, 0], sizes = [2, 64], strides = [1, 1]} : vector<2x256xf32> to vector<2x64xf32>
    %133 = vector.extract_strided_slice %130 {offsets = [0, 64], sizes = [2, 64], strides = [1, 1]} : vector<2x256xf32> to vector<2x64xf32>
    %134 = vector.extract_strided_slice %130 {offsets = [0, 128], sizes = [2, 64], strides = [1, 1]} : vector<2x256xf32> to vector<2x64xf32>
    %135 = vector.extract_strided_slice %131 {offsets = [0, 192], sizes = [2, 64], strides = [1, 1]} : vector<2x256xf32> to vector<2x64xf32>
    %136 = arith.mulf %133, %119 : vector<2x64xf32>
    %137 = arith.mulf %132, %135 : vector<2x64xf32>
    %138 = arith.addf %136, %137 : vector<2x64xf32>
    %139 = math.tanh %138 : vector<2x64xf32>
    %140 = arith.mulf %134, %139 : vector<2x64xf32>
    %141 = vector.extract_strided_slice %5 {offsets = [14, 0], sizes = [2, 256], strides = [1, 1]} : vector<16x256xf32> to vector<2x256xf32>
    %c0_35 = arith.constant 0 : index
    %c0_36 = arith.constant 0 : index
    %142 = vector.load %arg4[%c0_35, %c0_36] : memref<64x256xf32, #tpu.memory_space<vmem>>, vector<64x256xf32>
    %cst_37 = arith.constant dense<0.000000e+00> : vector<2x256xf32>
    %143 = tpu.matmul %140, %142, %cst_37 {dimension_numbers = #tpu.dot_dimension_numbers<[1], [0], [0], [1], [0, 0, 1, 1], [], []>} : vector<2x64xf32>, vector<64x256xf32>, vector<2x256xf32> -> vector<2x256xf32>
    %144 = arith.addf %141, %143 : vector<2x256xf32>
    %145 = arith.negf %144 : vector<2x256xf32>
    %146 = math.exp %145 : vector<2x256xf32>
    %cst_38 = arith.constant 1.000000e+00 : f32
    %147 = vector.broadcast %cst_38 : f32 to vector<2x256xf32>
    %148 = arith.addf %147, %146 : vector<2x256xf32>
    %149 = arith.divf %147, %148 : vector<2x256xf32>
    %150 = math.tanh %144 : vector<2x256xf32>
    %151 = vector.extract_strided_slice %149 {offsets = [0, 0], sizes = [2, 64], strides = [1, 1]} : vector<2x256xf32> to vector<2x64xf32>
    %152 = vector.extract_strided_slice %149 {offsets = [0, 64], sizes = [2, 64], strides = [1, 1]} : vector<2x256xf32> to vector<2x64xf32>
    %153 = vector.extract_strided_slice %149 {offsets = [0, 128], sizes = [2, 64], strides = [1, 1]} : vector<2x256xf32> to vector<2x64xf32>
    %154 = vector.extract_strided_slice %150 {offsets = [0, 192], sizes = [2, 64], strides = [1, 1]} : vector<2x256xf32> to vector<2x64xf32>
    %155 = arith.mulf %152, %138 : vector<2x64xf32>
    %156 = arith.mulf %151, %154 : vector<2x64xf32>
    %157 = arith.addf %155, %156 : vector<2x64xf32>
    %158 = math.tanh %157 : vector<2x64xf32>
    %159 = arith.mulf %153, %158 : vector<2x64xf32>
    %c0_39 = arith.constant 0 : index
    %c0_40 = arith.constant 0 : index
    %160 = vector.load %arg6[%c0_39, %c0_40] : memref<64x128xf32, #tpu.memory_space<vmem>>, vector<64x128xf32>
    %cst_41 = arith.constant dense<0.000000e+00> : vector<2x128xf32>
    %161 = tpu.matmul %159, %160, %cst_41 {dimension_numbers = #tpu.dot_dimension_numbers<[1], [0], [0], [1], [0, 0, 1, 1], [], []>} : vector<2x64xf32>, vector<64x128xf32>, vector<2x128xf32> -> vector<2x128xf32>
    %c0_42 = arith.constant 0 : index
    %c0_43 = arith.constant 0 : index
    %162 = vector.load %arg7[%c0_42, %c0_43] : memref<1x128xf32, #tpu.memory_space<vmem>>, vector<1x128xf32>
    %163 = vector.broadcast %162 : vector<1x128xf32> to vector<2x128xf32>
    %164 = arith.addf %161, %163 : vector<2x128xf32>
    %c0_44 = arith.constant 0 : index
    %c0_45 = arith.constant 0 : index
    %165 = vector.load %arg20[%c0_44, %c0_45] : memref<2x128xf32, #tpu.memory_space<vmem>>, vector<2x128xf32>
    tpu.vector_store %arg20[%c0_44, %c0_45], %164 {strides = array<i32>} : memref<2x128xf32, #tpu.memory_space<vmem>>, vector<2x128xf32>,
    %166 = vector.extract_strided_slice %164 {offsets = [0, 0], sizes = [2, 8], strides = [1, 1]} : vector<2x128xf32> to vector<2x8xf32>
    %167 = vector.extract_strided_slice %164 {offsets = [0, 8], sizes = [2, 8], strides = [1, 1]} : vector<2x128xf32> to vector<2x8xf32>
    %c0_46 = arith.constant 0 : index
    %c0_47 = arith.constant 0 : index
    %168 = vector.load %arg2[%c0_46, %c0_47] : memref<2x8xf32, #tpu.memory_space<vmem>>, vector<2x8xf32>
    %169 = arith.mulf %167, %168 : vector<2x8xf32>
    %170 = arith.addf %166, %169 : vector<2x8xf32>
    %c0_48 = arith.constant 0 : index
    %c0_49 = arith.constant 0 : index
    %171 = vector.load %arg8[%c0_48, %c0_49] : memref<8x48xf32, #tpu.memory_space<vmem>>, vector<8x48xf32>
    %cst_50 = arith.constant dense<0.000000e+00> : vector<2x48xf32>
    %172 = tpu.matmul %170, %171, %cst_50 {dimension_numbers = #tpu.dot_dimension_numbers<[1], [0], [0], [1], [0, 0, 1, 1], [], []>} : vector<2x8xf32>, vector<8x48xf32>, vector<2x48xf32> -> vector<2x48xf32>
    %c0_51 = arith.constant 0 : index
    %c0_52 = arith.constant 0 : index
    %173 = vector.load %arg9[%c0_51, %c0_52] : memref<1x48xf32, #tpu.memory_space<vmem>>, vector<1x48xf32>
    %174 = vector.broadcast %173 : vector<1x48xf32> to vector<2x48xf32>
    %175 = arith.addf %172, %174 : vector<2x48xf32>
    %176 = math.tanh %175 : vector<2x48xf32>
    %177 = vector.extract_strided_slice %176 {offsets = [0, 0], sizes = [2, 16], strides = [1, 1]} : vector<2x48xf32> to vector<2x16xf32>
    %178 = vector.extract_strided_slice %176 {offsets = [0, 16], sizes = [2, 32], strides = [1, 1]} : vector<2x48xf32> to vector<2x32xf32>
    %c0_53 = arith.constant 0 : index
    %c0_54 = arith.constant 0 : index
    %179 = vector.load %arg10[%c0_53, %c0_54] : memref<16x128xf32, #tpu.memory_space<vmem>>, vector<16x128xf32>
    %cst_55 = arith.constant dense<0.000000e+00> : vector<2x128xf32>
    %180 = tpu.matmul %177, %179, %cst_55 {dimension_numbers = #tpu.dot_dimension_numbers<[1], [0], [0], [1], [0, 0, 1, 1], [], []>} : vector<2x16xf32>, vector<16x128xf32>, vector<2x128xf32> -> vector<2x128xf32>
    %c0_56 = arith.constant 0 : index
    %c0_57 = arith.constant 0 : index
    %181 = vector.load %arg12[%c0_56, %c0_57] : memref<1x128xf32, #tpu.memory_space<vmem>>, vector<1x128xf32>
    %182 = vector.broadcast %181 : vector<1x128xf32> to vector<2x128xf32>
    %183 = arith.addf %180, %182 : vector<2x128xf32>
    %cst_58 = arith.constant 0.000000e+00 : f32
    %184 = vector.broadcast %cst_58 : f32 to vector<2x32xf32>
    %c0_59 = arith.constant 0 : index
    %c0_60 = arith.constant 0 : index
    %185 = vector.load %arg11[%c0_59, %c0_60] : memref<32x128xf32, #tpu.memory_space<vmem>>, vector<32x128xf32>
    %cst_61 = arith.constant dense<0.000000e+00> : vector<2x128xf32>
    %186 = tpu.matmul %178, %185, %cst_61 {dimension_numbers = #tpu.dot_dimension_numbers<[1], [0], [0], [1], [0, 0, 1, 1], [], []>} : vector<2x32xf32>, vector<32x128xf32>, vector<2x128xf32> -> vector<2x128xf32>
    %187 = arith.addf %183, %186 : vector<2x128xf32>
    %188 = arith.negf %187 : vector<2x128xf32>
    %189 = math.exp %188 : vector<2x128xf32>
    %cst_62 = arith.constant 1.000000e+00 : f32
    %190 = vector.broadcast %cst_62 : f32 to vector<2x128xf32>
    %191 = arith.addf %190, %189 : vector<2x128xf32>
    %192 = arith.divf %190, %191 : vector<2x128xf32>
    %193 = math.tanh %187 : vector<2x128xf32>
    %194 = vector.extract_strided_slice %192 {offsets = [0, 0], sizes = [2, 32], strides = [1, 1]} : vector<2x128xf32> to vector<2x32xf32>
    %195 = vector.extract_strided_slice %192 {offsets = [0, 32], sizes = [2, 32], strides = [1, 1]} : vector<2x128xf32> to vector<2x32xf32>
    %196 = vector.extract_strided_slice %192 {offsets = [0, 64], sizes = [2, 32], strides = [1, 1]} : vector<2x128xf32> to vector<2x32xf32>
    %197 = vector.extract_strided_slice %193 {offsets = [0, 96], sizes = [2, 32], strides = [1, 1]} : vector<2x128xf32> to vector<2x32xf32>
    %198 = arith.mulf %195, %184 : vector<2x32xf32>
    %199 = arith.mulf %194, %197 : vector<2x32xf32>
    %200 = arith.addf %198, %199 : vector<2x32xf32>
    %201 = math.tanh %200 : vector<2x32xf32>
    %202 = arith.mulf %196, %201 : vector<2x32xf32>
    %c0_63 = arith.constant 0 : index
    %c0_64 = arith.constant 0 : index
    %203 = vector.load %arg11[%c0_63, %c0_64] : memref<32x128xf32, #tpu.memory_space<vmem>>, vector<32x128xf32>
    %cst_65 = arith.constant dense<0.000000e+00> : vector<2x128xf32>
    %204 = tpu.matmul %202, %203, %cst_65 {dimension_numbers = #tpu.dot_dimension_numbers<[1], [0], [0], [1], [0, 0, 1, 1], [], []>} : vector<2x32xf32>, vector<32x128xf32>, vector<2x128xf32> -> vector<2x128xf32>
    %205 = arith.addf %183, %204 : vector<2x128xf32>
    %206 = arith.negf %205 : vector<2x128xf32>
    %207 = math.exp %206 : vector<2x128xf32>
    %cst_66 = arith.constant 1.000000e+00 : f32
    %208 = vector.broadcast %cst_66 : f32 to vector<2x128xf32>
    %209 = arith.addf %208, %207 : vector<2x128xf32>
    %210 = arith.divf %208, %209 : vector<2x128xf32>
    %211 = math.tanh %205 : vector<2x128xf32>
    %212 = vector.extract_strided_slice %210 {offsets = [0, 0], sizes = [2, 32], strides = [1, 1]} : vector<2x128xf32> to vector<2x32xf32>
    %213 = vector.extract_strided_slice %210 {offsets = [0, 32], sizes = [2, 32], strides = [1, 1]} : vector<2x128xf32> to vector<2x32xf32>
    %214 = vector.extract_strided_slice %210 {offsets = [0, 64], sizes = [2, 32], strides = [1, 1]} : vector<2x128xf32> to vector<2x32xf32>
    %215 = vector.extract_strided_slice %211 {offsets = [0, 96], sizes = [2, 32], strides = [1, 1]} : vector<2x128xf32> to vector<2x32xf32>
    %216 = arith.mulf %213, %200 : vector<2x32xf32>
    %217 = arith.mulf %212, %215 : vector<2x32xf32>
    %218 = arith.addf %216, %217 : vector<2x32xf32>
    %219 = math.tanh %218 : vector<2x32xf32>
    %220 = arith.mulf %214, %219 : vector<2x32xf32>
    %221 = tpu.concatenate %202, %220 in 0 : vector<2x32xf32>, vector<2x32xf32> -> vector<4x32xf32>
    %c0_67 = arith.constant 0 : index
    %c0_68 = arith.constant 0 : index
    %222 = vector.load %arg13[%c0_67, %c0_68] : memref<32x32xf32, #tpu.memory_space<vmem>>, vector<32x32xf32>
    %cst_69 = arith.constant dense<0.000000e+00> : vector<4x32xf32>
    %223 = tpu.matmul %221, %222, %cst_69 {dimension_numbers = #tpu.dot_dimension_numbers<[1], [0], [0], [1], [0, 0, 1, 1], [], []>} : vector<4x32xf32>, vector<32x32xf32>, vector<4x32xf32> -> vector<4x32xf32>
    %c0_70 = arith.constant 0 : index
    %c0_71 = arith.constant 0 : index
    %224 = vector.load %arg14[%c0_70, %c0_71] : memref<1x32xf32, #tpu.memory_space<vmem>>, vector<1x32xf32>
    %225 = vector.broadcast %224 : vector<1x32xf32> to vector<4x32xf32>
    %226 = arith.addf %223, %225 : vector<4x32xf32>
    %227 = math.tanh %226 : vector<4x32xf32>
    %cst_72 = arith.constant 0.000000e+00 : f32
    %228 = vector.broadcast %cst_72 : f32 to vector<4x32xf32>
    %c0_73 = arith.constant 0 : index
    %c0_74 = arith.constant 0 : index
    %229 = vector.load %arg15[%c0_73, %c0_74] : memref<48x128xf32, #tpu.memory_space<vmem>>, vector<32x128xf32>
    %c32 = arith.constant 32 : index
    %c0_75 = arith.constant 0 : index
    %230 = vector.load %arg15[%c32, %c0_75] : memref<48x128xf32, #tpu.memory_space<vmem>>, vector<16x128xf32>
    %cst_76 = arith.constant dense<0.000000e+00> : vector<4x128xf32>
    %231 = tpu.matmul %221, %229, %cst_76 {dimension_numbers = #tpu.dot_dimension_numbers<[1], [0], [0], [1], [0, 0, 1, 1], [], []>} : vector<4x32xf32>, vector<32x128xf32>, vector<4x128xf32> -> vector<4x128xf32>
    %c0_77 = arith.constant 0 : index
    %c0_78 = arith.constant 0 : index
    %232 = vector.load %arg17[%c0_77, %c0_78] : memref<1x128xf32, #tpu.memory_space<vmem>>, vector<1x128xf32>
    %233 = vector.broadcast %232 : vector<1x128xf32> to vector<4x128xf32>
    %234 = arith.addf %231, %233 : vector<4x128xf32>
    %c0_79 = arith.constant 0 : index
    %c0_80 = arith.constant 0 : index
    %235 = vector.load %arg1[%c0_79, %c0_80] : memref<64x16xf32, #tpu.memory_space<vmem>>, vector<64x16xf32>
    %cst_81 = arith.constant dense<0.000000e+00> : vector<64x128xf32>
    %236 = tpu.matmul %235, %230, %cst_81 {dimension_numbers = #tpu.dot_dimension_numbers<[1], [0], [0], [1], [0, 0, 1, 1], [], []>} : vector<64x16xf32>, vector<16x128xf32>, vector<64x128xf32> -> vector<64x128xf32>
    %c0_82 = arith.constant 0 : index
    %c0_83 = arith.constant 0 : index
    %237 = vector.load %arg18[%c0_82, %c0_83] : memref<32x128xf32, #tpu.memory_space<vmem>>, vector<32x128xf32>
    %c0_84 = arith.constant 0 : index
    %c0_85 = arith.constant 0 : index
    %238 = vector.load %arg19[%c0_84, %c0_85] : memref<1x128xf32, #tpu.memory_space<vmem>>, vector<1x128xf32>
    %239 = vector.extract_strided_slice %236 {offsets = [0, 0], sizes = [4, 128], strides = [1, 1]} : vector<64x128xf32> to vector<4x128xf32>
    %240 = arith.addf %234, %239 : vector<4x128xf32>
    %c0_86 = arith.constant 0 : index
    %c0_87 = arith.constant 0 : index
    %241 = vector.load %arg16[%c0_86, %c0_87] : memref<32x128xf32, #tpu.memory_space<vmem>>, vector<32x128xf32>
    %cst_88 = arith.constant dense<0.000000e+00> : vector<4x128xf32>
    %242 = tpu.matmul %227, %241, %cst_88 {dimension_numbers = #tpu.dot_dimension_numbers<[1], [0], [0], [1], [0, 0, 1, 1], [], []>} : vector<4x32xf32>, vector<32x128xf32>, vector<4x128xf32> -> vector<4x128xf32>
    %243 = arith.addf %240, %242 : vector<4x128xf32>
    %244 = arith.negf %243 : vector<4x128xf32>
    %245 = math.exp %244 : vector<4x128xf32>
    %cst_89 = arith.constant 1.000000e+00 : f32
    %246 = vector.broadcast %cst_89 : f32 to vector<4x128xf32>
    %247 = arith.addf %246, %245 : vector<4x128xf32>
    %248 = arith.divf %246, %247 : vector<4x128xf32>
    %249 = math.tanh %243 : vector<4x128xf32>
    %250 = vector.extract_strided_slice %248 {offsets = [0, 0], sizes = [4, 32], strides = [1, 1]} : vector<4x128xf32> to vector<4x32xf32>
    %251 = vector.extract_strided_slice %248 {offsets = [0, 32], sizes = [4, 32], strides = [1, 1]} : vector<4x128xf32> to vector<4x32xf32>
    %252 = vector.extract_strided_slice %248 {offsets = [0, 64], sizes = [4, 32], strides = [1, 1]} : vector<4x128xf32> to vector<4x32xf32>
    %253 = vector.extract_strided_slice %249 {offsets = [0, 96], sizes = [4, 32], strides = [1, 1]} : vector<4x128xf32> to vector<4x32xf32>
    %254 = arith.mulf %251, %228 : vector<4x32xf32>
    %255 = arith.mulf %250, %253 : vector<4x32xf32>
    %256 = arith.addf %254, %255 : vector<4x32xf32>
    %257 = math.tanh %256 : vector<4x32xf32>
    %258 = arith.mulf %252, %257 : vector<4x32xf32>
    %cst_90 = arith.constant dense<0.000000e+00> : vector<4x128xf32>
    %259 = tpu.matmul %258, %237, %cst_90 {dimension_numbers = #tpu.dot_dimension_numbers<[1], [0], [0], [1], [0, 0, 1, 1], [], []>} : vector<4x32xf32>, vector<32x128xf32>, vector<4x128xf32> -> vector<4x128xf32>
    %260 = vector.broadcast %238 : vector<1x128xf32> to vector<4x128xf32>
    %261 = arith.addf %259, %260 : vector<4x128xf32>
    %c0_91 = arith.constant 0 : index
    %c0_92 = arith.constant 0 : index
    %262 = vector.load %arg21[%c0_91, %c0_92] : memref<64x128xf32, #tpu.memory_space<vmem>>, vector<4x128xf32>
    tpu.vector_store %arg21[%c0_91, %c0_92], %261 {strides = array<i32>} : memref<64x128xf32, #tpu.memory_space<vmem>>, vector<4x128xf32>,
    %263 = vector.extract_strided_slice %236 {offsets = [4, 0], sizes = [4, 128], strides = [1, 1]} : vector<64x128xf32> to vector<4x128xf32>
    %264 = arith.addf %234, %263 : vector<4x128xf32>
    %c0_93 = arith.constant 0 : index
    %c0_94 = arith.constant 0 : index
    %265 = vector.load %arg16[%c0_93, %c0_94] : memref<32x128xf32, #tpu.memory_space<vmem>>, vector<32x128xf32>
    %cst_95 = arith.constant dense<0.000000e+00> : vector<4x128xf32>
    %266 = tpu.matmul %258, %265, %cst_95 {dimension_numbers = #tpu.dot_dimension_numbers<[1], [0], [0], [1], [0, 0, 1, 1], [], []>} : vector<4x32xf32>, vector<32x128xf32>, vector<4x128xf32> -> vector<4x128xf32>
    %267 = arith.addf %264, %266 : vector<4x128xf32>
    %268 = arith.negf %267 : vector<4x128xf32>
    %269 = math.exp %268 : vector<4x128xf32>
    %cst_96 = arith.constant 1.000000e+00 : f32
    %270 = vector.broadcast %cst_96 : f32 to vector<4x128xf32>
    %271 = arith.addf %270, %269 : vector<4x128xf32>
    %272 = arith.divf %270, %271 : vector<4x128xf32>
    %273 = math.tanh %267 : vector<4x128xf32>
    %274 = vector.extract_strided_slice %272 {offsets = [0, 0], sizes = [4, 32], strides = [1, 1]} : vector<4x128xf32> to vector<4x32xf32>
    %275 = vector.extract_strided_slice %272 {offsets = [0, 32], sizes = [4, 32], strides = [1, 1]} : vector<4x128xf32> to vector<4x32xf32>
    %276 = vector.extract_strided_slice %272 {offsets = [0, 64], sizes = [4, 32], strides = [1, 1]} : vector<4x128xf32> to vector<4x32xf32>
    %277 = vector.extract_strided_slice %273 {offsets = [0, 96], sizes = [4, 32], strides = [1, 1]} : vector<4x128xf32> to vector<4x32xf32>
    %278 = arith.mulf %275, %256 : vector<4x32xf32>
    %279 = arith.mulf %274, %277 : vector<4x32xf32>
    %280 = arith.addf %278, %279 : vector<4x32xf32>
    %281 = math.tanh %280 : vector<4x32xf32>
    %282 = arith.mulf %276, %281 : vector<4x32xf32>
    %cst_97 = arith.constant dense<0.000000e+00> : vector<4x128xf32>
    %283 = tpu.matmul %282, %237, %cst_97 {dimension_numbers = #tpu.dot_dimension_numbers<[1], [0], [0], [1], [0, 0, 1, 1], [], []>} : vector<4x32xf32>, vector<32x128xf32>, vector<4x128xf32> -> vector<4x128xf32>
    %284 = vector.broadcast %238 : vector<1x128xf32> to vector<4x128xf32>
    %285 = arith.addf %283, %284 : vector<4x128xf32>
    %c4 = arith.constant 4 : index
    %c0_98 = arith.constant 0 : index
    %286 = vector.load %arg21[%c4, %c0_98] : memref<64x128xf32, #tpu.memory_space<vmem>>, vector<4x128xf32>
    tpu.vector_store %arg21[%c4, %c0_98], %285 {strides = array<i32>} : memref<64x128xf32, #tpu.memory_space<vmem>>, vector<4x128xf32>,
    %287 = vector.extract_strided_slice %236 {offsets = [8, 0], sizes = [4, 128], strides = [1, 1]} : vector<64x128xf32> to vector<4x128xf32>
    %288 = arith.addf %234, %287 : vector<4x128xf32>
    %c0_99 = arith.constant 0 : index
    %c0_100 = arith.constant 0 : index
    %289 = vector.load %arg16[%c0_99, %c0_100] : memref<32x128xf32, #tpu.memory_space<vmem>>, vector<32x128xf32>
    %cst_101 = arith.constant dense<0.000000e+00> : vector<4x128xf32>
    %290 = tpu.matmul %282, %289, %cst_101 {dimension_numbers = #tpu.dot_dimension_numbers<[1], [0], [0], [1], [0, 0, 1, 1], [], []>} : vector<4x32xf32>, vector<32x128xf32>, vector<4x128xf32> -> vector<4x128xf32>
    %291 = arith.addf %288, %290 : vector<4x128xf32>
    %292 = arith.negf %291 : vector<4x128xf32>
    %293 = math.exp %292 : vector<4x128xf32>
    %cst_102 = arith.constant 1.000000e+00 : f32
    %294 = vector.broadcast %cst_102 : f32 to vector<4x128xf32>
    %295 = arith.addf %294, %293 : vector<4x128xf32>
    %296 = arith.divf %294, %295 : vector<4x128xf32>
    %297 = math.tanh %291 : vector<4x128xf32>
    %298 = vector.extract_strided_slice %296 {offsets = [0, 0], sizes = [4, 32], strides = [1, 1]} : vector<4x128xf32> to vector<4x32xf32>
    %299 = vector.extract_strided_slice %296 {offsets = [0, 32], sizes = [4, 32], strides = [1, 1]} : vector<4x128xf32> to vector<4x32xf32>
    %300 = vector.extract_strided_slice %296 {offsets = [0, 64], sizes = [4, 32], strides = [1, 1]} : vector<4x128xf32> to vector<4x32xf32>
    %301 = vector.extract_strided_slice %297 {offsets = [0, 96], sizes = [4, 32], strides = [1, 1]} : vector<4x128xf32> to vector<4x32xf32>
    %302 = arith.mulf %299, %280 : vector<4x32xf32>
    %303 = arith.mulf %298, %301 : vector<4x32xf32>
    %304 = arith.addf %302, %303 : vector<4x32xf32>
    %305 = math.tanh %304 : vector<4x32xf32>
    %306 = arith.mulf %300, %305 : vector<4x32xf32>
    %cst_103 = arith.constant dense<0.000000e+00> : vector<4x128xf32>
    %307 = tpu.matmul %306, %237, %cst_103 {dimension_numbers = #tpu.dot_dimension_numbers<[1], [0], [0], [1], [0, 0, 1, 1], [], []>} : vector<4x32xf32>, vector<32x128xf32>, vector<4x128xf32> -> vector<4x128xf32>
    %308 = vector.broadcast %238 : vector<1x128xf32> to vector<4x128xf32>
    %309 = arith.addf %307, %308 : vector<4x128xf32>
    %c8 = arith.constant 8 : index
    %c0_104 = arith.constant 0 : index
    %310 = vector.load %arg21[%c8, %c0_104] : memref<64x128xf32, #tpu.memory_space<vmem>>, vector<4x128xf32>
    tpu.vector_store %arg21[%c8, %c0_104], %309 {strides = array<i32>} : memref<64x128xf32, #tpu.memory_space<vmem>>, vector<4x128xf32>,
    %311 = vector.extract_strided_slice %236 {offsets = [12, 0], sizes = [4, 128], strides = [1, 1]} : vector<64x128xf32> to vector<4x128xf32>
    %312 = arith.addf %234, %311 : vector<4x128xf32>
    %c0_105 = arith.constant 0 : index
    %c0_106 = arith.constant 0 : index
    %313 = vector.load %arg16[%c0_105, %c0_106] : memref<32x128xf32, #tpu.memory_space<vmem>>, vector<32x128xf32>
    %cst_107 = arith.constant dense<0.000000e+00> : vector<4x128xf32>
    %314 = tpu.matmul %306, %313, %cst_107 {dimension_numbers = #tpu.dot_dimension_numbers<[1], [0], [0], [1], [0, 0, 1, 1], [], []>} : vector<4x32xf32>, vector<32x128xf32>, vector<4x128xf32> -> vector<4x128xf32>
    %315 = arith.addf %312, %314 : vector<4x128xf32>
    %316 = arith.negf %315 : vector<4x128xf32>
    %317 = math.exp %316 : vector<4x128xf32>
    %cst_108 = arith.constant 1.000000e+00 : f32
    %318 = vector.broadcast %cst_108 : f32 to vector<4x128xf32>
    %319 = arith.addf %318, %317 : vector<4x128xf32>
    %320 = arith.divf %318, %319 : vector<4x128xf32>
    %321 = math.tanh %315 : vector<4x128xf32>
    %322 = vector.extract_strided_slice %320 {offsets = [0, 0], sizes = [4, 32], strides = [1, 1]} : vector<4x128xf32> to vector<4x32xf32>
    %323 = vector.extract_strided_slice %320 {offsets = [0, 32], sizes = [4, 32], strides = [1, 1]} : vector<4x128xf32> to vector<4x32xf32>
    %324 = vector.extract_strided_slice %320 {offsets = [0, 64], sizes = [4, 32], strides = [1, 1]} : vector<4x128xf32> to vector<4x32xf32>
    %325 = vector.extract_strided_slice %321 {offsets = [0, 96], sizes = [4, 32], strides = [1, 1]} : vector<4x128xf32> to vector<4x32xf32>
    %326 = arith.mulf %323, %304 : vector<4x32xf32>
    %327 = arith.mulf %322, %325 : vector<4x32xf32>
    %328 = arith.addf %326, %327 : vector<4x32xf32>
    %329 = math.tanh %328 : vector<4x32xf32>
    %330 = arith.mulf %324, %329 : vector<4x32xf32>
    %cst_109 = arith.constant dense<0.000000e+00> : vector<4x128xf32>
    %331 = tpu.matmul %330, %237, %cst_109 {dimension_numbers = #tpu.dot_dimension_numbers<[1], [0], [0], [1], [0, 0, 1, 1], [], []>} : vector<4x32xf32>, vector<32x128xf32>, vector<4x128xf32> -> vector<4x128xf32>
    %332 = vector.broadcast %238 : vector<1x128xf32> to vector<4x128xf32>
    %333 = arith.addf %331, %332 : vector<4x128xf32>
    %c12 = arith.constant 12 : index
    %c0_110 = arith.constant 0 : index
    %334 = vector.load %arg21[%c12, %c0_110] : memref<64x128xf32, #tpu.memory_space<vmem>>, vector<4x128xf32>
    tpu.vector_store %arg21[%c12, %c0_110], %333 {strides = array<i32>} : memref<64x128xf32, #tpu.memory_space<vmem>>, vector<4x128xf32>,
    %335 = vector.extract_strided_slice %236 {offsets = [16, 0], sizes = [4, 128], strides = [1, 1]} : vector<64x128xf32> to vector<4x128xf32>
    %336 = arith.addf %234, %335 : vector<4x128xf32>
    %c0_111 = arith.constant 0 : index
    %c0_112 = arith.constant 0 : index
    %337 = vector.load %arg16[%c0_111, %c0_112] : memref<32x128xf32, #tpu.memory_space<vmem>>, vector<32x128xf32>
    %cst_113 = arith.constant dense<0.000000e+00> : vector<4x128xf32>
    %338 = tpu.matmul %330, %337, %cst_113 {dimension_numbers = #tpu.dot_dimension_numbers<[1], [0], [0], [1], [0, 0, 1, 1], [], []>} : vector<4x32xf32>, vector<32x128xf32>, vector<4x128xf32> -> vector<4x128xf32>
    %339 = arith.addf %336, %338 : vector<4x128xf32>
    %340 = arith.negf %339 : vector<4x128xf32>
    %341 = math.exp %340 : vector<4x128xf32>
    %cst_114 = arith.constant 1.000000e+00 : f32
    %342 = vector.broadcast %cst_114 : f32 to vector<4x128xf32>
    %343 = arith.addf %342, %341 : vector<4x128xf32>
    %344 = arith.divf %342, %343 : vector<4x128xf32>
    %345 = math.tanh %339 : vector<4x128xf32>
    %346 = vector.extract_strided_slice %344 {offsets = [0, 0], sizes = [4, 32], strides = [1, 1]} : vector<4x128xf32> to vector<4x32xf32>
    %347 = vector.extract_strided_slice %344 {offsets = [0, 32], sizes = [4, 32], strides = [1, 1]} : vector<4x128xf32> to vector<4x32xf32>
    %348 = vector.extract_strided_slice %344 {offsets = [0, 64], sizes = [4, 32], strides = [1, 1]} : vector<4x128xf32> to vector<4x32xf32>
    %349 = vector.extract_strided_slice %345 {offsets = [0, 96], sizes = [4, 32], strides = [1, 1]} : vector<4x128xf32> to vector<4x32xf32>
    %350 = arith.mulf %347, %328 : vector<4x32xf32>
    %351 = arith.mulf %346, %349 : vector<4x32xf32>
    %352 = arith.addf %350, %351 : vector<4x32xf32>
    %353 = math.tanh %352 : vector<4x32xf32>
    %354 = arith.mulf %348, %353 : vector<4x32xf32>
    %cst_115 = arith.constant dense<0.000000e+00> : vector<4x128xf32>
    %355 = tpu.matmul %354, %237, %cst_115 {dimension_numbers = #tpu.dot_dimension_numbers<[1], [0], [0], [1], [0, 0, 1, 1], [], []>} : vector<4x32xf32>, vector<32x128xf32>, vector<4x128xf32> -> vector<4x128xf32>
    %356 = vector.broadcast %238 : vector<1x128xf32> to vector<4x128xf32>
    %357 = arith.addf %355, %356 : vector<4x128xf32>
    %c16 = arith.constant 16 : index
    %c0_116 = arith.constant 0 : index
    %358 = vector.load %arg21[%c16, %c0_116] : memref<64x128xf32, #tpu.memory_space<vmem>>, vector<4x128xf32>
    tpu.vector_store %arg21[%c16, %c0_116], %357 {strides = array<i32>} : memref<64x128xf32, #tpu.memory_space<vmem>>, vector<4x128xf32>,
    %359 = vector.extract_strided_slice %236 {offsets = [20, 0], sizes = [4, 128], strides = [1, 1]} : vector<64x128xf32> to vector<4x128xf32>
    %360 = arith.addf %234, %359 : vector<4x128xf32>
    %c0_117 = arith.constant 0 : index
    %c0_118 = arith.constant 0 : index
    %361 = vector.load %arg16[%c0_117, %c0_118] : memref<32x128xf32, #tpu.memory_space<vmem>>, vector<32x128xf32>
    %cst_119 = arith.constant dense<0.000000e+00> : vector<4x128xf32>
    %362 = tpu.matmul %354, %361, %cst_119 {dimension_numbers = #tpu.dot_dimension_numbers<[1], [0], [0], [1], [0, 0, 1, 1], [], []>} : vector<4x32xf32>, vector<32x128xf32>, vector<4x128xf32> -> vector<4x128xf32>
    %363 = arith.addf %360, %362 : vector<4x128xf32>
    %364 = arith.negf %363 : vector<4x128xf32>
    %365 = math.exp %364 : vector<4x128xf32>
    %cst_120 = arith.constant 1.000000e+00 : f32
    %366 = vector.broadcast %cst_120 : f32 to vector<4x128xf32>
    %367 = arith.addf %366, %365 : vector<4x128xf32>
    %368 = arith.divf %366, %367 : vector<4x128xf32>
    %369 = math.tanh %363 : vector<4x128xf32>
    %370 = vector.extract_strided_slice %368 {offsets = [0, 0], sizes = [4, 32], strides = [1, 1]} : vector<4x128xf32> to vector<4x32xf32>
    %371 = vector.extract_strided_slice %368 {offsets = [0, 32], sizes = [4, 32], strides = [1, 1]} : vector<4x128xf32> to vector<4x32xf32>
    %372 = vector.extract_strided_slice %368 {offsets = [0, 64], sizes = [4, 32], strides = [1, 1]} : vector<4x128xf32> to vector<4x32xf32>
    %373 = vector.extract_strided_slice %369 {offsets = [0, 96], sizes = [4, 32], strides = [1, 1]} : vector<4x128xf32> to vector<4x32xf32>
    %374 = arith.mulf %371, %352 : vector<4x32xf32>
    %375 = arith.mulf %370, %373 : vector<4x32xf32>
    %376 = arith.addf %374, %375 : vector<4x32xf32>
    %377 = math.tanh %376 : vector<4x32xf32>
    %378 = arith.mulf %372, %377 : vector<4x32xf32>
    %cst_121 = arith.constant dense<0.000000e+00> : vector<4x128xf32>
    %379 = tpu.matmul %378, %237, %cst_121 {dimension_numbers = #tpu.dot_dimension_numbers<[1], [0], [0], [1], [0, 0, 1, 1], [], []>} : vector<4x32xf32>, vector<32x128xf32>, vector<4x128xf32> -> vector<4x128xf32>
    %380 = vector.broadcast %238 : vector<1x128xf32> to vector<4x128xf32>
    %381 = arith.addf %379, %380 : vector<4x128xf32>
    %c20 = arith.constant 20 : index
    %c0_122 = arith.constant 0 : index
    %382 = vector.load %arg21[%c20, %c0_122] : memref<64x128xf32, #tpu.memory_space<vmem>>, vector<4x128xf32>
    tpu.vector_store %arg21[%c20, %c0_122], %381 {strides = array<i32>} : memref<64x128xf32, #tpu.memory_space<vmem>>, vector<4x128xf32>,
    %383 = vector.extract_strided_slice %236 {offsets = [24, 0], sizes = [4, 128], strides = [1, 1]} : vector<64x128xf32> to vector<4x128xf32>
    %384 = arith.addf %234, %383 : vector<4x128xf32>
    %c0_123 = arith.constant 0 : index
    %c0_124 = arith.constant 0 : index
    %385 = vector.load %arg16[%c0_123, %c0_124] : memref<32x128xf32, #tpu.memory_space<vmem>>, vector<32x128xf32>
    %cst_125 = arith.constant dense<0.000000e+00> : vector<4x128xf32>
    %386 = tpu.matmul %378, %385, %cst_125 {dimension_numbers = #tpu.dot_dimension_numbers<[1], [0], [0], [1], [0, 0, 1, 1], [], []>} : vector<4x32xf32>, vector<32x128xf32>, vector<4x128xf32> -> vector<4x128xf32>
    %387 = arith.addf %384, %386 : vector<4x128xf32>
    %388 = arith.negf %387 : vector<4x128xf32>
    %389 = math.exp %388 : vector<4x128xf32>
    %cst_126 = arith.constant 1.000000e+00 : f32
    %390 = vector.broadcast %cst_126 : f32 to vector<4x128xf32>
    %391 = arith.addf %390, %389 : vector<4x128xf32>
    %392 = arith.divf %390, %391 : vector<4x128xf32>
    %393 = math.tanh %387 : vector<4x128xf32>
    %394 = vector.extract_strided_slice %392 {offsets = [0, 0], sizes = [4, 32], strides = [1, 1]} : vector<4x128xf32> to vector<4x32xf32>
    %395 = vector.extract_strided_slice %392 {offsets = [0, 32], sizes = [4, 32], strides = [1, 1]} : vector<4x128xf32> to vector<4x32xf32>
    %396 = vector.extract_strided_slice %392 {offsets = [0, 64], sizes = [4, 32], strides = [1, 1]} : vector<4x128xf32> to vector<4x32xf32>
    %397 = vector.extract_strided_slice %393 {offsets = [0, 96], sizes = [4, 32], strides = [1, 1]} : vector<4x128xf32> to vector<4x32xf32>
    %398 = arith.mulf %395, %376 : vector<4x32xf32>
    %399 = arith.mulf %394, %397 : vector<4x32xf32>
    %400 = arith.addf %398, %399 : vector<4x32xf32>
    %401 = math.tanh %400 : vector<4x32xf32>
    %402 = arith.mulf %396, %401 : vector<4x32xf32>
    %cst_127 = arith.constant dense<0.000000e+00> : vector<4x128xf32>
    %403 = tpu.matmul %402, %237, %cst_127 {dimension_numbers = #tpu.dot_dimension_numbers<[1], [0], [0], [1], [0, 0, 1, 1], [], []>} : vector<4x32xf32>, vector<32x128xf32>, vector<4x128xf32> -> vector<4x128xf32>
    %404 = vector.broadcast %238 : vector<1x128xf32> to vector<4x128xf32>
    %405 = arith.addf %403, %404 : vector<4x128xf32>
    %c24 = arith.constant 24 : index
    %c0_128 = arith.constant 0 : index
    %406 = vector.load %arg21[%c24, %c0_128] : memref<64x128xf32, #tpu.memory_space<vmem>>, vector<4x128xf32>
    tpu.vector_store %arg21[%c24, %c0_128], %405 {strides = array<i32>} : memref<64x128xf32, #tpu.memory_space<vmem>>, vector<4x128xf32>,
    %407 = vector.extract_strided_slice %236 {offsets = [28, 0], sizes = [4, 128], strides = [1, 1]} : vector<64x128xf32> to vector<4x128xf32>
    %408 = arith.addf %234, %407 : vector<4x128xf32>
    %c0_129 = arith.constant 0 : index
    %c0_130 = arith.constant 0 : index
    %409 = vector.load %arg16[%c0_129, %c0_130] : memref<32x128xf32, #tpu.memory_space<vmem>>, vector<32x128xf32>
    %cst_131 = arith.constant dense<0.000000e+00> : vector<4x128xf32>
    %410 = tpu.matmul %402, %409, %cst_131 {dimension_numbers = #tpu.dot_dimension_numbers<[1], [0], [0], [1], [0, 0, 1, 1], [], []>} : vector<4x32xf32>, vector<32x128xf32>, vector<4x128xf32> -> vector<4x128xf32>
    %411 = arith.addf %408, %410 : vector<4x128xf32>
    %412 = arith.negf %411 : vector<4x128xf32>
    %413 = math.exp %412 : vector<4x128xf32>
    %cst_132 = arith.constant 1.000000e+00 : f32
    %414 = vector.broadcast %cst_132 : f32 to vector<4x128xf32>
    %415 = arith.addf %414, %413 : vector<4x128xf32>
    %416 = arith.divf %414, %415 : vector<4x128xf32>
    %417 = math.tanh %411 : vector<4x128xf32>
    %418 = vector.extract_strided_slice %416 {offsets = [0, 0], sizes = [4, 32], strides = [1, 1]} : vector<4x128xf32> to vector<4x32xf32>
    %419 = vector.extract_strided_slice %416 {offsets = [0, 32], sizes = [4, 32], strides = [1, 1]} : vector<4x128xf32> to vector<4x32xf32>
    %420 = vector.extract_strided_slice %416 {offsets = [0, 64], sizes = [4, 32], strides = [1, 1]} : vector<4x128xf32> to vector<4x32xf32>
    %421 = vector.extract_strided_slice %417 {offsets = [0, 96], sizes = [4, 32], strides = [1, 1]} : vector<4x128xf32> to vector<4x32xf32>
    %422 = arith.mulf %419, %400 : vector<4x32xf32>
    %423 = arith.mulf %418, %421 : vector<4x32xf32>
    %424 = arith.addf %422, %423 : vector<4x32xf32>
    %425 = math.tanh %424 : vector<4x32xf32>
    %426 = arith.mulf %420, %425 : vector<4x32xf32>
    %cst_133 = arith.constant dense<0.000000e+00> : vector<4x128xf32>
    %427 = tpu.matmul %426, %237, %cst_133 {dimension_numbers = #tpu.dot_dimension_numbers<[1], [0], [0], [1], [0, 0, 1, 1], [], []>} : vector<4x32xf32>, vector<32x128xf32>, vector<4x128xf32> -> vector<4x128xf32>
    %428 = vector.broadcast %238 : vector<1x128xf32> to vector<4x128xf32>
    %429 = arith.addf %427, %428 : vector<4x128xf32>
    %c28 = arith.constant 28 : index
    %c0_134 = arith.constant 0 : index
    %430 = vector.load %arg21[%c28, %c0_134] : memref<64x128xf32, #tpu.memory_space<vmem>>, vector<4x128xf32>
    tpu.vector_store %arg21[%c28, %c0_134], %429 {strides = array<i32>} : memref<64x128xf32, #tpu.memory_space<vmem>>, vector<4x128xf32>,
    %431 = vector.extract_strided_slice %236 {offsets = [32, 0], sizes = [4, 128], strides = [1, 1]} : vector<64x128xf32> to vector<4x128xf32>
    %432 = arith.addf %234, %431 : vector<4x128xf32>
    %c0_135 = arith.constant 0 : index
    %c0_136 = arith.constant 0 : index
    %433 = vector.load %arg16[%c0_135, %c0_136] : memref<32x128xf32, #tpu.memory_space<vmem>>, vector<32x128xf32>
    %cst_137 = arith.constant dense<0.000000e+00> : vector<4x128xf32>
    %434 = tpu.matmul %426, %433, %cst_137 {dimension_numbers = #tpu.dot_dimension_numbers<[1], [0], [0], [1], [0, 0, 1, 1], [], []>} : vector<4x32xf32>, vector<32x128xf32>, vector<4x128xf32> -> vector<4x128xf32>
    %435 = arith.addf %432, %434 : vector<4x128xf32>
    %436 = arith.negf %435 : vector<4x128xf32>
    %437 = math.exp %436 : vector<4x128xf32>
    %cst_138 = arith.constant 1.000000e+00 : f32
    %438 = vector.broadcast %cst_138 : f32 to vector<4x128xf32>
    %439 = arith.addf %438, %437 : vector<4x128xf32>
    %440 = arith.divf %438, %439 : vector<4x128xf32>
    %441 = math.tanh %435 : vector<4x128xf32>
    %442 = vector.extract_strided_slice %440 {offsets = [0, 0], sizes = [4, 32], strides = [1, 1]} : vector<4x128xf32> to vector<4x32xf32>
    %443 = vector.extract_strided_slice %440 {offsets = [0, 32], sizes = [4, 32], strides = [1, 1]} : vector<4x128xf32> to vector<4x32xf32>
    %444 = vector.extract_strided_slice %440 {offsets = [0, 64], sizes = [4, 32], strides = [1, 1]} : vector<4x128xf32> to vector<4x32xf32>
    %445 = vector.extract_strided_slice %441 {offsets = [0, 96], sizes = [4, 32], strides = [1, 1]} : vector<4x128xf32> to vector<4x32xf32>
    %446 = arith.mulf %443, %424 : vector<4x32xf32>
    %447 = arith.mulf %442, %445 : vector<4x32xf32>
    %448 = arith.addf %446, %447 : vector<4x32xf32>
    %449 = math.tanh %448 : vector<4x32xf32>
    %450 = arith.mulf %444, %449 : vector<4x32xf32>
    %cst_139 = arith.constant dense<0.000000e+00> : vector<4x128xf32>
    %451 = tpu.matmul %450, %237, %cst_139 {dimension_numbers = #tpu.dot_dimension_numbers<[1], [0], [0], [1], [0, 0, 1, 1], [], []>} : vector<4x32xf32>, vector<32x128xf32>, vector<4x128xf32> -> vector<4x128xf32>
    %452 = vector.broadcast %238 : vector<1x128xf32> to vector<4x128xf32>
    %453 = arith.addf %451, %452 : vector<4x128xf32>
    %c32_140 = arith.constant 32 : index
    %c0_141 = arith.constant 0 : index
    %454 = vector.load %arg21[%c32_140, %c0_141] : memref<64x128xf32, #tpu.memory_space<vmem>>, vector<4x128xf32>
    tpu.vector_store %arg21[%c32_140, %c0_141], %453 {strides = array<i32>} : memref<64x128xf32, #tpu.memory_space<vmem>>, vector<4x128xf32>,
    %455 = vector.extract_strided_slice %236 {offsets = [36, 0], sizes = [4, 128], strides = [1, 1]} : vector<64x128xf32> to vector<4x128xf32>
    %456 = arith.addf %234, %455 : vector<4x128xf32>
    %c0_142 = arith.constant 0 : index
    %c0_143 = arith.constant 0 : index
    %457 = vector.load %arg16[%c0_142, %c0_143] : memref<32x128xf32, #tpu.memory_space<vmem>>, vector<32x128xf32>
    %cst_144 = arith.constant dense<0.000000e+00> : vector<4x128xf32>
    %458 = tpu.matmul %450, %457, %cst_144 {dimension_numbers = #tpu.dot_dimension_numbers<[1], [0], [0], [1], [0, 0, 1, 1], [], []>} : vector<4x32xf32>, vector<32x128xf32>, vector<4x128xf32> -> vector<4x128xf32>
    %459 = arith.addf %456, %458 : vector<4x128xf32>
    %460 = arith.negf %459 : vector<4x128xf32>
    %461 = math.exp %460 : vector<4x128xf32>
    %cst_145 = arith.constant 1.000000e+00 : f32
    %462 = vector.broadcast %cst_145 : f32 to vector<4x128xf32>
    %463 = arith.addf %462, %461 : vector<4x128xf32>
    %464 = arith.divf %462, %463 : vector<4x128xf32>
    %465 = math.tanh %459 : vector<4x128xf32>
    %466 = vector.extract_strided_slice %464 {offsets = [0, 0], sizes = [4, 32], strides = [1, 1]} : vector<4x128xf32> to vector<4x32xf32>
    %467 = vector.extract_strided_slice %464 {offsets = [0, 32], sizes = [4, 32], strides = [1, 1]} : vector<4x128xf32> to vector<4x32xf32>
    %468 = vector.extract_strided_slice %464 {offsets = [0, 64], sizes = [4, 32], strides = [1, 1]} : vector<4x128xf32> to vector<4x32xf32>
    %469 = vector.extract_strided_slice %465 {offsets = [0, 96], sizes = [4, 32], strides = [1, 1]} : vector<4x128xf32> to vector<4x32xf32>
    %470 = arith.mulf %467, %448 : vector<4x32xf32>
    %471 = arith.mulf %466, %469 : vector<4x32xf32>
    %472 = arith.addf %470, %471 : vector<4x32xf32>
    %473 = math.tanh %472 : vector<4x32xf32>
    %474 = arith.mulf %468, %473 : vector<4x32xf32>
    %cst_146 = arith.constant dense<0.000000e+00> : vector<4x128xf32>
    %475 = tpu.matmul %474, %237, %cst_146 {dimension_numbers = #tpu.dot_dimension_numbers<[1], [0], [0], [1], [0, 0, 1, 1], [], []>} : vector<4x32xf32>, vector<32x128xf32>, vector<4x128xf32> -> vector<4x128xf32>
    %476 = vector.broadcast %238 : vector<1x128xf32> to vector<4x128xf32>
    %477 = arith.addf %475, %476 : vector<4x128xf32>
    %c36 = arith.constant 36 : index
    %c0_147 = arith.constant 0 : index
    %478 = vector.load %arg21[%c36, %c0_147] : memref<64x128xf32, #tpu.memory_space<vmem>>, vector<4x128xf32>
    tpu.vector_store %arg21[%c36, %c0_147], %477 {strides = array<i32>} : memref<64x128xf32, #tpu.memory_space<vmem>>, vector<4x128xf32>,
    %479 = vector.extract_strided_slice %236 {offsets = [40, 0], sizes = [4, 128], strides = [1, 1]} : vector<64x128xf32> to vector<4x128xf32>
    %480 = arith.addf %234, %479 : vector<4x128xf32>
    %c0_148 = arith.constant 0 : index
    %c0_149 = arith.constant 0 : index
    %481 = vector.load %arg16[%c0_148, %c0_149] : memref<32x128xf32, #tpu.memory_space<vmem>>, vector<32x128xf32>
    %cst_150 = arith.constant dense<0.000000e+00> : vector<4x128xf32>
    %482 = tpu.matmul %474, %481, %cst_150 {dimension_numbers = #tpu.dot_dimension_numbers<[1], [0], [0], [1], [0, 0, 1, 1], [], []>} : vector<4x32xf32>, vector<32x128xf32>, vector<4x128xf32> -> vector<4x128xf32>
    %483 = arith.addf %480, %482 : vector<4x128xf32>
    %484 = arith.negf %483 : vector<4x128xf32>
    %485 = math.exp %484 : vector<4x128xf32>
    %cst_151 = arith.constant 1.000000e+00 : f32
    %486 = vector.broadcast %cst_151 : f32 to vector<4x128xf32>
    %487 = arith.addf %486, %485 : vector<4x128xf32>
    %488 = arith.divf %486, %487 : vector<4x128xf32>
    %489 = math.tanh %483 : vector<4x128xf32>
    %490 = vector.extract_strided_slice %488 {offsets = [0, 0], sizes = [4, 32], strides = [1, 1]} : vector<4x128xf32> to vector<4x32xf32>
    %491 = vector.extract_strided_slice %488 {offsets = [0, 32], sizes = [4, 32], strides = [1, 1]} : vector<4x128xf32> to vector<4x32xf32>
    %492 = vector.extract_strided_slice %488 {offsets = [0, 64], sizes = [4, 32], strides = [1, 1]} : vector<4x128xf32> to vector<4x32xf32>
    %493 = vector.extract_strided_slice %489 {offsets = [0, 96], sizes = [4, 32], strides = [1, 1]} : vector<4x128xf32> to vector<4x32xf32>
    %494 = arith.mulf %491, %472 : vector<4x32xf32>
    %495 = arith.mulf %490, %493 : vector<4x32xf32>
    %496 = arith.addf %494, %495 : vector<4x32xf32>
    %497 = math.tanh %496 : vector<4x32xf32>
    %498 = arith.mulf %492, %497 : vector<4x32xf32>
    %cst_152 = arith.constant dense<0.000000e+00> : vector<4x128xf32>
    %499 = tpu.matmul %498, %237, %cst_152 {dimension_numbers = #tpu.dot_dimension_numbers<[1], [0], [0], [1], [0, 0, 1, 1], [], []>} : vector<4x32xf32>, vector<32x128xf32>, vector<4x128xf32> -> vector<4x128xf32>
    %500 = vector.broadcast %238 : vector<1x128xf32> to vector<4x128xf32>
    %501 = arith.addf %499, %500 : vector<4x128xf32>
    %c40 = arith.constant 40 : index
    %c0_153 = arith.constant 0 : index
    %502 = vector.load %arg21[%c40, %c0_153] : memref<64x128xf32, #tpu.memory_space<vmem>>, vector<4x128xf32>
    tpu.vector_store %arg21[%c40, %c0_153], %501 {strides = array<i32>} : memref<64x128xf32, #tpu.memory_space<vmem>>, vector<4x128xf32>,
    %503 = vector.extract_strided_slice %236 {offsets = [44, 0], sizes = [4, 128], strides = [1, 1]} : vector<64x128xf32> to vector<4x128xf32>
    %504 = arith.addf %234, %503 : vector<4x128xf32>
    %c0_154 = arith.constant 0 : index
    %c0_155 = arith.constant 0 : index
    %505 = vector.load %arg16[%c0_154, %c0_155] : memref<32x128xf32, #tpu.memory_space<vmem>>, vector<32x128xf32>
    %cst_156 = arith.constant dense<0.000000e+00> : vector<4x128xf32>
    %506 = tpu.matmul %498, %505, %cst_156 {dimension_numbers = #tpu.dot_dimension_numbers<[1], [0], [0], [1], [0, 0, 1, 1], [], []>} : vector<4x32xf32>, vector<32x128xf32>, vector<4x128xf32> -> vector<4x128xf32>
    %507 = arith.addf %504, %506 : vector<4x128xf32>
    %508 = arith.negf %507 : vector<4x128xf32>
    %509 = math.exp %508 : vector<4x128xf32>
    %cst_157 = arith.constant 1.000000e+00 : f32
    %510 = vector.broadcast %cst_157 : f32 to vector<4x128xf32>
    %511 = arith.addf %510, %509 : vector<4x128xf32>
    %512 = arith.divf %510, %511 : vector<4x128xf32>
    %513 = math.tanh %507 : vector<4x128xf32>
    %514 = vector.extract_strided_slice %512 {offsets = [0, 0], sizes = [4, 32], strides = [1, 1]} : vector<4x128xf32> to vector<4x32xf32>
    %515 = vector.extract_strided_slice %512 {offsets = [0, 32], sizes = [4, 32], strides = [1, 1]} : vector<4x128xf32> to vector<4x32xf32>
    %516 = vector.extract_strided_slice %512 {offsets = [0, 64], sizes = [4, 32], strides = [1, 1]} : vector<4x128xf32> to vector<4x32xf32>
    %517 = vector.extract_strided_slice %513 {offsets = [0, 96], sizes = [4, 32], strides = [1, 1]} : vector<4x128xf32> to vector<4x32xf32>
    %518 = arith.mulf %515, %496 : vector<4x32xf32>
    %519 = arith.mulf %514, %517 : vector<4x32xf32>
    %520 = arith.addf %518, %519 : vector<4x32xf32>
    %521 = math.tanh %520 : vector<4x32xf32>
    %522 = arith.mulf %516, %521 : vector<4x32xf32>
    %cst_158 = arith.constant dense<0.000000e+00> : vector<4x128xf32>
    %523 = tpu.matmul %522, %237, %cst_158 {dimension_numbers = #tpu.dot_dimension_numbers<[1], [0], [0], [1], [0, 0, 1, 1], [], []>} : vector<4x32xf32>, vector<32x128xf32>, vector<4x128xf32> -> vector<4x128xf32>
    %524 = vector.broadcast %238 : vector<1x128xf32> to vector<4x128xf32>
    %525 = arith.addf %523, %524 : vector<4x128xf32>
    %c44 = arith.constant 44 : index
    %c0_159 = arith.constant 0 : index
    %526 = vector.load %arg21[%c44, %c0_159] : memref<64x128xf32, #tpu.memory_space<vmem>>, vector<4x128xf32>
    tpu.vector_store %arg21[%c44, %c0_159], %525 {strides = array<i32>} : memref<64x128xf32, #tpu.memory_space<vmem>>, vector<4x128xf32>,
    %527 = vector.extract_strided_slice %236 {offsets = [48, 0], sizes = [4, 128], strides = [1, 1]} : vector<64x128xf32> to vector<4x128xf32>
    %528 = arith.addf %234, %527 : vector<4x128xf32>
    %c0_160 = arith.constant 0 : index
    %c0_161 = arith.constant 0 : index
    %529 = vector.load %arg16[%c0_160, %c0_161] : memref<32x128xf32, #tpu.memory_space<vmem>>, vector<32x128xf32>
    %cst_162 = arith.constant dense<0.000000e+00> : vector<4x128xf32>
    %530 = tpu.matmul %522, %529, %cst_162 {dimension_numbers = #tpu.dot_dimension_numbers<[1], [0], [0], [1], [0, 0, 1, 1], [], []>} : vector<4x32xf32>, vector<32x128xf32>, vector<4x128xf32> -> vector<4x128xf32>
    %531 = arith.addf %528, %530 : vector<4x128xf32>
    %532 = arith.negf %531 : vector<4x128xf32>
    %533 = math.exp %532 : vector<4x128xf32>
    %cst_163 = arith.constant 1.000000e+00 : f32
    %534 = vector.broadcast %cst_163 : f32 to vector<4x128xf32>
    %535 = arith.addf %534, %533 : vector<4x128xf32>
    %536 = arith.divf %534, %535 : vector<4x128xf32>
    %537 = math.tanh %531 : vector<4x128xf32>
    %538 = vector.extract_strided_slice %536 {offsets = [0, 0], sizes = [4, 32], strides = [1, 1]} : vector<4x128xf32> to vector<4x32xf32>
    %539 = vector.extract_strided_slice %536 {offsets = [0, 32], sizes = [4, 32], strides = [1, 1]} : vector<4x128xf32> to vector<4x32xf32>
    %540 = vector.extract_strided_slice %536 {offsets = [0, 64], sizes = [4, 32], strides = [1, 1]} : vector<4x128xf32> to vector<4x32xf32>
    %541 = vector.extract_strided_slice %537 {offsets = [0, 96], sizes = [4, 32], strides = [1, 1]} : vector<4x128xf32> to vector<4x32xf32>
    %542 = arith.mulf %539, %520 : vector<4x32xf32>
    %543 = arith.mulf %538, %541 : vector<4x32xf32>
    %544 = arith.addf %542, %543 : vector<4x32xf32>
    %545 = math.tanh %544 : vector<4x32xf32>
    %546 = arith.mulf %540, %545 : vector<4x32xf32>
    %cst_164 = arith.constant dense<0.000000e+00> : vector<4x128xf32>
    %547 = tpu.matmul %546, %237, %cst_164 {dimension_numbers = #tpu.dot_dimension_numbers<[1], [0], [0], [1], [0, 0, 1, 1], [], []>} : vector<4x32xf32>, vector<32x128xf32>, vector<4x128xf32> -> vector<4x128xf32>
    %548 = vector.broadcast %238 : vector<1x128xf32> to vector<4x128xf32>
    %549 = arith.addf %547, %548 : vector<4x128xf32>
    %c48 = arith.constant 48 : index
    %c0_165 = arith.constant 0 : index
    %550 = vector.load %arg21[%c48, %c0_165] : memref<64x128xf32, #tpu.memory_space<vmem>>, vector<4x128xf32>
    tpu.vector_store %arg21[%c48, %c0_165], %549 {strides = array<i32>} : memref<64x128xf32, #tpu.memory_space<vmem>>, vector<4x128xf32>,
    %551 = vector.extract_strided_slice %236 {offsets = [52, 0], sizes = [4, 128], strides = [1, 1]} : vector<64x128xf32> to vector<4x128xf32>
    %552 = arith.addf %234, %551 : vector<4x128xf32>
    %c0_166 = arith.constant 0 : index
    %c0_167 = arith.constant 0 : index
    %553 = vector.load %arg16[%c0_166, %c0_167] : memref<32x128xf32, #tpu.memory_space<vmem>>, vector<32x128xf32>
    %cst_168 = arith.constant dense<0.000000e+00> : vector<4x128xf32>
    %554 = tpu.matmul %546, %553, %cst_168 {dimension_numbers = #tpu.dot_dimension_numbers<[1], [0], [0], [1], [0, 0, 1, 1], [], []>} : vector<4x32xf32>, vector<32x128xf32>, vector<4x128xf32> -> vector<4x128xf32>
    %555 = arith.addf %552, %554 : vector<4x128xf32>
    %556 = arith.negf %555 : vector<4x128xf32>
    %557 = math.exp %556 : vector<4x128xf32>
    %cst_169 = arith.constant 1.000000e+00 : f32
    %558 = vector.broadcast %cst_169 : f32 to vector<4x128xf32>
    %559 = arith.addf %558, %557 : vector<4x128xf32>
    %560 = arith.divf %558, %559 : vector<4x128xf32>
    %561 = math.tanh %555 : vector<4x128xf32>
    %562 = vector.extract_strided_slice %560 {offsets = [0, 0], sizes = [4, 32], strides = [1, 1]} : vector<4x128xf32> to vector<4x32xf32>
    %563 = vector.extract_strided_slice %560 {offsets = [0, 32], sizes = [4, 32], strides = [1, 1]} : vector<4x128xf32> to vector<4x32xf32>
    %564 = vector.extract_strided_slice %560 {offsets = [0, 64], sizes = [4, 32], strides = [1, 1]} : vector<4x128xf32> to vector<4x32xf32>
    %565 = vector.extract_strided_slice %561 {offsets = [0, 96], sizes = [4, 32], strides = [1, 1]} : vector<4x128xf32> to vector<4x32xf32>
    %566 = arith.mulf %563, %544 : vector<4x32xf32>
    %567 = arith.mulf %562, %565 : vector<4x32xf32>
    %568 = arith.addf %566, %567 : vector<4x32xf32>
    %569 = math.tanh %568 : vector<4x32xf32>
    %570 = arith.mulf %564, %569 : vector<4x32xf32>
    %cst_170 = arith.constant dense<0.000000e+00> : vector<4x128xf32>
    %571 = tpu.matmul %570, %237, %cst_170 {dimension_numbers = #tpu.dot_dimension_numbers<[1], [0], [0], [1], [0, 0, 1, 1], [], []>} : vector<4x32xf32>, vector<32x128xf32>, vector<4x128xf32> -> vector<4x128xf32>
    %572 = vector.broadcast %238 : vector<1x128xf32> to vector<4x128xf32>
    %573 = arith.addf %571, %572 : vector<4x128xf32>
    %c52 = arith.constant 52 : index
    %c0_171 = arith.constant 0 : index
    %574 = vector.load %arg21[%c52, %c0_171] : memref<64x128xf32, #tpu.memory_space<vmem>>, vector<4x128xf32>
    tpu.vector_store %arg21[%c52, %c0_171], %573 {strides = array<i32>} : memref<64x128xf32, #tpu.memory_space<vmem>>, vector<4x128xf32>,
    %575 = vector.extract_strided_slice %236 {offsets = [56, 0], sizes = [4, 128], strides = [1, 1]} : vector<64x128xf32> to vector<4x128xf32>
    %576 = arith.addf %234, %575 : vector<4x128xf32>
    %c0_172 = arith.constant 0 : index
    %c0_173 = arith.constant 0 : index
    %577 = vector.load %arg16[%c0_172, %c0_173] : memref<32x128xf32, #tpu.memory_space<vmem>>, vector<32x128xf32>
    %cst_174 = arith.constant dense<0.000000e+00> : vector<4x128xf32>
    %578 = tpu.matmul %570, %577, %cst_174 {dimension_numbers = #tpu.dot_dimension_numbers<[1], [0], [0], [1], [0, 0, 1, 1], [], []>} : vector<4x32xf32>, vector<32x128xf32>, vector<4x128xf32> -> vector<4x128xf32>
    %579 = arith.addf %576, %578 : vector<4x128xf32>
    %580 = arith.negf %579 : vector<4x128xf32>
    %581 = math.exp %580 : vector<4x128xf32>
    %cst_175 = arith.constant 1.000000e+00 : f32
    %582 = vector.broadcast %cst_175 : f32 to vector<4x128xf32>
    %583 = arith.addf %582, %581 : vector<4x128xf32>
    %584 = arith.divf %582, %583 : vector<4x128xf32>
    %585 = math.tanh %579 : vector<4x128xf32>
    %586 = vector.extract_strided_slice %584 {offsets = [0, 0], sizes = [4, 32], strides = [1, 1]} : vector<4x128xf32> to vector<4x32xf32>
    %587 = vector.extract_strided_slice %584 {offsets = [0, 32], sizes = [4, 32], strides = [1, 1]} : vector<4x128xf32> to vector<4x32xf32>
    %588 = vector.extract_strided_slice %584 {offsets = [0, 64], sizes = [4, 32], strides = [1, 1]} : vector<4x128xf32> to vector<4x32xf32>
    %589 = vector.extract_strided_slice %585 {offsets = [0, 96], sizes = [4, 32], strides = [1, 1]} : vector<4x128xf32> to vector<4x32xf32>
    %590 = arith.mulf %587, %568 : vector<4x32xf32>
    %591 = arith.mulf %586, %589 : vector<4x32xf32>
    %592 = arith.addf %590, %591 : vector<4x32xf32>
    %593 = math.tanh %592 : vector<4x32xf32>
    %594 = arith.mulf %588, %593 : vector<4x32xf32>
    %cst_176 = arith.constant dense<0.000000e+00> : vector<4x128xf32>
    %595 = tpu.matmul %594, %237, %cst_176 {dimension_numbers = #tpu.dot_dimension_numbers<[1], [0], [0], [1], [0, 0, 1, 1], [], []>} : vector<4x32xf32>, vector<32x128xf32>, vector<4x128xf32> -> vector<4x128xf32>
    %596 = vector.broadcast %238 : vector<1x128xf32> to vector<4x128xf32>
    %597 = arith.addf %595, %596 : vector<4x128xf32>
    %c56 = arith.constant 56 : index
    %c0_177 = arith.constant 0 : index
    %598 = vector.load %arg21[%c56, %c0_177] : memref<64x128xf32, #tpu.memory_space<vmem>>, vector<4x128xf32>
    tpu.vector_store %arg21[%c56, %c0_177], %597 {strides = array<i32>} : memref<64x128xf32, #tpu.memory_space<vmem>>, vector<4x128xf32>,
    %599 = vector.extract_strided_slice %236 {offsets = [60, 0], sizes = [4, 128], strides = [1, 1]} : vector<64x128xf32> to vector<4x128xf32>
    %600 = arith.addf %234, %599 : vector<4x128xf32>
    %c0_178 = arith.constant 0 : index
    %c0_179 = arith.constant 0 : index
    %601 = vector.load %arg16[%c0_178, %c0_179] : memref<32x128xf32, #tpu.memory_space<vmem>>, vector<32x128xf32>
    %cst_180 = arith.constant dense<0.000000e+00> : vector<4x128xf32>
    %602 = tpu.matmul %594, %601, %cst_180 {dimension_numbers = #tpu.dot_dimension_numbers<[1], [0], [0], [1], [0, 0, 1, 1], [], []>} : vector<4x32xf32>, vector<32x128xf32>, vector<4x128xf32> -> vector<4x128xf32>
    %603 = arith.addf %600, %602 : vector<4x128xf32>
    %604 = arith.negf %603 : vector<4x128xf32>
    %605 = math.exp %604 : vector<4x128xf32>
    %cst_181 = arith.constant 1.000000e+00 : f32
    %606 = vector.broadcast %cst_181 : f32 to vector<4x128xf32>
    %607 = arith.addf %606, %605 : vector<4x128xf32>
    %608 = arith.divf %606, %607 : vector<4x128xf32>
    %609 = math.tanh %603 : vector<4x128xf32>
    %610 = vector.extract_strided_slice %608 {offsets = [0, 0], sizes = [4, 32], strides = [1, 1]} : vector<4x128xf32> to vector<4x32xf32>
    %611 = vector.extract_strided_slice %608 {offsets = [0, 32], sizes = [4, 32], strides = [1, 1]} : vector<4x128xf32> to vector<4x32xf32>
    %612 = vector.extract_strided_slice %608 {offsets = [0, 64], sizes = [4, 32], strides = [1, 1]} : vector<4x128xf32> to vector<4x32xf32>
    %613 = vector.extract_strided_slice %609 {offsets = [0, 96], sizes = [4, 32], strides = [1, 1]} : vector<4x128xf32> to vector<4x32xf32>
    %614 = arith.mulf %611, %592 : vector<4x32xf32>
    %615 = arith.mulf %610, %613 : vector<4x32xf32>
    %616 = arith.addf %614, %615 : vector<4x32xf32>
    %617 = math.tanh %616 : vector<4x32xf32>
    %618 = arith.mulf %612, %617 : vector<4x32xf32>
    %cst_182 = arith.constant dense<0.000000e+00> : vector<4x128xf32>
    %619 = tpu.matmul %618, %237, %cst_182 {dimension_numbers = #tpu.dot_dimension_numbers<[1], [0], [0], [1], [0, 0, 1, 1], [], []>} : vector<4x32xf32>, vector<32x128xf32>, vector<4x128xf32> -> vector<4x128xf32>
    %620 = vector.broadcast %238 : vector<1x128xf32> to vector<4x128xf32>
    %621 = arith.addf %619, %620 : vector<4x128xf32>
    %c60 = arith.constant 60 : index
    %c0_183 = arith.constant 0 : index
    %622 = vector.load %arg21[%c60, %c0_183] : memref<64x128xf32, #tpu.memory_space<vmem>>, vector<4x128xf32>
    tpu.vector_store %arg21[%c60, %c0_183], %621 {strides = array<i32>} : memref<64x128xf32, #tpu.memory_space<vmem>>, vector<4x128xf32>,
    return
  }
}

</mosaic_0001>

<bundles_post_ra>
// kernel: music_vae_forward.1
= control target key start
LH: loop header
LB: loop body
LE: loop exit
PB: predicated region body
PF: predicated region fallthrough
CT: control target
= control target key end

     0   :  { %v5743_v3 = vmov 0.0   ;;  %vm89_vm0 = vcmask 261120   ;;  %v79_v26 = vlaneseq  ;;  %s5744_s25 = smov 64   ;;  %vm189_vm1 = vcmask 523264   ;;  %s5747_s27 = smov 120   ;;  %s7005_s4 = inlined_call_operand.vmem [shape: f32[64,256], index: 4, kind: input, shape index: {}]   ;;  %s7006_s3 = inlined_call_operand.vmem [shape: f32[32,256], index: 3, kind: input, shape index: {}]   ;;  %s7007_s0 = inlined_call_operand.vmem [shape: f32[16,32], index: 0, kind: input, shape index: {}]   ;;  %s7008_s5 = inlined_call_operand.vmem [shape: f32[1,256], index: 5, kind: input, shape index: {}]   ;;  %s7009_s6 = inlined_call_operand.vmem [shape: f32[64,128], index: 6, kind: input, shape index: {}]   ;;  %s7010_s2 = inlined_call_operand.vmem [shape: f32[2,8], index: 2, kind: input, shape index: {}]   ;;  %s7011_s8 = inlined_call_operand.vmem [shape: f32[8,48], index: 8, kind: input, shape index: {}]   ;;  %s7012_s7 = inlined_call_operand.vmem [shape: f32[1,128], index: 7, kind: input, shape index: {}]   ;;  %s7013_s20 = inlined_call_operand.vmem [shape: f32[2,128], index: 20, kind: output, shape index: {0}]   ;;  %s7014_s10 = inlined_call_operand.vmem [shape: f32[16,128], index: 10, kind: input, shape index: {}]   ;;  %s7015_s11 = inlined_call_operand.vmem [shape: f32[32,128], index: 11, kind: input, shape index: {}]   ;;  %s7016_s9 = inlined_call_operand.vmem [shape: f32[1,48], index: 9, kind: input, shape index: {}]   ;;  %s7017_s12 = inlined_call_operand.vmem [shape: f32[1,128], index: 12, kind: input, shape index: {}]   ;;  %s7018_s13 = inlined_call_operand.vmem [shape: f32[32,32], index: 13, kind: input, shape index: {}]   ;;  %s7019_s15 = inlined_call_operand.vmem [shape: f32[48,128], index: 15, kind: input, shape index: {}]   ;;  %s7020_s1 = inlined_call_operand.vmem [shape: f32[64,16], index: 1, kind: input, shape index: {}]   ;;  %s7021_s16 = inlined_call_operand.vmem [shape: f32[32,128], index: 16, kind: input, shape index: {}]   ;;  %s7022_s14 = inlined_call_operand.vmem [shape: f32[1,32], index: 14, kind: input, shape index: {}]   ;;  %s7023_s17 = inlined_call_operand.vmem [shape: f32[1,128], index: 17, kind: input, shape index: {}]   ;;  %s7024_s18 = inlined_call_operand.vmem [shape: f32[32,128], index: 18, kind: input, shape index: {}]   ;;  %s7025_s19 = inlined_call_operand.vmem [shape: f32[1,128], index: 19, kind: input, shape index: {}]   ;;  %s7026_s21 = inlined_call_operand.vmem [shape: f32[64,128], index: 21, kind: output, shape index: {1}]  }
   0x1   :  { %7031 = sst [smem:[#allocation2_spill]] %s7005_s4  ;;  %160 = vmatprep.mubr.f32.mxu0 %v5743_v3  ;;  %257 = vmatprep.mubr.f32.mxu1 %v5743_v3  ;;  %vm5745_vm2 = vmmov 0   ;;  %vm1209_vm3 = vcmask 64512   ;;  %vm1293_vm4 = vcmask 130048   ;;  %vm1573_vm5 = vcmask 1041408  }
   0x2   :  { %7032 = sst [smem:[#allocation3_spill]] %s7006_s3  ;;  %v80_v27 = vshrl.u32 %v79_v26, 7  ;;  %s5748_s3 = smov 112  }
   0x3   :  { %7033 = sst [smem:[#allocation4_spill]] %s7007_s0 }
   0x4   :  { %7034 = sst [smem:[#allocation5_spill]] %s7008_s5  ;;  %v85_v28 = vsub.s32 1, %v80_v27  ;;  %v81_v38 = vsub.s32 0, %v80_v27 }
   0x5   :  { %7035 = sst [smem:[#allocation6_spill]] %s7009_s6 }
   0x6   :  { %7036 = sst [smem:[#allocation7_spill]] %s7010_s2  ;;  %s5746_s2 = smov 8  }
   0x7   :  { %s7037_s26 = sld [smem:[#allocation2_spill]] }
   0x8   :  { %s7038_s22 = sld [smem:[#allocation3_spill]] }
   0x9   :  { %s7039_s24 = sld [smem:[#allocation4_spill]] }
   0xa   :  { %s7040_s0 = sld [smem:[#allocation5_spill]] }
   0xb   :  { %s7041_s28 = sld [smem:[#allocation6_spill]] }
   0xc   :  { %s7042_s30 = sld [smem:[#allocation7_spill]] }
   0xd   :  { %v5863_v0 = vld [vmem:[%s7037_s26 + $0x78] sm:$0xff]  ;;  %v5868_v1 = vld [vmem:[%s7037_s26 + $0x70] sm:$0xff]  ;;  %v5873_v2 = vld [vmem:[%s7037_s26 + $0x68] sm:$0xff] }
   0xe   :  { %209 = vmatprep.subr.mxu1 %v5863_v0  ;;  %v5881_v4 = vld [vmem:[%s7037_s26 + $0x60] sm:$0xff]  ;;  %v76_v5 = vld [vmem:[%s7038_s22 + $0x38] sm:$0xff]  ;;  %v75_v7 = vld [vmem:[%s7038_s22 + $0x30] sm:$0xff] }
   0xf   :  { %210 = vmatpush1.msra.mxu1 %v5868_v1  ;;  %120 = vmatprep.subr.mxu0 %v76_v5  ;;  %v5890_v6 = vld [vmem:[%s7037_s26 + $0x58] sm:$0xff]  ;;  %v74_v8 = vld [vmem:[%s7038_s22 + $0x28] sm:$0xff]  ;;  %v5902_v9 = vld [vmem:[%s7037_s26 + $0x50] sm:$0xff] }
  0x10   :  { %211 = vmatprep.subr.mxu1 %v5873_v2  ;;  %121 = vmatpush1.msra.mxu0 %v75_v7  ;;  %v73_v10 = vld [vmem:[%s7038_s22 + $0x20] sm:$0xff]  ;;  %v5911_v11 = vld [vmem:[%s7037_s26 + $0x48] sm:$0xff]  ;;  %v72_v12 = vld [vmem:[%s7038_s22 + $0x18] sm:$0xff] }
  0x11   :  { %212 = vmatpush1.msra.mxu1 %v5881_v4  ;;  %122 = vmatprep.subr.mxu0 %v74_v8  ;;  %v71_v13 = vld [vmem:[%s7038_s22 + $0x10] sm:$0xff]  ;;  %v5923_v14 = vld [vmem:[%s7037_s26 + $0x40] sm:$0xff]  ;;  %v70_v15 = vld [vmem:[%s7038_s22 + $0x8] sm:$0xff] }
  0x12   :  { %213 = vmatprep.subr.mxu1 %v5890_v6  ;;  %123 = vmatpush1.msra.mxu0 %v73_v10  ;;  %v5932_v16 = vld [vmem:[%s7037_s26 + $0x38] sm:$0xff]  ;;  %v69_v17 = vld [vmem:[%s7038_s22] sm:$0xff]  ;;  %v5941_v18 = vld [vmem:[%s7037_s26 + $0x30] sm:$0xff] }
  0x13   :  { %214 = vmatpush1.msra.mxu1 %v5902_v9  ;;  %124 = vmatprep.subr.mxu0 %v72_v12  ;;  %v67_v19 = vld [vmem:[%s7039_s24] sm:$0xff]  ;;  %v5950_v20 = vld [vmem:[%s7037_s26 + $0x28] sm:$0xff]  ;;  %v5963_v22 = vld [vmem:[%s7037_s26 + $0x18] sm:$0xff] }
  0x14   :  { %215 = vmatprep.subr.mxu1 %v5911_v11  ;;  %125 = vmatpush1.msra.mxu0 %v71_v13  ;;  %v5956_v21 = vld [vmem:[%s7037_s26 + $0x20] sm:$0xff]  ;;  %v5969_v23 = vld [vmem:[%s7037_s26 + $0x10] sm:$0xff]  ;;  %v5976_v24 = vld [vmem:[%s7037_s26 + $0x8] sm:$0xff] }
  0x15   :  { %216 = vmatpush1.msra.mxu1 %v5923_v14  ;;  %126 = vmatprep.subr.mxu0 %v70_v15  ;;  %v5983_v25 = vld [vmem:[%s7037_s26] sm:$0xff]  ;;  %v68_v48 = vld [vmem:[%s7039_s24 + $0x8] sm:$0xff] }
  0x16   :  { %217 = vmatprep.subr.mxu1 %v5932_v16  ;;  %127 = vmatpush1.msra.mxu0 %v69_v17  ;;  %v77_v29 = vld [vmem:[%s7040_s0] sm:$0x3]  ;;  %s5749_s0 = smov 32  }
  0x17   :  { %218 = vmatpush1.msra.mxu1 %v5941_v18  ;;  %4744 = vmatmul.mubr.msk.f32.vlgmr.msra.gmra.mxu0 %vm89_vm0, %v67_v19  ;;  %v6026_v31 = vrot.slane %v77_v29, %v85_v28  ;;  %v6033_v39 = vrot.slane %v77_v29, %v81_v38 }
  0x18   :  { %219 = vmatprep.subr.mxu1 %v5950_v20  ;;  %315 = vmatprep.subr.mxu0 %v5863_v0 }
  0x19   :  { %220 = vmatpush1.msra.mxu1 %v5956_v21  ;;  %316 = vmatpush1.msra.mxu0 %v5868_v1 }
  0x1a   :  { %221 = vmatprep.subr.mxu1 %v5963_v22  ;;  %317 = vmatprep.subr.mxu0 %v5873_v2 }
  0x1b   :  { %222 = vmatpush1.msra.mxu1 %v5969_v23  ;;  %318 = vmatpush1.msra.mxu0 %v5881_v4 }
  0x1c   :  { %223 = vmatprep.subr.mxu1 %v5976_v24  ;;  %319 = vmatprep.subr.mxu0 %v5890_v6 }
  0x1d   :  { %224 = vmatpush1.msra.mxu1 %v5983_v25  ;;  %320 = vmatpush1.msra.mxu0 %v5902_v9 }
  0x1e   :  { %258 = vmatmul.mubr.f32.vlgmr.msra.gmra.mxu1 %v5743_v3  ;;  %321 = vmatprep.subr.mxu0 %v5911_v11 }
  0x1f   :  { %322 = vmatpush1.msra.mxu0 %v5923_v14  ;;  %166 = vmatprep.mubr.f32.mxu0 %v5743_v3 }
  0x20   :  { %323 = vmatprep.subr.mxu0 %v5932_v16  ;;  %431 = vmatprep.subr.mxu1 %v5863_v0 }
  0x21   :  { %324 = vmatpush1.msra.mxu0 %v5941_v18  ;;  %432 = vmatpush1.msra.mxu1 %v5868_v1 }
  0x22   :  { %325 = vmatprep.subr.mxu0 %v5950_v20  ;;  %433 = vmatprep.subr.mxu1 %v5873_v2 }
  0x23   :  { %326 = vmatpush1.msra.mxu0 %v5956_v21  ;;  %434 = vmatpush1.msra.mxu1 %v5881_v4 }
  0x24   :  { %327 = vmatprep.subr.mxu0 %v5963_v22  ;;  %435 = vmatprep.subr.mxu1 %v5890_v6 }
  0x25   :  { %328 = vmatpush1.msra.mxu0 %v5969_v23  ;;  %436 = vmatpush1.msra.mxu1 %v5902_v9 }
  0x26   :  { %329 = vmatprep.subr.mxu0 %v5976_v24  ;;  %437 = vmatprep.subr.mxu1 %v5911_v11 }
  0x27   :  { %330 = vmatpush1.msra.mxu0 %v5983_v25  ;;  %438 = vmatpush1.msra.mxu1 %v5923_v14 }
  0x28   :  { %439 = vmatprep.subr.mxu1 %v5932_v16  ;;  %479 = vmatprep.mubr.f32.mxu1 %v5743_v3 }
  0x29   :  { %440 = vmatpush1.msra.mxu1 %v5941_v18  ;;  %547 = vmatprep.subr.mxu0 %v5863_v0 }
  0x2a   :  { %441 = vmatprep.subr.mxu1 %v5950_v20  ;;  %4745 = vmatmul.mubr.msk.f32.gmra.mxu0 %vm89_vm0, %v68_v48 }
  0x2b   :  { %442 = vmatpush1.msra.mxu1 %v5956_v21  ;;  %363 = vmatprep.mubr.f32.mxu0 %v5743_v3 }
  0x2c   :  { %443 = vmatprep.subr.mxu1 %v5963_v22 }
  0x2d   :  { %444 = vmatpush1.msra.mxu1 %v5969_v23 }
  0x2e   :  { %445 = vmatprep.subr.mxu1 %v5976_v24 }
  0x2f   :  { %446 = vmatpush1.msra.mxu1 %v5983_v25 }
  0x30   :  { %663 = vmatprep.subr.mxu1 %v5863_v0 }
  0xd7   :  { %v162_v30 = vpop.f32.mrf.mxu0 }
  0xd8   :  { %v6036_v40 = vadd.f32 %v162_v30, %v6033_v39 }
  0xd9   :  { %v164_v32 = vpop.f32.mrf.mxu0 }
  0xda   :  { %v6029_v34 = vadd.f32 %v164_v32, %v6026_v31 }
  0xde   :  { %v259_v33 = vpop.f32.mrf.mxu1 }
  0xdf   :  { %v264_v41 = vadd.f32 %v259_v33, %v6036_v40 }
  0xe0   :  { %v261_v35 = vpop.f32.mrf.mxu1 }
  0xe1   :  { %v265_v36 = vadd.f32 %v261_v35, %v6029_v34  ;;  %v4746_v42 = vmul.f32 -1.442695, %v264_v41 }
  0xe3   :  { %5494 = vtanh.f32 %v265_v36  ;;  %v4747_v53 = vmul.f32 -1.442695, %v265_v36 }
  0xe4   :  { %5496 = vpow2.f32 %v4746_v42 }
  0xea   :  { %v6064_v59 = vpop.f32.mrf.mxu0 }
  0xec   :  { %v6066_v60 = vpop.f32.mrf.mxu0 }
  0xf0   :  { %v5495_v37 = vpop.eup %5494 }
  0xf1   :  { %281 = vrot.lane.b32.xlu0 %v5495_v37, %s5744_s25  ;;  %v5497_v43 = vpop.eup %5496 }
  0xf2   :  { %v272_v44 = vadd.f32 1.0, %v5497_v43 }
  0xf4   :  { %5498 = vrcp.f32 %v272_v44 }
 0x101   :  { %v5499_v45 = vpop.eup %5498 }
 0x102   :  { %v279_v49 = vmul.f32 0.0, %v5499_v45 }
 0x163   :  { %v282_v46 = vpop.permute.xlu0 %281 }
 0x164   :  { %v284_v47 = vmul.f32 %v5499_v45, %v282_v46 }
 0x166   :  { %286 = vrot.lane.b32.xlu0 %v284_v47, %s5744_s25 }
 0x1d8   :  { %v287_v50 = vpop.permute.xlu0 %286 }
 0x1d9   :  { %v289_v51 = vadd.f32 %v287_v50, %v279_v49 }
 0x1db   :  { %5500 = vtanh.f32 %v289_v51  ;;  %v392_v27 = vrot.slane %v289_v51, 6 }
 0x1dc   :  { %5502 = vpow2.f32 %v4747_v53 }
 0x1e8   :  { %v5501_v52 = vpop.eup %5500 }
 0x1e9   :  { %292 = vrot.lane.b32.xlu1 %v5501_v52, %s5744_s25  ;;  %v5503_v54 = vpop.eup %5502 }
 0x1ea   :  { %v273_v55 = vadd.f32 1.0, %v5503_v54 }
 0x1ec   :  { %5504 = vrcp.f32 %v273_v55 }
 0x1f9   :  { %v5505_v56 = vpop.eup %5504 }
 0x25b   :  { %v293_v57 = vpop.permute.xlu1 %292 }
 0x25c   :  { %v295_v58 = vmul.f32 %v5505_v56, %v293_v57 }
 0x25e   :  { %4748 = vmatmul.mubr.msk.f32.vlgmr.msra.gmra.mxu0 %vm189_vm1, %v295_v58 }
 0x25f   :  { %548 = vmatpush1.msra.mxu0 %v5868_v1  ;;  %595 = vmatprep.mubr.f32.mxu0 %v5743_v3 }
 0x260   :  { %549 = vmatprep.subr.mxu0 %v5873_v2 }
 0x261   :  { %550 = vmatpush1.msra.mxu0 %v5881_v4 }
 0x262   :  { %551 = vmatprep.subr.mxu0 %v5890_v6 }
 0x263   :  { %552 = vmatpush1.msra.mxu0 %v5902_v9 }
 0x264   :  { %553 = vmatprep.subr.mxu0 %v5911_v11 }
 0x265   :  { %554 = vmatpush1.msra.mxu0 %v5923_v14 }
 0x266   :  { %555 = vmatprep.subr.mxu0 %v5932_v16 }
 0x267   :  { %556 = vmatpush1.msra.mxu0 %v5941_v18 }
 0x268   :  { %557 = vmatprep.subr.mxu0 %v5950_v20 }
 0x269   :  { %558 = vmatpush1.msra.mxu0 %v5956_v21 }
 0x26a   :  { %559 = vmatprep.subr.mxu0 %v5963_v22 }
 0x26b   :  { %560 = vmatpush1.msra.mxu0 %v5969_v23 }
 0x26c   :  { %561 = vmatprep.subr.mxu0 %v5976_v24 }
 0x26d   :  { %562 = vmatpush1.msra.mxu0 %v5983_v25 }
 0x26e   :  { %772 = vmatprep.subr.mxu0 %v5863_v0 }
 0x31e   :  { %v365_v61 = vpop.f32.mrf.mxu0 }
 0x31f   :  { %v372_v8 = vrot.slane %v365_v61, 6 }
 0x320   :  { %v367_v62 = vpop.f32.mrf.mxu0 }
 0x321   :  { %v373_v63 = vrot.slane %v367_v62, 6  ;;  %v376_v10 = vadd.f32 %v372_v8, %v6036_v40 }
 0x323   :  { %v377_v5 = vadd.f32 %v373_v63, %v6029_v34  ;;  %v4749_v12 = vmul.f32 -1.442695, %v376_v10 }
 0x325   :  { %5506 = vtanh.f32 %v377_v5  ;;  %v4750_v33 = vmul.f32 -1.442695, %v377_v5 }
 0x326   :  { %5508 = vpow2.f32 %v4749_v12 }
 0x332   :  { %v5507_v7 = vpop.eup %5506 }
 0x333   :  { %396 = vrot.lane.b32.xlu1 %v5507_v7, %s5744_s25  ;;  %v5509_v13 = vpop.eup %5508 }
 0x334   :  { %v384_v15 = vadd.f32 1.0, %v5509_v13 }
 0x336   :  { %5510 = vrcp.f32 %v384_v15 }
 0x343   :  { %v5511_v17 = vpop.eup %5510 }
 0x344   :  { %v394_v28 = vmul.f32 %v5511_v17, %v392_v27 }
 0x3a5   :  { %v397_v19 = vpop.permute.xlu1 %396 }
 0x3a6   :  { %v399_v26 = vmul.f32 %v5511_v17, %v397_v19 }
 0x3a8   :  { %401 = vrot.lane.b32.xlu0 %v399_v26, %s5744_s25 }
 0x41a   :  { %v402_v29 = vpop.permute.xlu0 %401 }
 0x41b   :  { %v404_v30 = vadd.f32 %v402_v29, %v394_v28 }
 0x41d   :  { %5512 = vtanh.f32 %v404_v30  ;;  %v508_v56 = vrot.slane %v404_v30, 6 }
 0x41e   :  { %5514 = vpow2.f32 %v4750_v33 }
 0x42a   :  { %v5513_v32 = vpop.eup %5512 }
 0x42b   :  { %407 = vrot.lane.b32.xlu1 %v5513_v32, %s5744_s25  ;;  %v5515_v35 = vpop.eup %5514 }
 0x42c   :  { %v385_v36 = vadd.f32 1.0, %v5515_v35 }
 0x42e   :  { %5516 = vrcp.f32 %v385_v36 }
 0x43b   :  { %v5517_v37 = vpop.eup %5516 }
 0x49d   :  { %v408_v38 = vpop.permute.xlu1 %407 }
 0x49e   :  { %v410_v41 = vmul.f32 %v5517_v37, %v408_v38 }
 0x4a0   :  { %v412_v42 = vrot.slane %v410_v41, 2 }
 0x4a2   :  { %4751 = vmatmul.mubr.msk.f32.vlgmr.msra.gmra.mxu1 %vm189_vm1, %v412_v42 }
 0x4a3   :  { %664 = vmatpush1.msra.mxu1 %v5868_v1  ;;  %711 = vmatprep.mubr.f32.mxu1 %v5743_v3 }
 0x4a4   :  { %665 = vmatprep.subr.mxu1 %v5873_v2 }
 0x4a5   :  { %666 = vmatpush1.msra.mxu1 %v5881_v4 }
 0x4a6   :  { %667 = vmatprep.subr.mxu1 %v5890_v6 }
 0x4a7   :  { %668 = vmatpush1.msra.mxu1 %v5902_v9 }
 0x4a8   :  { %669 = vmatprep.subr.mxu1 %v5911_v11 }
 0x4a9   :  { %670 = vmatpush1.msra.mxu1 %v5923_v14 }
 0x4aa   :  { %671 = vmatprep.subr.mxu1 %v5932_v16 }
 0x4ab   :  { %672 = vmatpush1.msra.mxu1 %v5941_v18 }
 0x4ac   :  { %673 = vmatprep.subr.mxu1 %v5950_v20 }
 0x4ad   :  { %674 = vmatpush1.msra.mxu1 %v5956_v21 }
 0x4ae   :  { %675 = vmatprep.subr.mxu1 %v5963_v22 }
 0x4af   :  { %676 = vmatpush1.msra.mxu1 %v5969_v23 }
 0x4b0   :  { %677 = vmatprep.subr.mxu1 %v5976_v24 }
 0x4b1   :  { %678 = vmatpush1.msra.mxu1 %v5983_v25 }
 0x4b2   :  { %888 = vmatprep.subr.mxu1 %v5863_v0 }
 0x562   :  { %v481_v43 = vpop.f32.mrf.mxu1 }
 0x563   :  { %v488_v48 = vrot.slane %v481_v43, 4 }
 0x564   :  { %v483_v44 = vpop.f32.mrf.mxu1 }
 0x565   :  { %v489_v45 = vrot.slane %v483_v44, 4  ;;  %v492_v49 = vadd.f32 %v488_v48, %v6036_v40 }
 0x567   :  { %v493_v46 = vadd.f32 %v489_v45, %v6029_v34  ;;  %v4752_v50 = vmul.f32 -1.442695, %v492_v49 }
 0x569   :  { %5518 = vtanh.f32 %v493_v46  ;;  %v4753_v63 = vmul.f32 -1.442695, %v493_v46 }
 0x56a   :  { %5520 = vpow2.f32 %v4752_v50  ;;  %v6139_v50 = vadd.f32 %v6066_v60, %v6026_v31 }
 0x576   :  { %v5519_v47 = vpop.eup %5518 }
 0x577   :  { %512 = vrot.lane.b32.xlu0 %v5519_v47, %s5744_s25  ;;  %v5521_v51 = vpop.eup %5520 }
 0x578   :  { %v500_v52 = vadd.f32 1.0, %v5521_v51 }
 0x57a   :  { %5522 = vrcp.f32 %v500_v52 }
 0x587   :  { %v5523_v53 = vpop.eup %5522 }
 0x588   :  { %v510_v57 = vmul.f32 %v5523_v53, %v508_v56 }
 0x5e9   :  { %v513_v54 = vpop.permute.xlu0 %512 }
 0x5ea   :  { %v515_v55 = vmul.f32 %v5523_v53, %v513_v54  ;;  %v6145_v54 = vadd.f32 %v6064_v59, %v6033_v39 }
 0x5ec   :  { %517 = vrot.lane.b32.xlu1 %v515_v55, %s5744_s25 }
 0x65e   :  { %v518_v58 = vpop.permute.xlu1 %517 }
 0x65f   :  { %v520_v61 = vadd.f32 %v518_v58, %v510_v57 }
 0x661   :  { %5524 = vtanh.f32 %v520_v61  ;;  %v624_v37 = vrot.slane %v520_v61, 6 }
 0x662   :  { %5526 = vpow2.f32 %v4753_v63 }
 0x66e   :  { %v5525_v62 = vpop.eup %5524 }
 0x66f   :  { %523 = vrot.lane.b32.xlu0 %v5525_v62, %s5744_s25  ;;  %v5527_v5 = vpop.eup %5526 }
 0x670   :  { %v501_v7 = vadd.f32 1.0, %v5527_v5 }
 0x672   :  { %5528 = vrcp.f32 %v501_v7 }
 0x67f   :  { %v5529_v8 = vpop.eup %5528 }
 0x6e1   :  { %v524_v10 = vpop.permute.xlu0 %523 }
 0x6e2   :  { %v526_v12 = vmul.f32 %v5529_v8, %v524_v10 }
 0x6e4   :  { %v528_v13 = vrot.slane %v526_v12, 4 }
 0x6e6   :  { %4754 = vmatmul.mubr.msk.f32.vlgmr.msra.gmra.mxu0 %vm189_vm1, %v528_v13 }
 0x6e7   :  { %773 = vmatpush1.msra.mxu0 %v5868_v1  ;;  %820 = vmatprep.mubr.f32.mxu0 %v5743_v3 }
 0x6e8   :  { %774 = vmatprep.subr.mxu0 %v5873_v2 }
 0x6e9   :  { %775 = vmatpush1.msra.mxu0 %v5881_v4 }
 0x6ea   :  { %776 = vmatprep.subr.mxu0 %v5890_v6 }
 0x6eb   :  { %777 = vmatpush1.msra.mxu0 %v5902_v9 }
 0x6ec   :  { %778 = vmatprep.subr.mxu0 %v5911_v11 }
 0x6ed   :  { %779 = vmatpush1.msra.mxu0 %v5923_v14 }
 0x6ee   :  { %780 = vmatprep.subr.mxu0 %v5932_v16 }
 0x6ef   :  { %781 = vmatpush1.msra.mxu0 %v5941_v18 }
 0x6f0   :  { %782 = vmatprep.subr.mxu0 %v5950_v20 }
 0x6f1   :  { %783 = vmatpush1.msra.mxu0 %v5956_v21 }
 0x6f2   :  { %784 = vmatprep.subr.mxu0 %v5963_v22 }
 0x6f3   :  { %785 = vmatpush1.msra.mxu0 %v5969_v23 }
 0x6f4   :  { %786 = vmatprep.subr.mxu0 %v5976_v24 }
 0x6f5   :  { %787 = vmatpush1.msra.mxu0 %v5983_v25 }
 0x6f6   :  { %1004 = vmatprep.subr.mxu0 %v5863_v0 }
 0x7a6   :  { %v597_v15 = vpop.f32.mrf.mxu0 }
 0x7a7   :  { %v604_v28 = vrot.slane %v597_v15, 2 }
 0x7a8   :  { %v599_v17 = vpop.f32.mrf.mxu0 }
 0x7a9   :  { %v605_v19 = vrot.slane %v599_v17, 2  ;;  %v608_v29 = vadd.f32 %v604_v28, %v6036_v40 }
 0x7ab   :  { %v609_v26 = vadd.f32 %v605_v19, %v6029_v34  ;;  %v4755_v30 = vmul.f32 -1.442695, %v608_v29 }
 0x7ad   :  { %5530 = vtanh.f32 %v609_v26  ;;  %v4756_v43 = vmul.f32 -1.442695, %v609_v26 }
 0x7ae   :  { %5532 = vpow2.f32 %v4755_v30 }
 0x7ba   :  { %v5531_v27 = vpop.eup %5530 }
 0x7bb   :  { %628 = vrot.lane.b32.xlu1 %v5531_v27, %s5744_s25  ;;  %v5533_v32 = vpop.eup %5532 }
 0x7bc   :  { %v616_v33 = vadd.f32 1.0, %v5533_v32 }
 0x7be   :  { %5534 = vrcp.f32 %v616_v33 }
 0x7cb   :  { %v5535_v35 = vpop.eup %5534 }
 0x7cc   :  { %v626_v38 = vmul.f32 %v5535_v35, %v624_v37 }
 0x82d   :  { %v629_v36 = vpop.permute.xlu1 %628 }
 0x82e   :  { %v631_v0 = vmul.f32 %v5535_v35, %v629_v36 }
 0x830   :  { %633 = vrot.lane.b32.xlu0 %v631_v0, %s5744_s25 }
 0x8a2   :  { %v634_v34 = vpop.permute.xlu0 %633 }
 0x8a3   :  { %v636_v41 = vadd.f32 %v634_v34, %v626_v38 }
 0x8a5   :  { %5536 = vtanh.f32 %v636_v41  ;;  %v734_v62 = vrot.slane %v636_v41, 6 }
 0x8a6   :  { %5538 = vpow2.f32 %v4756_v43 }
 0x8b2   :  { %v5537_v42 = vpop.eup %5536 }
 0x8b3   :  { %639 = vrot.lane.b32.xlu1 %v5537_v42, %s5744_s25  ;;  %v5539_v40 = vpop.eup %5538 }
 0x8b4   :  { %v617_v44 = vadd.f32 1.0, %v5539_v40 }
 0x8b6   :  { %5540 = vrcp.f32 %v617_v44 }
 0x8c3   :  { %v5541_v45 = vpop.eup %5540 }
 0x925   :  { %v640_v46 = vpop.permute.xlu1 %639 }
 0x926   :  { %v642_v47 = vmul.f32 %v5541_v45, %v640_v46 }
 0x928   :  { %v644_v48 = vrot.slane %v642_v47, 6 }
 0x92a   :  { %4757 = vmatmul.mubr.msk.f32.vlgmr.msra.gmra.mxu1 %vm189_vm1, %v644_v48 }
 0x92b   :  { %889 = vmatpush1.msra.mxu1 %v5868_v1  ;;  %936 = vmatprep.mubr.f32.mxu1 %v5743_v3 }
 0x92c   :  { %890 = vmatprep.subr.mxu1 %v5873_v2 }
 0x92d   :  { %891 = vmatpush1.msra.mxu1 %v5881_v4 }
 0x92e   :  { %892 = vmatprep.subr.mxu1 %v5890_v6 }
 0x92f   :  { %893 = vmatpush1.msra.mxu1 %v5902_v9 }
 0x930   :  { %894 = vmatprep.subr.mxu1 %v5911_v11 }
 0x931   :  { %895 = vmatpush1.msra.mxu1 %v5923_v14 }
 0x932   :  { %896 = vmatprep.subr.mxu1 %v5932_v16 }
 0x933   :  { %897 = vmatpush1.msra.mxu1 %v5941_v18 }
 0x934   :  { %898 = vmatprep.subr.mxu1 %v5950_v20 }
 0x935   :  { %899 = vmatpush1.msra.mxu1 %v5956_v21 }
 0x936   :  { %900 = vmatprep.subr.mxu1 %v5963_v22 }
 0x937   :  { %901 = vmatpush1.msra.mxu1 %v5969_v23 }
 0x938   :  { %902 = vmatprep.subr.mxu1 %v5976_v24 }
 0x939   :  { %903 = vmatpush1.msra.mxu1 %v5983_v25 }
 0x93a   :  { %5044 = vmatprep.subr.mxu1 %v5743_v3 }
 0x9ea   :  { %v713_v49 = vpop.f32.mrf.mxu1 }
 0x9eb   :  { %v718_v55 = vadd.f32 %v713_v49, %v6145_v54 }
 0x9ec   :  { %v715_v51 = vpop.f32.mrf.mxu1 }
 0x9ed   :  { %v719_v52 = vadd.f32 %v715_v51, %v6139_v50  ;;  %v4758_v56 = vmul.f32 -1.442695, %v718_v55 }
 0x9ef   :  { %5542 = vtanh.f32 %v719_v52  ;;  %v4759_v39 = vmul.f32 -1.442695, %v719_v52 }
 0x9f0   :  { %5544 = vpow2.f32 %v4758_v56 }
 0x9fc   :  { %v5543_v53 = vpop.eup %5542 }
 0x9fd   :  { %738 = vrot.lane.b32.xlu0 %v5543_v53, %s5744_s25  ;;  %v5545_v57 = vpop.eup %5544 }
 0x9fe   :  { %v726_v58 = vadd.f32 1.0, %v5545_v57 }
 0xa00   :  { %5546 = vrcp.f32 %v726_v58 }
 0xa0d   :  { %v5547_v31 = vpop.eup %5546 }
 0xa0e   :  { %v736_v63 = vmul.f32 %v5547_v31, %v734_v62 }
 0xa6f   :  { %v739_v60 = vpop.permute.xlu0 %738 }
 0xa70   :  { %v741_v61 = vmul.f32 %v5547_v31, %v739_v60 }
 0xa72   :  { %743 = vrot.lane.b32.xlu1 %v741_v61, %s5744_s25 }
 0xae4   :  { %v744_v5 = vpop.permute.xlu1 %743 }
 0xae5   :  { %v746_v7 = vadd.f32 %v744_v5, %v736_v63 }
 0xae7   :  { %5548 = vtanh.f32 %v746_v7 }
 0xae8   :  { %5550 = vpow2.f32 %v4759_v39 }
 0xaf4   :  { %v5549_v8 = vpop.eup %5548 }
 0xaf5   :  { %749 = vrot.lane.b32.xlu0 %v5549_v8, %s5744_s25  ;;  %v5551_v59 = vpop.eup %5550 }
 0xaf6   :  { %v727_v10 = vadd.f32 1.0, %v5551_v59 }
 0xaf8   :  { %5552 = vrcp.f32 %v727_v10 }
 0xb05   :  { %v5553_v12 = vpop.eup %5552 }
 0xb67   :  { %v750_v13 = vpop.permute.xlu0 %749 }
 0xb68   :  { %v752_v15 = vmul.f32 %v5553_v12, %v750_v13 }
 0xb6a   :  { %4760 = vmatmul.mubr.msk.f32.vlgmr.msra.gmra.mxu0 %vm189_vm1, %v752_v15 }
 0xb6b   :  { %1005 = vmatpush1.msra.mxu0 %v5868_v1  ;;  %1052 = vmatprep.mubr.f32.mxu0 %v5743_v3 }
 0xb6c   :  { %1006 = vmatprep.subr.mxu0 %v5873_v2 }
 0xb6d   :  { %1007 = vmatpush1.msra.mxu0 %v5881_v4 }
 0xb6e   :  { %1008 = vmatprep.subr.mxu0 %v5890_v6 }
 0xb6f   :  { %1009 = vmatpush1.msra.mxu0 %v5902_v9 }
 0xb70   :  { %1010 = vmatprep.subr.mxu0 %v5911_v11 }
 0xb71   :  { %1011 = vmatpush1.msra.mxu0 %v5923_v14 }
 0xb72   :  { %1012 = vmatprep.subr.mxu0 %v5932_v16 }
 0xb73   :  { %1013 = vmatpush1.msra.mxu0 %v5941_v18 }
 0xb74   :  { %1014 = vmatprep.subr.mxu0 %v5950_v20 }
 0xb75   :  { %1015 = vmatpush1.msra.mxu0 %v5956_v21 }
 0xb76   :  { %1016 = vmatprep.subr.mxu0 %v5963_v22 }
 0xb77   :  { %1017 = vmatpush1.msra.mxu0 %v5969_v23 }
 0xb78   :  { %1018 = vmatprep.subr.mxu0 %v5976_v24  ;;  %v849_v24 = vrot.slane %v746_v7, 6 }
 0xb79   :  { %1019 = vmatpush1.msra.mxu0 %v5983_v25 }
 0xb7a   :  { %5063 = vmatprep.subr.mxu0 %v5743_v3 }
 0xc2a   :  { %v822_v1 = vpop.f32.mrf.mxu0 }
 0xc2b   :  { %v829_v11 = vrot.slane %v822_v1, 6 }
 0xc2c   :  { %v824_v2 = vpop.f32.mrf.mxu0 }
 0xc2d   :  { %v830_v4 = vrot.slane %v824_v2, 6  ;;  %v833_v14 = vadd.f32 %v829_v11, %v6145_v54  ;;  %v1102_v11 = vld [vmem:[%s7041_s28 + $0x10] sm:$0xff] }
 0xc2f   :  { %v834_v6 = vadd.f32 %v830_v4, %v6139_v50  ;;  %v4761_v16 = vmul.f32 -1.442695, %v833_v14  ;;  %v1106_v4 = vld [vmem:[%s7041_s28 + $0x30] sm:$0xff] }
 0xc31   :  { %5554 = vtanh.f32 %v834_v6  ;;  %v4762_v27 = vmul.f32 -1.442695, %v834_v6  ;;  %v1104_v6 = vld [vmem:[%s7041_s28 + $0x20] sm:$0xff] }
 0xc32   :  { %5556 = vpow2.f32 %v4761_v16 }
 0xc3e   :  { %v5555_v9 = vpop.eup %5554 }
 0xc3f   :  { %853 = vrot.lane.b32.xlu1 %v5555_v9, %s5744_s25  ;;  %v5557_v18 = vpop.eup %5556  ;;  %v1103_v9 = vld [vmem:[%s7041_s28 + $0x18] sm:$0xff] }
 0xc40   :  { %v841_v20 = vadd.f32 1.0, %v5557_v18 }
 0xc42   :  { %5558 = vrcp.f32 %v841_v20 }
 0xc4f   :  { %v5559_v21 = vpop.eup %5558 }
 0xc50   :  { %v851_v25 = vmul.f32 %v5559_v21, %v849_v24 }
 0xcb1   :  { %v854_v22 = vpop.permute.xlu1 %853 }
 0xcb2   :  { %v856_v23 = vmul.f32 %v5559_v21, %v854_v22  ;;  %v1101_v21 = vld [vmem:[%s7041_s28 + $0x8] sm:$0xff]  ;;  %v1100_v22 = vld [vmem:[%s7041_s28] sm:$0xff] }
 0xcb4   :  { %858 = vrot.lane.b32.xlu0 %v856_v23, %s5744_s25  ;;  %v1190_v23 = vld [vmem:[%s7042_s30] sm:$0x3] }
 0xd26   :  { %v859_v17 = vpop.permute.xlu0 %858 }
 0xd27   :  { %v861_v19 = vadd.f32 %v859_v17, %v851_v25 }
 0xd29   :  { %5560 = vtanh.f32 %v861_v19  ;;  %v965_v48 = vrot.slane %v861_v19, 6 }
 0xd2a   :  { %5562 = vpow2.f32 %v4762_v27 }
 0xd36   :  { %v5561_v26 = vpop.eup %5560 }
 0xd37   :  { %864 = vrot.lane.b32.xlu1 %v5561_v26, %s5744_s25  ;;  %v5563_v28 = vpop.eup %5562 }
 0xd38   :  { %v842_v29 = vadd.f32 1.0, %v5563_v28 }
 0xd3a   :  { %5564 = vrcp.f32 %v842_v29 }
 0xd47   :  { %v5565_v30 = vpop.eup %5564 }
 0xda9   :  { %v865_v32 = vpop.permute.xlu1 %864 }
 0xdaa   :  { %v867_v33 = vmul.f32 %v5565_v30, %v865_v32  ;;  %v1201_v30 = vld [vmem:[%s7011_s8] sm:$0xff] }
 0xdab   :  { %v4769_v32 = vld [vmem:[%s7012_s7] ss:$0 sm:$0xff] }
 0xdac   :  { %v869_v35 = vrot.slane %v867_v33, 2 }
 0xdae   :  { %4763 = vmatmul.mubr.msk.f32.vlgmr.msra.gmra.mxu1 %vm189_vm1, %v869_v35 }
 0xdaf   :  { %5060 = vmatprep.mubr.msk.f32.mxu1 %vm5745_vm2, %v5743_v3 }
 0xe6e   :  { %v938_v36 = vpop.f32.mrf.mxu1 }
 0xe6f   :  { %v945_v41 = vrot.slane %v938_v36, 4 }
 0xe70   :  { %v940_v0 = vpop.f32.mrf.mxu1 }
 0xe71   :  { %v946_v37 = vrot.slane %v940_v0, 4  ;;  %v949_v42 = vadd.f32 %v945_v41, %v6145_v54  ;;  %v1285_v41 = vld [vmem:[%s7014_s10 + $0x8] sm:$0xff] }
 0xe73   :  { %v950_v38 = vadd.f32 %v946_v37, %v6139_v50  ;;  %v4764_v43 = vmul.f32 -1.442695, %v949_v42  ;;  %v1284_v42 = vld [vmem:[%s7014_s10] sm:$0xff] }
 0xe75   :  { %5566 = vtanh.f32 %v950_v38  ;;  %v4765_v55 = vmul.f32 -1.442695, %v950_v38 }
 0xe76   :  { %5568 = vpow2.f32 %v4764_v43  ;;  %v1370_v43 = vld [vmem:[%s7015_s11 + $0x18] sm:$0xff] }
 0xe82   :  { %v5567_v34 = vpop.eup %5566 }
 0xe83   :  { %969 = vrot.lane.b32.xlu0 %v5567_v34, %s5744_s25  ;;  %v5569_v40 = vpop.eup %5568 }
 0xe84   :  { %v957_v44 = vadd.f32 1.0, %v5569_v40  ;;  %v1369_v40 = vld [vmem:[%s7015_s11 + $0x10] sm:$0xff] }
 0xe86   :  { %5570 = vrcp.f32 %v957_v44  ;;  %v1368_v44 = vld [vmem:[%s7015_s11 + $0x8] sm:$0xff] }
 0xe93   :  { %v5571_v45 = vpop.eup %5570 }
 0xe94   :  { %v967_v49 = vmul.f32 %v5571_v45, %v965_v48 }
 0xef5   :  { %v970_v46 = vpop.permute.xlu0 %969 }
 0xef6   :  { %v972_v47 = vmul.f32 %v5571_v45, %v970_v46  ;;  %v4771_v45 = vld [vmem:[%s7016_s9] ss:$0 sm:$0xff] }
 0xef8   :  { %974 = vrot.lane.b32.xlu1 %v972_v47, %s5744_s25 }
 0xf6a   :  { %v975_v51 = vpop.permute.xlu1 %974 }
 0xf6b   :  { %v977_v52 = vadd.f32 %v975_v51, %v967_v49  ;;  %v1367_v49 = vld [vmem:[%s7015_s11] sm:$0xff] }
 0xf6d   :  { %5572 = vtanh.f32 %v977_v52  ;;  %v1081_v14 = vrot.slane %v977_v52, 6 }
 0xf6e   :  { %5574 = vpow2.f32 %v4765_v55 }
 0xf7a   :  { %v5573_v53 = vpop.eup %5572 }
 0xf7b   :  { %980 = vrot.lane.b32.xlu0 %v5573_v53, %s5744_s25  ;;  %v5575_v56 = vpop.eup %5574 }
 0xf7c   :  { %v958_v57 = vadd.f32 1.0, %v5575_v56  ;;  %v4773_v56 = vld [vmem:[%s7017_s12] ss:$0 sm:$0xff] }
 0xf7e   :  { %5576 = vrcp.f32 %v958_v57 }
 0xf8b   :  { %v5577_v58 = vpop.eup %5576 }
 0xfed   :  { %v981_v31 = vpop.permute.xlu0 %980 }
 0xfee   :  { %v983_v60 = vmul.f32 %v5577_v58, %v981_v31 }
 0xff0   :  { %v985_v61 = vrot.slane %v983_v60, 4 }
 0xff2   :  { %4766 = vmatmul.mubr.msk.f32.vlgmr.msra.gmra.mxu0 %vm189_vm1, %v985_v61 }
 0xff3   :  { %5065 = vmatprep.mubr.msk.f32.mxu0 %vm5745_vm2, %v5743_v3  ;;  %5064 = vmatpush3.msra.mxu0 %v1201_v30 }
 0xff4   :  { %5068 = vmatprep.subr.mxu0 %v5743_v3 }
0x10b2   :  { %v1054_v62 = vpop.f32.mrf.mxu0 }
0x10b3   :  { %v1061_v39 = vrot.slane %v1054_v62, 2 }
0x10b4   :  { %v1056_v63 = vpop.f32.mrf.mxu0 }
0x10b5   :  { %v1062_v5 = vrot.slane %v1056_v63, 2  ;;  %v1065_v59 = vadd.f32 %v1061_v39, %v6145_v54  ;;  %v1105_v54 = vld [vmem:[%s7041_s28 + $0x28] sm:$0xff] }
0x10b7   :  { %v1066_v7 = vadd.f32 %v1062_v5, %v6139_v50  ;;  %v4767_v10 = vmul.f32 -1.442695, %v1065_v59  ;;  %v1107_v50 = vld [vmem:[%s7041_s28 + $0x38] sm:$0xff] }
0x10b8   :  { %5045 = vmatpush3.msra.mxu1 %v1107_v50 }
0x10b9   :  { %5578 = vtanh.f32 %v1066_v7  ;;  %5046 = vmatprep.subr.mxu1 %v5743_v3  ;;  %v4768_v25 = vmul.f32 -1.442695, %v1066_v7 }
0x10ba   :  { %5580 = vpow2.f32 %v4767_v10  ;;  %5047 = vmatpush3.msra.mxu1 %v1106_v4 }
0x10bb   :  { %5048 = vmatprep.subr.mxu1 %v5743_v3 }
0x10bc   :  { %5049 = vmatpush3.msra.mxu1 %v1105_v54 }
0x10bd   :  { %5050 = vmatprep.subr.mxu1 %v5743_v3 }
0x10be   :  { %5051 = vmatpush3.msra.mxu1 %v1104_v6 }
0x10bf   :  { %5052 = vmatprep.subr.mxu1 %v5743_v3 }
0x10c0   :  { %5053 = vmatpush3.msra.mxu1 %v1103_v9 }
0x10c1   :  { %5054 = vmatprep.subr.mxu1 %v5743_v3 }
0x10c2   :  { %5055 = vmatpush3.msra.mxu1 %v1102_v11 }
0x10c3   :  { %5056 = vmatprep.subr.mxu1 %v5743_v3 }
0x10c4   :  { %5057 = vmatpush3.msra.mxu1 %v1101_v21 }
0x10c5   :  { %5058 = vmatprep.subr.mxu1 %v5743_v3 }
0x10c6   :  { %v5579_v8 = vpop.eup %5578  ;;  %5059 = vmatpush3.msra.mxu1 %v1100_v22 }
0x10c7   :  { %1085 = vrot.lane.b32.xlu1 %v5579_v8, %s5744_s25  ;;  %v5581_v12 = vpop.eup %5580  ;;  %5086 = vmatprep.subr.mxu1 %v5743_v3 }
0x10c8   :  { %v1073_v13 = vadd.f32 1.0, %v5581_v12 }
0x10ca   :  { %5582 = vrcp.f32 %v1073_v13 }
0x10d7   :  { %v5583_v15 = vpop.eup %5582 }
0x10d8   :  { %v1083_v16 = vmul.f32 %v5583_v15, %v1081_v14 }
0x1139   :  { %v1086_v1 = vpop.permute.xlu1 %1085 }
0x113a   :  { %v1088_v2 = vmul.f32 %v5583_v15, %v1086_v1 }
0x113c   :  { %1090 = vrot.lane.b32.xlu0 %v1088_v2, %s5744_s25 }
0x1140   :  { %1192 = vrot.lane.b32.xlu0 %v1190_v23, %s5746_s2 }
0x11ae   :  { %v1091_v18 = vpop.permute.xlu0 %1090 }
0x11af   :  { %v1093_v20 = vadd.f32 %v1091_v18, %v1083_v16 }
0x11b1   :  { %5584 = vtanh.f32 %v1093_v20 }
0x11b2   :  { %5586 = vpow2.f32 %v4768_v25  ;;  %v1193_v35 = vpop.permute.xlu0 %1192  ;;  %v1665_v25 = vld [vmem:[%s7019_s15 + $0x18] sm:$0xff] }
0x11be   :  { %v5585_v24 = vpop.eup %5584 }
0x11bf   :  { %1096 = vrot.lane.b32.xlu1 %v5585_v24, %s5744_s25  ;;  %v5587_v17 = vpop.eup %5586  ;;  %v1578_v24 = vld [vmem:[%s7018_s13 + $0x18] sm:$0xff] }
0x11c0   :  { %v1074_v19 = vadd.f32 1.0, %v5587_v17  ;;  %v1577_v17 = vld [vmem:[%s7018_s13 + $0x10] sm:$0xff] }
0x11c2   :  { %5588 = vrcp.f32 %v1074_v19  ;;  %v1664_v19 = vld [vmem:[%s7019_s15 + $0x10] sm:$0xff] }
0x11cf   :  { %v5589_v26 = vpop.eup %5588 }
0x1231   :  { %v1097_v27 = vpop.permute.xlu1 %1096 }
0x1232   :  { %v1099_v28 = vmul.f32 %v5589_v26, %v1097_v27  ;;  %v1576_v26 = vld [vmem:[%s7018_s13 + $0x8] sm:$0xff] }
0x1233   :  { %v1663_v27 = vld [vmem:[%s7019_s15 + $0x8] sm:$0xff] }
0x1234   :  { %v1116_v29 = vrot.slane %v1099_v28, 6  ;;  %v1575_v28 = vld [vmem:[%s7018_s13] sm:$0xff] }
0x1236   :  { %5061 = vmatmul.mubr.msk.f32.vlgmr.msra.gmra.mxu1 %vm189_vm1, %v1116_v29  ;;  %v1662_v29 = vld [vmem:[%s7019_s15] sm:$0xff] }
0x1237   :  { %5094 = vmatprep.mubr.msk.f32.mxu1 %vm5745_vm2, %v5743_v3  ;;  %5087 = vmatpush3.msra.mxu1 %v1370_v43 }
0x1238   :  { %5088 = vmatprep.subr.mxu1 %v5743_v3 }
0x1239   :  { %5089 = vmatpush3.msra.mxu1 %v1369_v40 }
0x123a   :  { %5090 = vmatprep.subr.mxu1 %v5743_v3 }
0x123b   :  { %5091 = vmatpush3.msra.mxu1 %v1368_v44 }
0x123c   :  { %5092 = vmatprep.subr.mxu1 %v5743_v3 }
0x123d   :  { %5093 = vmatpush3.msra.mxu1 %v1367_v49 }
0x123e   :  { %5108 = vmatprep.subr.mxu1 %v5743_v3 }
0x12f6   :  { %v1185_v33 = vpop.f32.mrf.mxu1 }
0x12f7   :  { %v1186_v36 = vadd.f32 %v4769_v32, %v1185_v33  ;;  %v1667_v32 = vld [vmem:[%s7019_s15 + $0x28] sm:$0xff] }
0x12f8   :  { %v5062_v0 = vpop.f32.mrf.mxu1 }
0x12f9   :  { %1189 = vst [vmem:[%s7013_s20] sm:$0x3] %v1186_v36  ;;  %v1195_v37 = vmul.f32 %v1193_v35, %v1186_v36 }
0x12fb   :  { %1197 = vrot.lane.b32.xlu1 %v1195_v37, %s5747_s27  ;;  %v1745_v37 = vld [vmem:[%s7020_s1] sm:$0xff] }
0x136d   :  { %v1198_v38 = vpop.permute.xlu1 %1197 }
0x136e   :  { %v1200_v34 = vadd.f32 %v1198_v38, %v1186_v36 }
0x1370   :  { %5066 = vmatmul.mubr.msk.f32.vlgmr.msra.gmra.mxu0 %vm1209_vm3, %v1200_v34  ;;  %v1666_v34 = vld [vmem:[%s7019_s15 + $0x20] sm:$0xff] }
0x1371   :  { %5072 = vmatprep.mubr.msk.f32.mxu0 %vm5745_vm2, %v5743_v3  ;;  %5069 = vmatpush3.msra.mxu0 %v1285_v41  ;;  %v1746_v41 = vld [vmem:[%s7020_s1 + $0x8] sm:$0xff] }
0x1372   :  { %5070 = vmatprep.subr.mxu0 %v5743_v3 }
0x1373   :  { %5071 = vmatpush3.msra.mxu0 %v1284_v42  ;;  %v1747_v42 = vld [vmem:[%s7020_s1 + $0x10] sm:$0xff] }
0x1374   :  { %5075 = vmatprep.subr.mxu0 %v5743_v3 }
0x1430   :  { %v1279_v46 = vpop.f32.mrf.mxu0 }
0x1431   :  { %v1280_v47 = vadd.f32 %v4771_v45, %v1279_v46  ;;  %v1751_v45 = vld [vmem:[%s7020_s1 + $0x30] sm:$0xff]  ;;  %v1752_v46 = vld [vmem:[%s7020_s1 + $0x38] sm:$0xff] }
0x1432   :  { %v5067_v48 = vpop.f32.mrf.mxu0 }
0x1433   :  { %5590 = vtanh.f32 %v1280_v47  ;;  %v6369_v47 = vld [vmem:[%s7021_s16 + $0x18] sm:$0xff]  ;;  %v6377_v48 = vld [vmem:[%s7021_s16 + $0x10] sm:$0xff] }
0x1440   :  { %v5591_v51 = vpop.eup %5590 }
0x1441   :  { %1371 = vrot.lane.b32.xlu0 %v5591_v51, %s5748_s3  ;;  %5073 = vmatmul.mubr.msk.f32.vlgmr.msra.gmra.mxu0 %vm1293_vm4, %v5591_v51  ;;  %v6395_v51 = vld [vmem:[%s7021_s16] sm:$0xff] }
0x1442   :  { %5076 = vmatpush3.msra.mxu0 %v1370_v43  ;;  %5083 = vmatprep.mubr.msk.f32.mxu0 %vm5745_vm2, %v5743_v3  ;;  %v1748_v43 = vld [vmem:[%s7020_s1 + $0x18] sm:$0xff] }
0x1443   :  { %5077 = vmatprep.subr.mxu0 %v5743_v3 }
0x1444   :  { %5078 = vmatpush3.msra.mxu0 %v1369_v40  ;;  %v1749_v40 = vld [vmem:[%s7020_s1 + $0x20] sm:$0xff] }
0x1445   :  { %5079 = vmatprep.subr.mxu0 %v5743_v3 }
0x1446   :  { %5080 = vmatpush3.msra.mxu0 %v1368_v44  ;;  %v1750_v44 = vld [vmem:[%s7020_s1 + $0x28] sm:$0xff] }
0x1447   :  { %5081 = vmatprep.subr.mxu0 %v5743_v3 }
0x1448   :  { %5082 = vmatpush3.msra.mxu0 %v1367_v49  ;;  %v6386_v49 = vld [vmem:[%s7021_s16 + $0x8] sm:$0xff] }
0x1449   :  { %5097 = vmatprep.subr.mxu0 %v5743_v3 }
0x14b3   :  { %v1372_v52 = vpop.permute.xlu0 %1371 }
0x14b4   :  { %5084 = vmatmul.mubr.msk.f32.vlgmr.msra.gmra.mxu0 %vm89_vm0, %v1372_v52  ;;  %v4779_v52 = vld [vmem:[%s7022_s14] ss:$0 sm:$0xff] }
0x14b5   :  { %5105 = vmatprep.mubr.msk.f32.mxu0 %vm5745_vm2, %v5743_v3  ;;  %5098 = vmatpush3.msra.mxu0 %v1578_v24 }
0x14b6   :  { %5099 = vmatprep.subr.mxu0 %v5743_v3 }
0x14b7   :  { %5100 = vmatpush3.msra.mxu0 %v1577_v17 }
0x14b8   :  { %5101 = vmatprep.subr.mxu0 %v5743_v3 }
0x14b9   :  { %5102 = vmatpush3.msra.mxu0 %v1576_v26 }
0x14ba   :  { %5103 = vmatprep.subr.mxu0 %v5743_v3 }
0x14bb   :  { %5104 = vmatpush3.msra.mxu0 %v1575_v28 }
0x14bc   :  { %5119 = vmatprep.subr.mxu0 %v1667_v32 }
0x1501   :  { %v1363_v53 = vpop.f32.mrf.mxu0 }
0x1502   :  { %v1364_v57 = vadd.f32 %v4773_v56, %v1363_v53 }
0x1503   :  { %v5074_v55 = vpop.f32.mrf.mxu0 }
0x1504   :  { %v4781_v55 = vld [vmem:[%s7023_s17] ss:$0 sm:$0xff] }
0x1574   :  { %v1441_v58 = vpop.f32.mrf.mxu0 }
0x1575   :  { %v1445_v31 = vadd.f32 %v1441_v58, %v1364_v57 }
0x1576   :  { %v5085_v60 = vpop.f32.mrf.mxu0 }
0x1577   :  { %5592 = vtanh.f32 %v1445_v31  ;;  %v4776_v62 = vmul.f32 -1.442695, %v1445_v31 }
0x1579   :  { %5594 = vpow2.f32 %v4776_v62 }
0x1584   :  { %v5593_v61 = vpop.eup %5592 }
0x1585   :  { %1455 = vrot.lane.b32.xlu1 %v5593_v61, %s5749_s0 }
0x1586   :  { %v5595_v63 = vpop.eup %5594 }
0x1587   :  { %v1449_v5 = vadd.f32 1.0, %v5595_v63 }
0x1589   :  { %5596 = vrcp.f32 %v1449_v5 }
0x1596   :  { %v5597_v7 = vpop.eup %5596 }
0x1597   :  { %v1453_v59 = vmul.f32 0.0, %v5597_v7 }
0x15f7   :  { %v1456_v8 = vpop.permute.xlu1 %1455 }
0x15f8   :  { %v1458_v39 = vmul.f32 %v5597_v7, %v1456_v8 }
0x15fa   :  { %1460 = vrot.lane.b32.xlu0 %v1458_v39, %s5749_s0 }
0x166c   :  { %v1461_v10 = vpop.permute.xlu0 %1460 }
0x166d   :  { %v1463_v12 = vadd.f32 %v1461_v10, %v1453_v59 }
0x166f   :  { %5598 = vtanh.f32 %v1463_v12 }
0x167c   :  { %v5599_v13 = vpop.eup %5598 }
0x167d   :  { %1466 = vrot.lane.b32.xlu1 %v5599_v13, %s5749_s0 }
0x16ef   :  { %v1467_v15 = vpop.permute.xlu1 %1466 }
0x16f0   :  { %v1469_v1 = vmul.f32 %v5597_v7, %v1467_v15 }
0x16f2   :  { %1471 = vrot.lane.b32.xlu0 %v1469_v1, %s5744_s25 }
0x1764   :  { %v1472_v2 = vpop.permute.xlu0 %1471 }
0x1765   :  { %5095 = vmatmul.mubr.msk.f32.vlgmr.msra.gmra.mxu1 %vm89_vm0, %v1472_v2 }
0x1766   :  { %5116 = vmatprep.mubr.msk.f32.mxu1 %vm5745_vm2, %v5743_v3  ;;  %5109 = vmatpush3.msra.mxu1 %v1665_v25 }
0x1767   :  { %5110 = vmatprep.subr.mxu1 %v5743_v3 }
0x1768   :  { %5111 = vmatpush3.msra.mxu1 %v1664_v19 }
0x1769   :  { %5112 = vmatprep.subr.mxu1 %v5743_v3 }
0x176a   :  { %5113 = vmatpush3.msra.mxu1 %v1663_v27 }
0x176b   :  { %5114 = vmatprep.subr.mxu1 %v5743_v3 }
0x176c   :  { %5115 = vmatpush3.msra.mxu1 %v1662_v29 }
0x176d   :  { %5135 = vmatprep.subr.mxu1 %v5743_v3 }
0x1825   :  { %v1541_v50 = vpop.f32.mrf.mxu1 }
0x1826   :  { %v1545_v4 = vadd.f32 %v1541_v50, %v1364_v57 }
0x1827   :  { %v5096_v54 = vpop.f32.mrf.mxu1 }
0x1828   :  { %5600 = vtanh.f32 %v1545_v4  ;;  %v4778_v9 = vmul.f32 -1.442695, %v1545_v4 }
0x182a   :  { %5602 = vpow2.f32 %v4778_v9 }
0x1835   :  { %v5601_v6 = vpop.eup %5600 }
0x1836   :  { %1555 = vrot.lane.b32.xlu1 %v5601_v6, %s5749_s0 }
0x1837   :  { %v5603_v11 = vpop.eup %5602 }
0x1838   :  { %v1549_v14 = vadd.f32 1.0, %v5603_v11 }
0x183a   :  { %5604 = vrcp.f32 %v1549_v14 }
0x1847   :  { %v5605_v16 = vpop.eup %5604 }
0x1848   :  { %v1553_v21 = vmul.f32 %v5605_v16, %v1463_v12 }
0x18a8   :  { %v1556_v18 = vpop.permute.xlu1 %1555 }
0x18a9   :  { %v1558_v20 = vmul.f32 %v5605_v16, %v1556_v18 }
0x18ab   :  { %1560 = vrot.lane.b32.xlu0 %v1558_v20, %s5749_s0 }
0x191d   :  { %v1561_v22 = vpop.permute.xlu0 %1560 }
0x191e   :  { %v1563_v23 = vadd.f32 %v1561_v22, %v1553_v21 }
0x1920   :  { %5606 = vtanh.f32 %v1563_v23 }
0x192d   :  { %v5607_v30 = vpop.eup %5606 }
0x192e   :  { %1566 = vrot.lane.b32.xlu1 %v5607_v30, %s5749_s0 }
0x19a0   :  { %v1567_v33 = vpop.permute.xlu1 %1566 }
0x19a1   :  { %v1569_v35 = vmul.f32 %v5605_v16, %v1567_v33 }
0x19a3   :  { %v1571_v36 = vrot.slane %v1569_v35, 6 }
0x19a5   :  { %v1574_v0 = vsel %vm1573_vm5, %v1469_v1, %v1571_v36 }
0x19a6   :  { %1587 = vrot.lane.b32.xlu0 %v1574_v0, %s5744_s25 }
0x1a18   :  { %v1588_v38 = vpop.permute.xlu0 %1587 }
0x1a19   :  { %5106 = vmatmul.mubr.msk.f32.vlgmr.msra.gmra.mxu0 %vm89_vm0, %v1588_v38  ;;  %5117 = vmatmul.mubr.msk.f32.vlgmr.msra.gmra.mxu1 %vm89_vm0, %v1588_v38  ;;  %v6461_v38 = vld [vmem:[%s7024_s18 + $0x18] sm:$0xff] }
0x1a1a   :  { %5120 = vmatpush3.msra.mxu0 %v1667_v32  ;;  %5123 = vmatprep.mubr.msk.f32.mxu0 %vm1293_vm4, %v1745_v37 }
0x1a1b   :  { %5121 = vmatprep.subr.mxu0 %v1666_v34  ;;  %5143 = vmatprep.mubr.msk.f32.mxu1 %vm5745_vm2, %v5743_v3 }
0x1a1c   :  { %5122 = vmatpush3.msra.mxu0 %v1666_v34  ;;  %5136 = vmatpush3.msra.mxu1 %v6369_v47  ;;  %v6466_v34 = vld [vmem:[%s7024_s18 + $0x10] sm:$0xff] }
0x1a1d   :  { %5124 = vmatmul.mubr.msk.f32.vlgmr.msra.gmra.mxu0 %vm1293_vm4, %v1746_v41  ;;  %5157 = vmatprep.subr.mxu0 %v5743_v3  ;;  %v6473_v41 = vld [vmem:[%s7024_s18 + $0x8] sm:$0xff] }
0x1a1e   :  { %5126 = vmatprep.mubr.msk.f32.mxu0 %vm1293_vm4, %v1747_v42  ;;  %5158 = vmatpush3.msra.mxu0 %v6369_v47  ;;  %v6480_v42 = vld [vmem:[%s7024_s18] sm:$0xff] }
0x1a1f   :  { %5137 = vmatprep.subr.mxu1 %v5743_v3  ;;  %5159 = vmatprep.subr.mxu0 %v5743_v3 }
0x1a20   :  { %5138 = vmatpush3.msra.mxu1 %v6377_v48  ;;  %5160 = vmatpush3.msra.mxu0 %v6377_v48 }
0x1a21   :  { %5127 = vmatmul.mubr.msk.f32.gmra.mxu0 %vm1293_vm4, %v1748_v43  ;;  %5139 = vmatprep.subr.mxu1 %v5743_v3 }
0x1a22   :  { %5129 = vmatprep.mubr.msk.f32.mxu0 %vm1293_vm4, %v1749_v40  ;;  %5161 = vmatprep.subr.mxu0 %v5743_v3 }
0x1a23   :  { %5140 = vmatpush3.msra.mxu1 %v6386_v49  ;;  %5162 = vmatpush3.msra.mxu0 %v6386_v49 }
0x1a24   :  { %5141 = vmatprep.subr.mxu1 %v5743_v3  ;;  %5163 = vmatprep.subr.mxu0 %v5743_v3 }
0x1a25   :  { %5130 = vmatmul.mubr.msk.f32.gmra.mxu0 %vm1293_vm4, %v1750_v44  ;;  %5142 = vmatpush3.msra.mxu1 %v6395_v51 }
0x1a26   :  { %5132 = vmatprep.mubr.msk.f32.mxu0 %vm1293_vm4, %v1751_v45  ;;  %5164 = vmatpush3.msra.mxu0 %v6395_v51 }
0x1a27   :  { %5146 = vmatprep.subr.mxu1 %v5743_v3  ;;  %5179 = vmatprep.subr.mxu0 %v5743_v3 }
0x1a29   :  { %5133 = vmatmul.mubr.msk.f32.gmra.mxu0 %vm1293_vm4, %v1752_v46 }
0x1a2a   :  { %5165 = vmatprep.mubr.msk.f32.mxu0 %vm5745_vm2, %v5743_v3 }
0x1ad9   :  { %v1657_v53 = vpop.f32.mrf.mxu0  ;;  %v1741_v56 = vpop.f32.mrf.mxu1 }
0x1ada   :  { %v1658_v57 = vadd.f32 %v4779_v52, %v1657_v53  ;;  %v6408_v60 = vadd.f32 %v4781_v55, %v1741_v56  ;;  %v6515_v52 = vld [vmem:[%s7025_s19] ss:$0 sm:$0xff] }
0x1adb   :  { %v5107_v58 = vpop.f32.mrf.mxu0  ;;  %v5118_v31 = vpop.f32.mrf.mxu1 }
0x1adc   :  { %5608 = vtanh.f32 %v1658_v57 }
0x1add   :  { %v5125_v61 = vpop.f32.mrf.mxu0 }
0x1ade   :  { %v6411_v62 = vadd.f32 %v5125_v61, %v6408_v60  ;;  %v2428_v63 = vrot.slane %v5125_v61, 4 }
0x1adf   :  { %v1843_v5 = vpop.f32.mrf.mxu0 }
0x1ae0   :  { %v2073_v7 = vrot.slane %v1843_v5, 4  ;;  %v6414_v8 = vadd.f32 %v2428_v63, %v6408_v60  ;;  %v1887_v25 = vadd.f32 %v1843_v5, %v6408_v60 }
0x1ae1   :  { %v5128_v39 = vpop.f32.mrf.mxu0 }
0x1ae2   :  { %v6417_v59 = vadd.f32 %v5128_v39, %v6408_v60  ;;  %v3138_v10 = vrot.slane %v5128_v39, 4  ;;  %v6420_v12 = vadd.f32 %v2073_v7, %v6408_v60 }
0x1ae3   :  { %v1853_v13 = vpop.f32.mrf.mxu0 }
0x1ae4   :  { %v6423_v15 = vadd.f32 %v1853_v13, %v6408_v60  ;;  %v2783_v1 = vrot.slane %v1853_v13, 4  ;;  %v6426_v2 = vadd.f32 %v3138_v10, %v6408_v60 }
0x1ae5   :  { %v5131_v50 = vpop.f32.mrf.mxu0 }
0x1ae6   :  { %v6429_v4 = vadd.f32 %v5131_v50, %v6408_v60  ;;  %v3848_v54 = vrot.slane %v5131_v50, 4  ;;  %v6432_v6 = vadd.f32 %v2783_v1, %v6408_v60 }
0x1ae7   :  { %v1863_v9 = vpop.f32.mrf.mxu0 }
0x1ae8   :  { %v6435_v11 = vadd.f32 %v1863_v9, %v6408_v60  ;;  %v3493_v14 = vrot.slane %v1863_v9, 4  ;;  %v6438_v16 = vadd.f32 %v3848_v54, %v6408_v60 }
0x1ae9   :  { %v5609_v18 = vpop.eup %5608  ;;  %v5134_v20 = vpop.f32.mrf.mxu0 }
0x1aea   :  { %v6441_v21 = vadd.f32 %v5134_v20, %v6408_v60  ;;  %v4558_v22 = vrot.slane %v5134_v20, 4  ;;  %5144 = vmatmul.mubr.msk.f32.vlgmr.msra.gmra.mxu1 %vm89_vm0, %v5609_v18  ;;  %v6445_v23 = vadd.f32 %v3493_v14, %v6408_v60 }
0x1aeb   :  { %5154 = vmatprep.mubr.msk.f32.mxu1 %vm5745_vm2, %v5743_v3  ;;  %5147 = vmatpush3.msra.mxu1 %v6461_v38  ;;  %v6510_v46 = vpop.f32.mrf.mxu0 }
0x1aec   :  { %v6450_v24 = vadd.f32 %v4558_v22, %v6408_v60  ;;  %5148 = vmatprep.subr.mxu1 %v5743_v3 }
0x1aed   :  { %5149 = vmatpush3.msra.mxu1 %v6466_v34 }
0x1aee   :  { %5150 = vmatprep.subr.mxu1 %v5743_v3 }
0x1aef   :  { %5151 = vmatpush3.msra.mxu1 %v6473_v41 }
0x1af0   :  { %5152 = vmatprep.subr.mxu1 %v5743_v3 }
0x1af1   :  { %5153 = vmatpush3.msra.mxu1 %v6480_v42 }
0x1af2   :  { %5168 = vmatprep.subr.mxu1 %v5743_v3 }
0x1baa   :  { %v1961_v17 = vpop.f32.mrf.mxu1 }
0x1bab   :  { %v1965_v19 = vadd.f32 %v1961_v17, %v1887_v25 }
0x1bac   :  { %v5145_v26 = vpop.f32.mrf.mxu1 }
0x1bad   :  { %5610 = vtanh.f32 %v1965_v19  ;;  %v4792_v28 = vmul.f32 -1.442695, %v1965_v19 }
0x1baf   :  { %5612 = vpow2.f32 %v4792_v28 }
0x1bba   :  { %v5611_v27 = vpop.eup %5610 }
0x1bbb   :  { %1975 = vrot.lane.b32.xlu1 %v5611_v27, %s5749_s0 }
0x1bbc   :  { %v5613_v29 = vpop.eup %5612 }
0x1bbd   :  { %v1969_v30 = vadd.f32 1.0, %v5613_v29 }
0x1bbf   :  { %5614 = vrcp.f32 %v1969_v30 }
0x1bcc   :  { %v5615_v32 = vpop.eup %5614 }
0x1bcd   :  { %v1973_v36 = vmul.f32 0.0, %v5615_v32 }
0x1c2d   :  { %v1976_v33 = vpop.permute.xlu1 %1975 }
0x1c2e   :  { %v1978_v35 = vmul.f32 %v5615_v32, %v1976_v33 }
0x1c30   :  { %1980 = vrot.lane.b32.xlu0 %v1978_v35, %s5749_s0 }
0x1ca2   :  { %v1981_v0 = vpop.permute.xlu0 %1980 }
0x1ca3   :  { %v6455_v37 = vadd.f32 %v1981_v0, %v1973_v36 }
0x1ca5   :  { %5616 = vtanh.f32 %v6455_v37 }
0x1cb2   :  { %v5617_v43 = vpop.eup %5616 }
0x1cb3   :  { %1986 = vrot.lane.b32.xlu1 %v5617_v43, %s5749_s0 }
0x1d25   :  { %v1987_v40 = vpop.permute.xlu1 %1986 }
0x1d26   :  { %v1989_v44 = vmul.f32 %v5615_v32, %v1987_v40 }
0x1d28   :  { %1997 = vrot.lane.b32.xlu0 %v1989_v44, %s5744_s25 }
0x1d9a   :  { %v1998_v45 = vpop.permute.xlu0 %1997 }
0x1d9b   :  { %5155 = vmatmul.mubr.msk.f32.vlgmr.msra.gmra.mxu1 %vm89_vm0, %v1998_v45  ;;  %5166 = vmatmul.mubr.msk.f32.vlgmr.msra.gmra.mxu0 %vm89_vm0, %v1998_v45 }
0x1d9c   :  { %5169 = vmatpush3.msra.mxu1 %v6461_v38  ;;  %5180 = vmatpush3.msra.mxu0 %v6369_v47 }
0x1d9d   :  { %5170 = vmatprep.subr.mxu1 %v5743_v3  ;;  %5181 = vmatprep.subr.mxu0 %v5743_v3 }
0x1d9e   :  { %5171 = vmatpush3.msra.mxu1 %v6466_v34  ;;  %5182 = vmatpush3.msra.mxu0 %v6377_v48 }
0x1d9f   :  { %5172 = vmatprep.subr.mxu1 %v5743_v3  ;;  %5183 = vmatprep.subr.mxu0 %v5743_v3 }
0x1da0   :  { %5173 = vmatpush3.msra.mxu1 %v6473_v41  ;;  %5184 = vmatpush3.msra.mxu0 %v6386_v49 }
0x1da1   :  { %5174 = vmatprep.subr.mxu1 %v5743_v3  ;;  %5185 = vmatprep.subr.mxu0 %v5743_v3 }
0x1da2   :  { %5186 = vmatpush3.msra.mxu0 %v6395_v51  ;;  %5187 = vmatprep.mubr.msk.f32.mxu0 %vm5745_vm2, %v5743_v3 }
0x1da3   :  { %5175 = vmatpush3.msra.mxu1 %v6480_v42  ;;  %5176 = vmatprep.mubr.msk.f32.mxu1 %vm5745_vm2, %v5743_v3 }
0x1da4   :  { %5190 = vmatprep.subr.mxu1 %v5743_v3  ;;  %5201 = vmatprep.subr.mxu0 %v5743_v3 }
0x1e5b   :  { %v2067_v53 = vpop.f32.mrf.mxu1  ;;  %v2146_v55 = vpop.f32.mrf.mxu0 }
0x1e5c   :  { %v2068_v56 = vadd.f32 %v6515_v52, %v2067_v53  ;;  %v2150_v57 = vadd.f32 %v2146_v55, %v6420_v12 }
0x1e5d   :  { %v5156_v58 = vpop.f32.mrf.mxu1  ;;  %v5167_v31 = vpop.f32.mrf.mxu0 }
0x1e5e   :  { %2071 = vst [vmem:[%s7026_s21] sm:$0xf] %v2068_v56  ;;  %5618 = vtanh.f32 %v2150_v57  ;;  %v4796_v63 = vmul.f32 -1.442695, %v2150_v57 }
0x1e60   :  { %5620 = vpow2.f32 %v4796_v63 }
0x1e6b   :  { %v5619_v61 = vpop.eup %5618 }
0x1e6c   :  { %2160 = vrot.lane.b32.xlu1 %v5619_v61, %s5749_s0 }
0x1e6d   :  { %v5621_v5 = vpop.eup %5620 }
0x1e6e   :  { %v2154_v7 = vadd.f32 1.0, %v5621_v5 }
0x1e70   :  { %5622 = vrcp.f32 %v2154_v7 }
0x1e7d   :  { %v5623_v39 = vpop.eup %5622 }
0x1e7e   :  { %v2158_v12 = vmul.f32 %v5623_v39, %v6455_v37 }
0x1ede   :  { %v2161_v10 = vpop.permute.xlu1 %2160 }
0x1edf   :  { %v2163_v13 = vmul.f32 %v5623_v39, %v2161_v10 }
0x1ee1   :  { %2165 = vrot.lane.b32.xlu0 %v2163_v13, %s5749_s0 }
0x1f53   :  { %v2166_v1 = vpop.permute.xlu0 %2165 }
0x1f54   :  { %v2168_v50 = vadd.f32 %v2166_v1, %v2158_v12 }
0x1f56   :  { %5624 = vtanh.f32 %v2168_v50 }
0x1f63   :  { %v5625_v54 = vpop.eup %5624 }
0x1f64   :  { %2171 = vrot.lane.b32.xlu1 %v5625_v54, %s5749_s0 }
0x1fd6   :  { %v2172_v9 = vpop.permute.xlu1 %2171 }
0x1fd7   :  { %v2174_v14 = vmul.f32 %v5623_v39, %v2172_v9 }
0x1fd9   :  { %2176 = vrot.lane.b32.xlu0 %v2174_v14, %s5744_s25 }
0x204b   :  { %v2177_v18 = vpop.permute.xlu0 %2176 }
0x204c   :  { %5177 = vmatmul.mubr.msk.f32.vlgmr.msra.gmra.mxu1 %vm89_vm0, %v2177_v18  ;;  %5188 = vmatmul.mubr.msk.f32.vlgmr.msra.gmra.mxu0 %vm89_vm0, %v2177_v18 }
0x204d   :  { %5191 = vmatpush3.msra.mxu1 %v6461_v38  ;;  %5202 = vmatpush3.msra.mxu0 %v6369_v47 }
0x204e   :  { %5192 = vmatprep.subr.mxu1 %v5743_v3  ;;  %5203 = vmatprep.subr.mxu0 %v5743_v3 }
0x204f   :  { %5193 = vmatpush3.msra.mxu1 %v6466_v34  ;;  %5204 = vmatpush3.msra.mxu0 %v6377_v48 }
0x2050   :  { %5194 = vmatprep.subr.mxu1 %v5743_v3  ;;  %5205 = vmatprep.subr.mxu0 %v5743_v3 }
0x2051   :  { %5195 = vmatpush3.msra.mxu1 %v6473_v41  ;;  %5206 = vmatpush3.msra.mxu0 %v6386_v49 }
0x2052   :  { %5196 = vmatprep.subr.mxu1 %v5743_v3  ;;  %5207 = vmatprep.subr.mxu0 %v5743_v3 }
0x2053   :  { %5208 = vmatpush3.msra.mxu0 %v6395_v51  ;;  %5209 = vmatprep.mubr.msk.f32.mxu0 %vm5745_vm2, %v5743_v3 }
0x2054   :  { %5197 = vmatpush3.msra.mxu1 %v6480_v42  ;;  %5198 = vmatprep.mubr.msk.f32.mxu1 %vm5745_vm2, %v5743_v3 }
0x2055   :  { %5212 = vmatprep.subr.mxu1 %v5743_v3  ;;  %5223 = vmatprep.subr.mxu0 %v5743_v3 }
0x210c   :  { %v2246_v20 = vpop.f32.mrf.mxu1  ;;  %v2322_v22 = vpop.f32.mrf.mxu0 }
0x210d   :  { %v2247_v25 = vadd.f32 %v6515_v52, %v2246_v20  ;;  %v2326_v17 = vadd.f32 %v2322_v22, %v6411_v62 }
0x210e   :  { %v5178_v19 = vpop.f32.mrf.mxu1  ;;  %v5189_v26 = vpop.f32.mrf.mxu0 }
0x210f   :  { %2250 = vst [vmem:[%s7026_s21 + $0x4] sm:$0xf] %v2247_v25  ;;  %5626 = vtanh.f32 %v2326_v17  ;;  %v4799_v28 = vmul.f32 -1.442695, %v2326_v17 }
0x2111   :  { %5628 = vpow2.f32 %v4799_v28 }
0x211c   :  { %v5627_v27 = vpop.eup %5626 }
0x211d   :  { %2336 = vrot.lane.b32.xlu1 %v5627_v27, %s5749_s0 }
0x211e   :  { %v5629_v29 = vpop.eup %5628 }
0x211f   :  { %v2330_v30 = vadd.f32 1.0, %v5629_v29 }
0x2121   :  { %5630 = vrcp.f32 %v2330_v30 }
0x212e   :  { %v5631_v32 = vpop.eup %5630 }
0x212f   :  { %v2334_v62 = vmul.f32 %v5631_v32, %v2168_v50 }
0x218f   :  { %v2337_v33 = vpop.permute.xlu1 %2336 }
0x2190   :  { %v2339_v35 = vmul.f32 %v5631_v32, %v2337_v33 }
0x2192   :  { %2341 = vrot.lane.b32.xlu0 %v2339_v35, %s5749_s0 }
0x2204   :  { %v2342_v36 = vpop.permute.xlu0 %2341 }
0x2205   :  { %v2344_v0 = vadd.f32 %v2342_v36, %v2334_v62 }
0x2207   :  { %5632 = vtanh.f32 %v2344_v0 }
0x2214   :  { %v5633_v37 = vpop.eup %5632 }
0x2215   :  { %2347 = vrot.lane.b32.xlu1 %v5633_v37, %s5749_s0 }
0x2287   :  { %v2348_v43 = vpop.permute.xlu1 %2347 }
0x2288   :  { %v2350_v40 = vmul.f32 %v5631_v32, %v2348_v43 }
0x228a   :  { %2352 = vrot.lane.b32.xlu0 %v2350_v40, %s5744_s25 }
0x22fc   :  { %v2353_v44 = vpop.permute.xlu0 %2352 }
0x22fd   :  { %5199 = vmatmul.mubr.msk.f32.vlgmr.msra.gmra.mxu1 %vm89_vm0, %v2353_v44  ;;  %5210 = vmatmul.mubr.msk.f32.vlgmr.msra.gmra.mxu0 %vm89_vm0, %v2353_v44 }
0x22fe   :  { %5213 = vmatpush3.msra.mxu1 %v6461_v38  ;;  %5224 = vmatpush3.msra.mxu0 %v6369_v47 }
0x22ff   :  { %5214 = vmatprep.subr.mxu1 %v5743_v3  ;;  %5225 = vmatprep.subr.mxu0 %v5743_v3 }
0x2300   :  { %5215 = vmatpush3.msra.mxu1 %v6466_v34  ;;  %5226 = vmatpush3.msra.mxu0 %v6377_v48 }
0x2301   :  { %5216 = vmatprep.subr.mxu1 %v5743_v3  ;;  %5227 = vmatprep.subr.mxu0 %v5743_v3 }
0x2302   :  { %5217 = vmatpush3.msra.mxu1 %v6473_v41  ;;  %5228 = vmatpush3.msra.mxu0 %v6386_v49 }
0x2303   :  { %5218 = vmatprep.subr.mxu1 %v5743_v3  ;;  %5229 = vmatprep.subr.mxu0 %v5743_v3 }
0x2304   :  { %5230 = vmatpush3.msra.mxu0 %v6395_v51  ;;  %5231 = vmatprep.mubr.msk.f32.mxu0 %vm5745_vm2, %v5743_v3 }
0x2305   :  { %5219 = vmatpush3.msra.mxu1 %v6480_v42  ;;  %5220 = vmatprep.mubr.msk.f32.mxu1 %vm5745_vm2, %v5743_v3 }
0x2306   :  { %5234 = vmatprep.subr.mxu1 %v5743_v3  ;;  %5245 = vmatprep.subr.mxu0 %v5743_v3 }
0x23bd   :  { %v2422_v45 = vpop.f32.mrf.mxu1  ;;  %v2501_v53 = vpop.f32.mrf.mxu0 }
0x23be   :  { %v2423_v55 = vadd.f32 %v6515_v52, %v2422_v45  ;;  %v2505_v56 = vadd.f32 %v2501_v53, %v6414_v8 }
0x23bf   :  { %v5200_v57 = vpop.f32.mrf.mxu1  ;;  %v5211_v58 = vpop.f32.mrf.mxu0 }
0x23c0   :  { %2426 = vst [vmem:[%s7026_s21 + $0x8] sm:$0xf] %v2423_v55  ;;  %5634 = vtanh.f32 %v2505_v56  ;;  %v4802_v61 = vmul.f32 -1.442695, %v2505_v56 }
0x23c2   :  { %5636 = vpow2.f32 %v4802_v61 }
0x23cd   :  { %v5635_v31 = vpop.eup %5634 }
0x23ce   :  { %2515 = vrot.lane.b32.xlu1 %v5635_v31, %s5749_s0 }
0x23cf   :  { %v5637_v63 = vpop.eup %5636 }
0x23d0   :  { %v2509_v5 = vadd.f32 1.0, %v5637_v63 }
0x23d2   :  { %5638 = vrcp.f32 %v2509_v5 }
0x23df   :  { %v5639_v7 = vpop.eup %5638 }
0x23e0   :  { %v2513_v8 = vmul.f32 %v5639_v7, %v2344_v0 }
0x2440   :  { %v2516_v39 = vpop.permute.xlu1 %2515 }
0x2441   :  { %v2518_v10 = vmul.f32 %v5639_v7, %v2516_v39 }
0x2443   :  { %2520 = vrot.lane.b32.xlu0 %v2518_v10, %s5749_s0 }
0x24b5   :  { %v2521_v13 = vpop.permute.xlu0 %2520 }
0x24b6   :  { %v2523_v12 = vadd.f32 %v2521_v13, %v2513_v8 }
0x24b8   :  { %5640 = vtanh.f32 %v2523_v12 }
0x24c5   :  { %v5641_v1 = vpop.eup %5640 }
0x24c6   :  { %2526 = vrot.lane.b32.xlu1 %v5641_v1, %s5749_s0 }
0x2538   :  { %v2527_v50 = vpop.permute.xlu1 %2526 }
0x2539   :  { %v2529_v54 = vmul.f32 %v5639_v7, %v2527_v50 }
0x253b   :  { %2531 = vrot.lane.b32.xlu0 %v2529_v54, %s5744_s25 }
0x25ad   :  { %v2532_v9 = vpop.permute.xlu0 %2531 }
0x25ae   :  { %5221 = vmatmul.mubr.msk.f32.vlgmr.msra.gmra.mxu1 %vm89_vm0, %v2532_v9  ;;  %5232 = vmatmul.mubr.msk.f32.vlgmr.msra.gmra.mxu0 %vm89_vm0, %v2532_v9 }
0x25af   :  { %5235 = vmatpush3.msra.mxu1 %v6461_v38  ;;  %5246 = vmatpush3.msra.mxu0 %v6369_v47 }
0x25b0   :  { %5236 = vmatprep.subr.mxu1 %v5743_v3  ;;  %5247 = vmatprep.subr.mxu0 %v5743_v3 }
0x25b1   :  { %5237 = vmatpush3.msra.mxu1 %v6466_v34  ;;  %5248 = vmatpush3.msra.mxu0 %v6377_v48 }
0x25b2   :  { %5238 = vmatprep.subr.mxu1 %v5743_v3  ;;  %5249 = vmatprep.subr.mxu0 %v5743_v3 }
0x25b3   :  { %5239 = vmatpush3.msra.mxu1 %v6473_v41  ;;  %5250 = vmatpush3.msra.mxu0 %v6386_v49 }
0x25b4   :  { %5240 = vmatprep.subr.mxu1 %v5743_v3  ;;  %5251 = vmatprep.subr.mxu0 %v5743_v3 }
0x25b5   :  { %5252 = vmatpush3.msra.mxu0 %v6395_v51  ;;  %5253 = vmatprep.mubr.msk.f32.mxu0 %vm5745_vm2, %v5743_v3 }
0x25b6   :  { %5241 = vmatpush3.msra.mxu1 %v6480_v42  ;;  %5242 = vmatprep.mubr.msk.f32.mxu1 %vm5745_vm2, %v5743_v3 }
0x25b7   :  { %5256 = vmatprep.subr.mxu1 %v5743_v3  ;;  %5267 = vmatprep.subr.mxu0 %v5743_v3 }
0x266e   :  { %v2601_v14 = vpop.f32.mrf.mxu1  ;;  %v2677_v18 = vpop.f32.mrf.mxu0 }
0x266f   :  { %v2602_v20 = vadd.f32 %v6515_v52, %v2601_v14  ;;  %v2681_v22 = vadd.f32 %v2677_v18, %v6423_v15 }
0x2670   :  { %v5222_v25 = vpop.f32.mrf.mxu1  ;;  %v5233_v17 = vpop.f32.mrf.mxu0 }
0x2671   :  { %2605 = vst [vmem:[%s7026_s21 + $0xc] sm:$0xf] %v2602_v20  ;;  %5642 = vtanh.f32 %v2681_v22  ;;  %v4805_v26 = vmul.f32 -1.442695, %v2681_v22 }
0x2673   :  { %5644 = vpow2.f32 %v4805_v26 }
0x267e   :  { %v5643_v19 = vpop.eup %5642 }
0x267f   :  { %2691 = vrot.lane.b32.xlu1 %v5643_v19, %s5749_s0 }
0x2680   :  { %v5645_v27 = vpop.eup %5644 }
0x2681   :  { %v2685_v28 = vadd.f32 1.0, %v5645_v27 }
0x2683   :  { %5646 = vrcp.f32 %v2685_v28 }
0x2690   :  { %v5647_v29 = vpop.eup %5646 }
0x2691   :  { %v2689_v15 = vmul.f32 %v5647_v29, %v2523_v12 }
0x26f1   :  { %v2692_v30 = vpop.permute.xlu1 %2691 }
0x26f2   :  { %v2694_v32 = vmul.f32 %v5647_v29, %v2692_v30 }
0x26f4   :  { %2696 = vrot.lane.b32.xlu0 %v2694_v32, %s5749_s0 }
0x2766   :  { %v2697_v33 = vpop.permute.xlu0 %2696 }
0x2767   :  { %v2699_v35 = vadd.f32 %v2697_v33, %v2689_v15 }
0x2769   :  { %5648 = vtanh.f32 %v2699_v35 }
0x2776   :  { %v5649_v62 = vpop.eup %5648 }
0x2777   :  { %2702 = vrot.lane.b32.xlu1 %v5649_v62, %s5749_s0 }
0x27e9   :  { %v2703_v36 = vpop.permute.xlu1 %2702 }
0x27ea   :  { %v2705_v0 = vmul.f32 %v5647_v29, %v2703_v36 }
0x27ec   :  { %2707 = vrot.lane.b32.xlu0 %v2705_v0, %s5744_s25 }
0x285e   :  { %v2708_v37 = vpop.permute.xlu0 %2707 }
0x285f   :  { %5243 = vmatmul.mubr.msk.f32.vlgmr.msra.gmra.mxu1 %vm89_vm0, %v2708_v37  ;;  %5254 = vmatmul.mubr.msk.f32.vlgmr.msra.gmra.mxu0 %vm89_vm0, %v2708_v37 }
0x2860   :  { %5257 = vmatpush3.msra.mxu1 %v6461_v38  ;;  %5268 = vmatpush3.msra.mxu0 %v6369_v47 }
0x2861   :  { %5258 = vmatprep.subr.mxu1 %v5743_v3  ;;  %5269 = vmatprep.subr.mxu0 %v5743_v3 }
0x2862   :  { %5259 = vmatpush3.msra.mxu1 %v6466_v34  ;;  %5270 = vmatpush3.msra.mxu0 %v6377_v48 }
0x2863   :  { %5260 = vmatprep.subr.mxu1 %v5743_v3  ;;  %5271 = vmatprep.subr.mxu0 %v5743_v3 }
0x2864   :  { %5261 = vmatpush3.msra.mxu1 %v6473_v41  ;;  %5272 = vmatpush3.msra.mxu0 %v6386_v49 }
0x2865   :  { %5262 = vmatprep.subr.mxu1 %v5743_v3  ;;  %5273 = vmatprep.subr.mxu0 %v5743_v3 }
0x2866   :  { %5274 = vmatpush3.msra.mxu0 %v6395_v51  ;;  %5275 = vmatprep.mubr.msk.f32.mxu0 %vm5745_vm2, %v5743_v3 }
0x2867   :  { %5263 = vmatpush3.msra.mxu1 %v6480_v42  ;;  %5264 = vmatprep.mubr.msk.f32.mxu1 %vm5745_vm2, %v5743_v3 }
0x2868   :  { %5278 = vmatprep.subr.mxu1 %v5743_v3  ;;  %5289 = vmatprep.subr.mxu0 %v5743_v3 }
0x291f   :  { %v2777_v43 = vpop.f32.mrf.mxu1  ;;  %v2856_v40 = vpop.f32.mrf.mxu0 }
0x2920   :  { %v2778_v44 = vadd.f32 %v6515_v52, %v2777_v43  ;;  %v2860_v45 = vadd.f32 %v2856_v40, %v6432_v6 }
0x2921   :  { %v5244_v53 = vpop.f32.mrf.mxu1  ;;  %v5255_v55 = vpop.f32.mrf.mxu0 }
0x2922   :  { %2781 = vst [vmem:[%s7026_s21 + $0x10] sm:$0xf] %v2778_v44  ;;  %5650 = vtanh.f32 %v2860_v45  ;;  %v4808_v57 = vmul.f32 -1.442695, %v2860_v45 }
0x2924   :  { %5652 = vpow2.f32 %v4808_v57 }
0x292f   :  { %v5651_v56 = vpop.eup %5650 }
0x2930   :  { %2870 = vrot.lane.b32.xlu1 %v5651_v56, %s5749_s0 }
0x2931   :  { %v5653_v58 = vpop.eup %5652 }
0x2932   :  { %v2864_v31 = vadd.f32 1.0, %v5653_v58 }
0x2934   :  { %5654 = vrcp.f32 %v2864_v31 }
0x2941   :  { %v5655_v61 = vpop.eup %5654 }
0x2942   :  { %v2868_v6 = vmul.f32 %v5655_v61, %v2699_v35 }
0x29a2   :  { %v2871_v63 = vpop.permute.xlu1 %2870 }
0x29a3   :  { %v2873_v5 = vmul.f32 %v5655_v61, %v2871_v63 }
0x29a5   :  { %2875 = vrot.lane.b32.xlu0 %v2873_v5, %s5749_s0 }
0x2a17   :  { %v2876_v7 = vpop.permute.xlu0 %2875 }
0x2a18   :  { %v2878_v39 = vadd.f32 %v2876_v7, %v2868_v6 }
0x2a1a   :  { %5656 = vtanh.f32 %v2878_v39 }
0x2a27   :  { %v5657_v10 = vpop.eup %5656 }
0x2a28   :  { %2881 = vrot.lane.b32.xlu1 %v5657_v10, %s5749_s0 }
0x2a9a   :  { %v2882_v8 = vpop.permute.xlu1 %2881 }
0x2a9b   :  { %v2884_v13 = vmul.f32 %v5655_v61, %v2882_v8 }
0x2a9d   :  { %2886 = vrot.lane.b32.xlu0 %v2884_v13, %s5744_s25 }
0x2b0f   :  { %v2887_v12 = vpop.permute.xlu0 %2886 }
0x2b10   :  { %5265 = vmatmul.mubr.msk.f32.vlgmr.msra.gmra.mxu1 %vm89_vm0, %v2887_v12  ;;  %5276 = vmatmul.mubr.msk.f32.vlgmr.msra.gmra.mxu0 %vm89_vm0, %v2887_v12 }
0x2b11   :  { %5279 = vmatpush3.msra.mxu1 %v6461_v38  ;;  %5290 = vmatpush3.msra.mxu0 %v6369_v47 }
0x2b12   :  { %5280 = vmatprep.subr.mxu1 %v5743_v3  ;;  %5291 = vmatprep.subr.mxu0 %v5743_v3 }
0x2b13   :  { %5281 = vmatpush3.msra.mxu1 %v6466_v34  ;;  %5292 = vmatpush3.msra.mxu0 %v6377_v48 }
0x2b14   :  { %5282 = vmatprep.subr.mxu1 %v5743_v3  ;;  %5293 = vmatprep.subr.mxu0 %v5743_v3 }
0x2b15   :  { %5283 = vmatpush3.msra.mxu1 %v6473_v41  ;;  %5294 = vmatpush3.msra.mxu0 %v6386_v49 }
0x2b16   :  { %5284 = vmatprep.subr.mxu1 %v5743_v3  ;;  %5295 = vmatprep.subr.mxu0 %v5743_v3 }
0x2b17   :  { %5296 = vmatpush3.msra.mxu0 %v6395_v51  ;;  %5297 = vmatprep.mubr.msk.f32.mxu0 %vm5745_vm2, %v5743_v3 }
0x2b18   :  { %5285 = vmatpush3.msra.mxu1 %v6480_v42  ;;  %5286 = vmatprep.mubr.msk.f32.mxu1 %vm5745_vm2, %v5743_v3 }
0x2b19   :  { %5300 = vmatprep.subr.mxu1 %v5743_v3  ;;  %5311 = vmatprep.subr.mxu0 %v5743_v3 }
0x2bd0   :  { %v2956_v1 = vpop.f32.mrf.mxu1  ;;  %v3032_v50 = vpop.f32.mrf.mxu0 }
0x2bd1   :  { %v2957_v54 = vadd.f32 %v6515_v52, %v2956_v1  ;;  %v3036_v9 = vadd.f32 %v3032_v50, %v6417_v59 }
0x2bd2   :  { %v5266_v14 = vpop.f32.mrf.mxu1  ;;  %v5277_v18 = vpop.f32.mrf.mxu0 }
0x2bd3   :  { %2960 = vst [vmem:[%s7026_s21 + $0x14] sm:$0xf] %v2957_v54  ;;  %5658 = vtanh.f32 %v3036_v9  ;;  %v4811_v22 = vmul.f32 -1.442695, %v3036_v9 }
0x2bd5   :  { %5660 = vpow2.f32 %v4811_v22 }
0x2be0   :  { %v5659_v20 = vpop.eup %5658 }
0x2be1   :  { %3046 = vrot.lane.b32.xlu1 %v5659_v20, %s5749_s0 }
0x2be2   :  { %v5661_v25 = vpop.eup %5660 }
0x2be3   :  { %v3040_v17 = vadd.f32 1.0, %v5661_v25 }
0x2be5   :  { %5662 = vrcp.f32 %v3040_v17 }
0x2bf2   :  { %v5663_v19 = vpop.eup %5662 }
0x2bf3   :  { %v3044_v59 = vmul.f32 %v5663_v19, %v2878_v39 }
0x2c53   :  { %v3047_v26 = vpop.permute.xlu1 %3046 }
0x2c54   :  { %v3049_v27 = vmul.f32 %v5663_v19, %v3047_v26 }
0x2c56   :  { %3051 = vrot.lane.b32.xlu0 %v3049_v27, %s5749_s0 }
0x2cc8   :  { %v3052_v28 = vpop.permute.xlu0 %3051 }
0x2cc9   :  { %v3054_v29 = vadd.f32 %v3052_v28, %v3044_v59 }
0x2ccb   :  { %5664 = vtanh.f32 %v3054_v29 }
0x2cd8   :  { %v5665_v30 = vpop.eup %5664 }
0x2cd9   :  { %3057 = vrot.lane.b32.xlu1 %v5665_v30, %s5749_s0 }
0x2d4b   :  { %v3058_v32 = vpop.permute.xlu1 %3057 }
0x2d4c   :  { %v3060_v15 = vmul.f32 %v5663_v19, %v3058_v32 }
0x2d4e   :  { %3062 = vrot.lane.b32.xlu0 %v3060_v15, %s5744_s25 }
0x2dc0   :  { %v3063_v33 = vpop.permute.xlu0 %3062 }
0x2dc1   :  { %5287 = vmatmul.mubr.msk.f32.vlgmr.msra.gmra.mxu1 %vm89_vm0, %v3063_v33  ;;  %5298 = vmatmul.mubr.msk.f32.vlgmr.msra.gmra.mxu0 %vm89_vm0, %v3063_v33 }
0x2dc2   :  { %5301 = vmatpush3.msra.mxu1 %v6461_v38  ;;  %5312 = vmatpush3.msra.mxu0 %v6369_v47 }
0x2dc3   :  { %5302 = vmatprep.subr.mxu1 %v5743_v3  ;;  %5313 = vmatprep.subr.mxu0 %v5743_v3 }
0x2dc4   :  { %5303 = vmatpush3.msra.mxu1 %v6466_v34  ;;  %5314 = vmatpush3.msra.mxu0 %v6377_v48 }
0x2dc5   :  { %5304 = vmatprep.subr.mxu1 %v5743_v3  ;;  %5315 = vmatprep.subr.mxu0 %v5743_v3 }
0x2dc6   :  { %5305 = vmatpush3.msra.mxu1 %v6473_v41  ;;  %5316 = vmatpush3.msra.mxu0 %v6386_v49 }
0x2dc7   :  { %5306 = vmatprep.subr.mxu1 %v5743_v3  ;;  %5317 = vmatprep.subr.mxu0 %v5743_v3 }
0x2dc8   :  { %5318 = vmatpush3.msra.mxu0 %v6395_v51  ;;  %5319 = vmatprep.mubr.msk.f32.mxu0 %vm5745_vm2, %v5743_v3 }
0x2dc9   :  { %5307 = vmatpush3.msra.mxu1 %v6480_v42  ;;  %5308 = vmatprep.mubr.msk.f32.mxu1 %vm5745_vm2, %v5743_v3 }
0x2dca   :  { %5322 = vmatprep.subr.mxu1 %v5743_v3  ;;  %5333 = vmatprep.subr.mxu0 %v5743_v3 }
0x2e81   :  { %v3132_v35 = vpop.f32.mrf.mxu1  ;;  %v3211_v62 = vpop.f32.mrf.mxu0 }
0x2e82   :  { %v3133_v36 = vadd.f32 %v6515_v52, %v3132_v35  ;;  %v3215_v0 = vadd.f32 %v3211_v62, %v6426_v2 }
0x2e83   :  { %v5288_v37 = vpop.f32.mrf.mxu1  ;;  %v5299_v43 = vpop.f32.mrf.mxu0 }
0x2e84   :  { %3136 = vst [vmem:[%s7026_s21 + $0x18] sm:$0xf] %v3133_v36  ;;  %5666 = vtanh.f32 %v3215_v0  ;;  %v4814_v44 = vmul.f32 -1.442695, %v3215_v0 }
0x2e86   :  { %5668 = vpow2.f32 %v4814_v44 }
0x2e91   :  { %v5667_v40 = vpop.eup %5666 }
0x2e92   :  { %3225 = vrot.lane.b32.xlu1 %v5667_v40, %s5749_s0 }
0x2e93   :  { %v5669_v45 = vpop.eup %5668 }
0x2e94   :  { %v3219_v53 = vadd.f32 1.0, %v5669_v45 }
0x2e96   :  { %5670 = vrcp.f32 %v3219_v53 }
0x2ea3   :  { %v5671_v55 = vpop.eup %5670 }
0x2ea4   :  { %v3223_v2 = vmul.f32 %v5671_v55, %v3054_v29 }
0x2f04   :  { %v3226_v56 = vpop.permute.xlu1 %3225 }
0x2f05   :  { %v3228_v57 = vmul.f32 %v5671_v55, %v3226_v56 }
0x2f07   :  { %3230 = vrot.lane.b32.xlu0 %v3228_v57, %s5749_s0 }
0x2f79   :  { %v3231_v58 = vpop.permute.xlu0 %3230 }
0x2f7a   :  { %v3233_v31 = vadd.f32 %v3231_v58, %v3223_v2 }
0x2f7c   :  { %5672 = vtanh.f32 %v3233_v31 }
0x2f89   :  { %v5673_v61 = vpop.eup %5672 }
0x2f8a   :  { %3236 = vrot.lane.b32.xlu1 %v5673_v61, %s5749_s0 }
0x2ffc   :  { %v3237_v63 = vpop.permute.xlu1 %3236 }
0x2ffd   :  { %v3239_v5 = vmul.f32 %v5671_v55, %v3237_v63 }
0x2fff   :  { %3241 = vrot.lane.b32.xlu0 %v3239_v5, %s5744_s25 }
0x3071   :  { %v3242_v6 = vpop.permute.xlu0 %3241 }
0x3072   :  { %5309 = vmatmul.mubr.msk.f32.vlgmr.msra.gmra.mxu1 %vm89_vm0, %v3242_v6  ;;  %5320 = vmatmul.mubr.msk.f32.vlgmr.msra.gmra.mxu0 %vm89_vm0, %v3242_v6  ;;  %v6802_v6 = vld [vmem:[%s7021_s16 + $0x18] sm:$0xff] }
0x3073   :  { %5323 = vmatpush3.msra.mxu1 %v6461_v38  ;;  %5334 = vmatpush3.msra.mxu0 %v6369_v47 }
0x3074   :  { %5324 = vmatprep.subr.mxu1 %v5743_v3  ;;  %5335 = vmatprep.subr.mxu0 %v5743_v3 }
0x3075   :  { %5325 = vmatpush3.msra.mxu1 %v6466_v34  ;;  %5336 = vmatpush3.msra.mxu0 %v6377_v48 }
0x3076   :  { %5326 = vmatprep.subr.mxu1 %v5743_v3  ;;  %5337 = vmatprep.subr.mxu0 %v5743_v3 }
0x3077   :  { %5327 = vmatpush3.msra.mxu1 %v6473_v41  ;;  %5338 = vmatpush3.msra.mxu0 %v6386_v49 }
0x3078   :  { %5328 = vmatprep.subr.mxu1 %v5743_v3  ;;  %5339 = vmatprep.subr.mxu0 %v5743_v3 }
0x3079   :  { %5340 = vmatpush3.msra.mxu0 %v6395_v51  ;;  %5341 = vmatprep.mubr.msk.f32.mxu0 %vm5745_vm2, %v5743_v3 }
0x307a   :  { %5329 = vmatpush3.msra.mxu1 %v6480_v42  ;;  %5330 = vmatprep.mubr.msk.f32.mxu1 %vm5745_vm2, %v5743_v3 }
0x307b   :  { %5344 = vmatprep.subr.mxu1 %v5743_v3  ;;  %5355 = vmatprep.subr.mxu0 %v5743_v3 }
0x3132   :  { %v3311_v7 = vpop.f32.mrf.mxu1  ;;  %v3387_v39 = vpop.f32.mrf.mxu0 }
0x3133   :  { %v3312_v10 = vadd.f32 %v6515_v52, %v3311_v7  ;;  %v3391_v8 = vadd.f32 %v3387_v39, %v6435_v11  ;;  %v6807_v7 = vld [vmem:[%s7021_s16 + $0x10] sm:$0xff]  ;;  %v6814_v39 = vld [vmem:[%s7021_s16 + $0x8] sm:$0xff] }
0x3134   :  { %v5310_v13 = vpop.f32.mrf.mxu1  ;;  %v5321_v12 = vpop.f32.mrf.mxu0 }
0x3135   :  { %3315 = vst [vmem:[%s7026_s21 + $0x1c] sm:$0xf] %v3312_v10  ;;  %5674 = vtanh.f32 %v3391_v8  ;;  %v4817_v50 = vmul.f32 -1.442695, %v3391_v8  ;;  %v6821_v10 = vld [vmem:[%s7021_s16] sm:$0xff] }
0x3137   :  { %5676 = vpow2.f32 %v4817_v50  ;;  %v6834_v50 = vld [vmem:[%s7024_s18 + $0x18] sm:$0xff] }
0x3142   :  { %v5675_v1 = vpop.eup %5674 }
0x3143   :  { %3401 = vrot.lane.b32.xlu1 %v5675_v1, %s5749_s0 }
0x3144   :  { %v5677_v54 = vpop.eup %5676 }
0x3145   :  { %v3395_v9 = vadd.f32 1.0, %v5677_v54  ;;  %v6843_v54 = vld [vmem:[%s7024_s18 + $0x10] sm:$0xff] }
0x3147   :  { %5678 = vrcp.f32 %v3395_v9  ;;  %v6852_v9 = vld [vmem:[%s7024_s18 + $0x8] sm:$0xff] }
0x3154   :  { %v5679_v14 = vpop.eup %5678 }
0x3155   :  { %v3399_v11 = vmul.f32 %v5679_v14, %v3233_v31 }
0x31b5   :  { %v3402_v18 = vpop.permute.xlu1 %3401 }
0x31b6   :  { %v3404_v20 = vmul.f32 %v5679_v14, %v3402_v18 }
0x31b8   :  { %3406 = vrot.lane.b32.xlu0 %v3404_v20, %s5749_s0 }
0x322a   :  { %v3407_v22 = vpop.permute.xlu0 %3406 }
0x322b   :  { %v3409_v25 = vadd.f32 %v3407_v22, %v3399_v11 }
0x322d   :  { %5680 = vtanh.f32 %v3409_v25 }
0x323a   :  { %v5681_v17 = vpop.eup %5680 }
0x323b   :  { %3412 = vrot.lane.b32.xlu1 %v5681_v17, %s5749_s0 }
0x32ad   :  { %v3413_v19 = vpop.permute.xlu1 %3412 }
0x32ae   :  { %v3415_v26 = vmul.f32 %v5679_v14, %v3413_v19  ;;  %v6864_v14 = vld [vmem:[%s7024_s18] sm:$0xff] }
0x32b0   :  { %3417 = vrot.lane.b32.xlu0 %v3415_v26, %s5744_s25 }
0x3322   :  { %v3418_v27 = vpop.permute.xlu0 %3417 }
0x3323   :  { %5331 = vmatmul.mubr.msk.f32.vlgmr.msra.gmra.mxu1 %vm89_vm0, %v3418_v27  ;;  %5342 = vmatmul.mubr.msk.f32.vlgmr.msra.gmra.mxu0 %vm89_vm0, %v3418_v27 }
0x3324   :  { %5345 = vmatpush3.msra.mxu1 %v6461_v38  ;;  %5356 = vmatpush3.msra.mxu0 %v6369_v47 }
0x3325   :  { %5346 = vmatprep.subr.mxu1 %v5743_v3  ;;  %5357 = vmatprep.subr.mxu0 %v5743_v3 }
0x3326   :  { %5347 = vmatpush3.msra.mxu1 %v6466_v34  ;;  %5358 = vmatpush3.msra.mxu0 %v6377_v48 }
0x3327   :  { %5348 = vmatprep.subr.mxu1 %v5743_v3  ;;  %5359 = vmatprep.subr.mxu0 %v5743_v3 }
0x3328   :  { %5349 = vmatpush3.msra.mxu1 %v6473_v41  ;;  %5360 = vmatpush3.msra.mxu0 %v6386_v49 }
0x3329   :  { %5350 = vmatprep.subr.mxu1 %v5743_v3  ;;  %5361 = vmatprep.subr.mxu0 %v5743_v3 }
0x332a   :  { %5362 = vmatpush3.msra.mxu0 %v6395_v51  ;;  %5363 = vmatprep.mubr.msk.f32.mxu0 %vm5745_vm2, %v5743_v3 }
0x332b   :  { %5351 = vmatpush3.msra.mxu1 %v6480_v42  ;;  %5352 = vmatprep.mubr.msk.f32.mxu1 %vm5745_vm2, %v5743_v3 }
0x332c   :  { %5366 = vmatprep.subr.mxu1 %v5743_v3  ;;  %5377 = vmatprep.subr.mxu0 %v5743_v3 }
0x33e3   :  { %v3487_v47 = vpop.f32.mrf.mxu1  ;;  %v3566_v48 = vpop.f32.mrf.mxu0 }
0x33e4   :  { %v3488_v49 = vadd.f32 %v6515_v52, %v3487_v47  ;;  %v3570_v59 = vadd.f32 %v3566_v48, %v6445_v23 }
0x33e5   :  { %v5332_v28 = vpop.f32.mrf.mxu1  ;;  %v5343_v51 = vpop.f32.mrf.mxu0 }
0x33e6   :  { %3491 = vst [vmem:[%s7026_s21 + $0x20] sm:$0xf] %v3488_v49  ;;  %5682 = vtanh.f32 %v3570_v59  ;;  %v4820_v30 = vmul.f32 -1.442695, %v3570_v59 }
0x33e8   :  { %5684 = vpow2.f32 %v4820_v30 }
0x33f3   :  { %v5683_v29 = vpop.eup %5682 }
0x33f4   :  { %3580 = vrot.lane.b32.xlu1 %v5683_v29, %s5749_s0 }
0x33f5   :  { %v5685_v32 = vpop.eup %5684 }
0x33f6   :  { %v3574_v15 = vadd.f32 1.0, %v5685_v32 }
0x33f8   :  { %5686 = vrcp.f32 %v3574_v15  ;;  %v4026_v15 = vadd.f32 %v6510_v46, %v6408_v60 }
0x3405   :  { %v5687_v33 = vpop.eup %5686 }
0x3406   :  { %v3578_v23 = vmul.f32 %v5687_v33, %v3409_v25 }
0x3466   :  { %v3581_v35 = vpop.permute.xlu1 %3580 }
0x3467   :  { %v3583_v62 = vmul.f32 %v5687_v33, %v3581_v35 }
0x3469   :  { %3585 = vrot.lane.b32.xlu0 %v3583_v62, %s5749_s0  ;;  %v6908_v62 = vld [vmem:[%s7025_s19] ss:$0 sm:$0xff] }
0x34db   :  { %v3586_v36 = vpop.permute.xlu0 %3585 }
0x34dc   :  { %v3588_v0 = vadd.f32 %v3586_v36, %v3578_v23 }
0x34de   :  { %5688 = vtanh.f32 %v3588_v0 }
0x34eb   :  { %v5689_v37 = vpop.eup %5688 }
0x34ec   :  { %3591 = vrot.lane.b32.xlu1 %v5689_v37, %s5749_s0 }
0x355e   :  { %v3592_v43 = vpop.permute.xlu1 %3591 }
0x355f   :  { %v3594_v40 = vmul.f32 %v5687_v33, %v3592_v43 }
0x3561   :  { %3596 = vrot.lane.b32.xlu0 %v3594_v40, %s5744_s25 }
0x35d3   :  { %v3597_v44 = vpop.permute.xlu0 %3596 }
0x35d4   :  { %5353 = vmatmul.mubr.msk.f32.vlgmr.msra.gmra.mxu1 %vm89_vm0, %v3597_v44  ;;  %5364 = vmatmul.mubr.msk.f32.vlgmr.msra.gmra.mxu0 %vm89_vm0, %v3597_v44 }
0x35d5   :  { %5367 = vmatpush3.msra.mxu1 %v6461_v38  ;;  %5385 = vmatprep.mubr.msk.f32.mxu0 %vm5745_vm2, %v5743_v3 }
0x35d6   :  { %5368 = vmatprep.subr.mxu1 %v5743_v3  ;;  %5374 = vmatprep.mubr.msk.f32.mxu1 %vm5745_vm2, %v5743_v3 }
0x35d7   :  { %5369 = vmatpush3.msra.mxu1 %v6466_v34  ;;  %5378 = vmatpush3.msra.mxu0 %v6802_v6 }
0x35d8   :  { %5370 = vmatprep.subr.mxu1 %v5743_v3  ;;  %5379 = vmatprep.subr.mxu0 %v5743_v3 }
0x35d9   :  { %5371 = vmatpush3.msra.mxu1 %v6473_v41  ;;  %5380 = vmatpush3.msra.mxu0 %v6807_v7 }
0x35da   :  { %5372 = vmatprep.subr.mxu1 %v5743_v3  ;;  %5381 = vmatprep.subr.mxu0 %v5743_v3 }
0x35db   :  { %5373 = vmatpush3.msra.mxu1 %v6480_v42  ;;  %5382 = vmatpush3.msra.mxu0 %v6814_v39 }
0x35dc   :  { %5388 = vmatprep.subr.mxu1 %v5743_v3  ;;  %5383 = vmatprep.subr.mxu0 %v5743_v3 }
0x35dd   :  { %5384 = vmatpush3.msra.mxu0 %v6821_v10 }
0x35de   :  { %5399 = vmatprep.subr.mxu0 %v5743_v3 }
0x3694   :  { %v3666_v38 = vpop.f32.mrf.mxu1  ;;  %v3742_v45 = vpop.f32.mrf.mxu0 }
0x3695   :  { %v3667_v53 = vadd.f32 %v6515_v52, %v3666_v38  ;;  %v3746_v55 = vadd.f32 %v3742_v45, %v6429_v4 }
0x3696   :  { %v5354_v56 = vpop.f32.mrf.mxu1  ;;  %v5365_v57 = vpop.f32.mrf.mxu0 }
0x3697   :  { %3670 = vst [vmem:[%s7026_s21 + $0x24] sm:$0xf] %v3667_v53  ;;  %5690 = vtanh.f32 %v3746_v55  ;;  %v4823_v41 = vmul.f32 -1.442695, %v3746_v55 }
0x3699   :  { %5692 = vpow2.f32 %v4823_v41 }
0x36a4   :  { %v5691_v34 = vpop.eup %5690 }
0x36a5   :  { %3756 = vrot.lane.b32.xlu1 %v5691_v34, %s5749_s0 }
0x36a6   :  { %v5693_v42 = vpop.eup %5692 }
0x36a7   :  { %v3750_v2 = vadd.f32 1.0, %v5693_v42 }
0x36a9   :  { %5694 = vrcp.f32 %v3750_v2 }
0x36b6   :  { %v5695_v58 = vpop.eup %5694 }
0x36b7   :  { %v3754_v4 = vmul.f32 %v5695_v58, %v3588_v0 }
0x3717   :  { %v3757_v31 = vpop.permute.xlu1 %3756 }
0x3718   :  { %v3759_v61 = vmul.f32 %v5695_v58, %v3757_v31  ;;  %v4203_v31 = vrot.slane %v6510_v46, 4 }
0x371a   :  { %3761 = vrot.lane.b32.xlu0 %v3759_v61, %s5749_s0  ;;  %v4205_v61 = vadd.f32 %v4203_v31, %v6408_v60 }
0x378c   :  { %v3762_v63 = vpop.permute.xlu0 %3761 }
0x378d   :  { %v6796_v5 = vadd.f32 %v3762_v63, %v3754_v4 }
0x378f   :  { %5696 = vtanh.f32 %v6796_v5 }
0x379c   :  { %v5697_v8 = vpop.eup %5696 }
0x379d   :  { %3767 = vrot.lane.b32.xlu1 %v5697_v8, %s5749_s0 }
0x380f   :  { %v3768_v13 = vpop.permute.xlu1 %3767 }
0x3810   :  { %v3770_v12 = vmul.f32 %v5695_v58, %v3768_v13 }
0x3812   :  { %3772 = vrot.lane.b32.xlu0 %v3770_v12, %s5744_s25 }
0x3884   :  { %v3773_v1 = vpop.permute.xlu0 %3772 }
0x3885   :  { %5375 = vmatmul.mubr.msk.f32.vlgmr.msra.gmra.mxu1 %vm89_vm0, %v3773_v1  ;;  %5386 = vmatmul.mubr.msk.f32.vlgmr.msra.gmra.mxu0 %vm89_vm0, %v3773_v1 }
0x3886   :  { %5389 = vmatpush3.msra.mxu1 %v6834_v50  ;;  %5400 = vmatpush3.msra.mxu0 %v6802_v6 }
0x3887   :  { %5390 = vmatprep.subr.mxu1 %v5743_v3  ;;  %5401 = vmatprep.subr.mxu0 %v5743_v3 }
0x3888   :  { %5391 = vmatpush3.msra.mxu1 %v6843_v54  ;;  %5402 = vmatpush3.msra.mxu0 %v6807_v7 }
0x3889   :  { %5392 = vmatprep.subr.mxu1 %v5743_v3  ;;  %5403 = vmatprep.subr.mxu0 %v5743_v3 }
0x388a   :  { %5393 = vmatpush3.msra.mxu1 %v6852_v9  ;;  %5404 = vmatpush3.msra.mxu0 %v6814_v39 }
0x388b   :  { %5394 = vmatprep.subr.mxu1 %v5743_v3  ;;  %5405 = vmatprep.subr.mxu0 %v5743_v3 }
0x388c   :  { %5406 = vmatpush3.msra.mxu0 %v6821_v10  ;;  %5407 = vmatprep.mubr.msk.f32.mxu0 %vm5745_vm2, %v5743_v3 }
0x388d   :  { %5395 = vmatpush3.msra.mxu1 %v6864_v14  ;;  %5396 = vmatprep.mubr.msk.f32.mxu1 %vm5745_vm2, %v5743_v3 }
0x388e   :  { %5410 = vmatprep.subr.mxu1 %v5743_v3  ;;  %5421 = vmatprep.subr.mxu0 %v5743_v3 }
0x3945   :  { %v3842_v18 = vpop.f32.mrf.mxu1  ;;  %v3921_v20 = vpop.f32.mrf.mxu0 }
0x3946   :  { %v3843_v11 = vadd.f32 %v6515_v52, %v3842_v18  ;;  %v3925_v22 = vadd.f32 %v3921_v20, %v6438_v16 }
0x3947   :  { %v5376_v25 = vpop.f32.mrf.mxu1  ;;  %v5387_v17 = vpop.f32.mrf.mxu0 }
0x3948   :  { %3846 = vst [vmem:[%s7026_s21 + $0x28] sm:$0xf] %v3843_v11  ;;  %5698 = vtanh.f32 %v3925_v22  ;;  %v4826_v26 = vmul.f32 -1.442695, %v3925_v22 }
0x394a   :  { %5700 = vpow2.f32 %v4826_v26 }
0x3955   :  { %v5699_v19 = vpop.eup %5698 }
0x3956   :  { %3935 = vrot.lane.b32.xlu1 %v5699_v19, %s5749_s0 }
0x3957   :  { %v5701_v27 = vpop.eup %5700 }
0x3958   :  { %v3929_v47 = vadd.f32 1.0, %v5701_v27 }
0x395a   :  { %5702 = vrcp.f32 %v3929_v47 }
0x3967   :  { %v5703_v48 = vpop.eup %5702 }
0x3968   :  { %v3933_v16 = vmul.f32 %v5703_v48, %v6796_v5 }
0x39c8   :  { %v3936_v49 = vpop.permute.xlu1 %3935 }
0x39c9   :  { %v3938_v52 = vmul.f32 %v5703_v48, %v3936_v49 }
0x39cb   :  { %3940 = vrot.lane.b32.xlu0 %v3938_v52, %s5749_s0 }
0x3a3d   :  { %v3941_v59 = vpop.permute.xlu0 %3940 }
0x3a3e   :  { %v3943_v28 = vadd.f32 %v3941_v59, %v3933_v16 }
0x3a40   :  { %5704 = vtanh.f32 %v3943_v28 }
0x3a4d   :  { %v5705_v51 = vpop.eup %5704 }
0x3a4e   :  { %3946 = vrot.lane.b32.xlu1 %v5705_v51, %s5749_s0 }
0x3ac0   :  { %v3947_v29 = vpop.permute.xlu1 %3946 }
0x3ac1   :  { %v3949_v30 = vmul.f32 %v5703_v48, %v3947_v29 }
0x3ac3   :  { %3951 = vrot.lane.b32.xlu0 %v3949_v30, %s5744_s25 }
0x3b35   :  { %v3952_v32 = vpop.permute.xlu0 %3951 }
0x3b36   :  { %5397 = vmatmul.mubr.msk.f32.vlgmr.msra.gmra.mxu1 %vm89_vm0, %v3952_v32  ;;  %5408 = vmatmul.mubr.msk.f32.vlgmr.msra.gmra.mxu0 %vm89_vm0, %v3952_v32 }
0x3b37   :  { %5411 = vmatpush3.msra.mxu1 %v6834_v50  ;;  %5422 = vmatpush3.msra.mxu0 %v6802_v6 }
0x3b38   :  { %5412 = vmatprep.subr.mxu1 %v5743_v3  ;;  %5423 = vmatprep.subr.mxu0 %v5743_v3 }
0x3b39   :  { %5413 = vmatpush3.msra.mxu1 %v6843_v54  ;;  %5424 = vmatpush3.msra.mxu0 %v6807_v7 }
0x3b3a   :  { %5414 = vmatprep.subr.mxu1 %v5743_v3  ;;  %5425 = vmatprep.subr.mxu0 %v5743_v3 }
0x3b3b   :  { %5415 = vmatpush3.msra.mxu1 %v6852_v9  ;;  %5426 = vmatpush3.msra.mxu0 %v6814_v39 }
0x3b3c   :  { %5416 = vmatprep.subr.mxu1 %v5743_v3  ;;  %5427 = vmatprep.subr.mxu0 %v5743_v3 }
0x3b3d   :  { %5428 = vmatpush3.msra.mxu0 %v6821_v10  ;;  %5429 = vmatprep.mubr.msk.f32.mxu0 %vm5745_vm2, %v5743_v3 }
0x3b3e   :  { %5417 = vmatpush3.msra.mxu1 %v6864_v14  ;;  %5418 = vmatprep.mubr.msk.f32.mxu1 %vm5745_vm2, %v5743_v3 }
0x3b3f   :  { %5432 = vmatprep.subr.mxu1 %v5743_v3  ;;  %5443 = vmatprep.subr.mxu0 %v5743_v3 }
0x3bf6   :  { %v4021_v33 = vpop.f32.mrf.mxu1  ;;  %v4097_v35 = vpop.f32.mrf.mxu0 }
0x3bf7   :  { %v4022_v23 = vadd.f32 %v6908_v62, %v4021_v33  ;;  %v4101_v36 = vadd.f32 %v4097_v35, %v4026_v15 }
0x3bf8   :  { %v5398_v0 = vpop.f32.mrf.mxu1  ;;  %v5409_v37 = vpop.f32.mrf.mxu0 }
0x3bf9   :  { %4025 = vst [vmem:[%s7026_s21 + $0x2c] sm:$0xf] %v4022_v23  ;;  %5706 = vtanh.f32 %v4101_v36  ;;  %v4829_v40 = vmul.f32 -1.442695, %v4101_v36 }
0x3bfb   :  { %5708 = vpow2.f32 %v4829_v40 }
0x3c06   :  { %v5707_v43 = vpop.eup %5706 }
0x3c07   :  { %4111 = vrot.lane.b32.xlu1 %v5707_v43, %s5749_s0 }
0x3c08   :  { %v5709_v44 = vpop.eup %5708 }
0x3c09   :  { %v4105_v38 = vadd.f32 1.0, %v5709_v44 }
0x3c0b   :  { %5710 = vrcp.f32 %v4105_v38 }
0x3c18   :  { %v5711_v45 = vpop.eup %5710 }
0x3c19   :  { %v4109_v56 = vmul.f32 %v5711_v45, %v3943_v28 }
0x3c79   :  { %v4112_v53 = vpop.permute.xlu1 %4111 }
0x3c7a   :  { %v4114_v55 = vmul.f32 %v5711_v45, %v4112_v53 }
0x3c7c   :  { %4116 = vrot.lane.b32.xlu0 %v4114_v55, %s5749_s0 }
0x3cee   :  { %v4117_v57 = vpop.permute.xlu0 %4116 }
0x3cef   :  { %v4119_v34 = vadd.f32 %v4117_v57, %v4109_v56 }
0x3cf1   :  { %5712 = vtanh.f32 %v4119_v34 }
0x3cfe   :  { %v5713_v41 = vpop.eup %5712 }
0x3cff   :  { %4122 = vrot.lane.b32.xlu1 %v5713_v41, %s5749_s0 }
0x3d71   :  { %v4123_v42 = vpop.permute.xlu1 %4122 }
0x3d72   :  { %v4125_v2 = vmul.f32 %v5711_v45, %v4123_v42 }
0x3d74   :  { %4127 = vrot.lane.b32.xlu0 %v4125_v2, %s5744_s25 }
0x3de6   :  { %v4128_v58 = vpop.permute.xlu0 %4127 }
0x3de7   :  { %5419 = vmatmul.mubr.msk.f32.vlgmr.msra.gmra.mxu1 %vm89_vm0, %v4128_v58  ;;  %5430 = vmatmul.mubr.msk.f32.vlgmr.msra.gmra.mxu0 %vm89_vm0, %v4128_v58 }
0x3de8   :  { %5433 = vmatpush3.msra.mxu1 %v6834_v50  ;;  %5444 = vmatpush3.msra.mxu0 %v6802_v6 }
0x3de9   :  { %5434 = vmatprep.subr.mxu1 %v5743_v3  ;;  %5445 = vmatprep.subr.mxu0 %v5743_v3 }
0x3dea   :  { %5435 = vmatpush3.msra.mxu1 %v6843_v54  ;;  %5446 = vmatpush3.msra.mxu0 %v6807_v7 }
0x3deb   :  { %5436 = vmatprep.subr.mxu1 %v5743_v3  ;;  %5447 = vmatprep.subr.mxu0 %v5743_v3 }
0x3dec   :  { %5437 = vmatpush3.msra.mxu1 %v6852_v9  ;;  %5448 = vmatpush3.msra.mxu0 %v6814_v39 }
0x3ded   :  { %5438 = vmatprep.subr.mxu1 %v5743_v3  ;;  %5449 = vmatprep.subr.mxu0 %v5743_v3 }
0x3dee   :  { %5450 = vmatpush3.msra.mxu0 %v6821_v10  ;;  %5451 = vmatprep.mubr.msk.f32.mxu0 %vm5745_vm2, %v5743_v3 }
0x3def   :  { %5439 = vmatpush3.msra.mxu1 %v6864_v14  ;;  %5440 = vmatprep.mubr.msk.f32.mxu1 %vm5745_vm2, %v5743_v3 }
0x3df0   :  { %5454 = vmatprep.subr.mxu1 %v5743_v3  ;;  %5465 = vmatprep.subr.mxu0 %v5743_v3 }
0x3ea7   :  { %v4197_v4 = vpop.f32.mrf.mxu1  ;;  %v4276_v63 = vpop.f32.mrf.mxu0 }
0x3ea8   :  { %v4198_v5 = vadd.f32 %v6908_v62, %v4197_v4  ;;  %v4280_v8 = vadd.f32 %v4276_v63, %v4205_v61 }
0x3ea9   :  { %v5420_v13 = vpop.f32.mrf.mxu1  ;;  %v5431_v12 = vpop.f32.mrf.mxu0 }
0x3eaa   :  { %4201 = vst [vmem:[%s7026_s21 + $0x30] sm:$0xf] %v4198_v5  ;;  %5714 = vtanh.f32 %v4280_v8  ;;  %v4832_v18 = vmul.f32 -1.442695, %v4280_v8 }
0x3eac   :  { %5716 = vpow2.f32 %v4832_v18 }
0x3eb7   :  { %v5715_v1 = vpop.eup %5714 }
0x3eb8   :  { %4290 = vrot.lane.b32.xlu1 %v5715_v1, %s5749_s0 }
0x3eb9   :  { %v5717_v46 = vpop.eup %5716 }
0x3eba   :  { %v4284_v20 = vadd.f32 1.0, %v5717_v46 }
0x3ebc   :  { %5718 = vrcp.f32 %v4284_v20 }
0x3ec9   :  { %v5719_v60 = vpop.eup %5718 }
0x3eca   :  { %v4288_v25 = vmul.f32 %v5719_v60, %v4119_v34 }
0x3f2a   :  { %v4291_v11 = vpop.permute.xlu1 %4290 }
0x3f2b   :  { %v4293_v22 = vmul.f32 %v5719_v60, %v4291_v11 }
0x3f2d   :  { %4295 = vrot.lane.b32.xlu0 %v4293_v22, %s5749_s0 }
0x3f9f   :  { %v4296_v17 = vpop.permute.xlu0 %4295 }
0x3fa0   :  { %v4298_v19 = vadd.f32 %v4296_v17, %v4288_v25 }
0x3fa2   :  { %5720 = vtanh.f32 %v4298_v19 }
0x3faf   :  { %v5721_v26 = vpop.eup %5720 }
0x3fb0   :  { %4301 = vrot.lane.b32.xlu1 %v5721_v26, %s5749_s0 }
0x4022   :  { %v4302_v27 = vpop.permute.xlu1 %4301 }
0x4023   :  { %v4304_v47 = vmul.f32 %v5719_v60, %v4302_v27 }
0x4025   :  { %4306 = vrot.lane.b32.xlu0 %v4304_v47, %s5744_s25 }
0x4097   :  { %v4307_v48 = vpop.permute.xlu0 %4306 }
0x4098   :  { %5441 = vmatmul.mubr.msk.f32.vlgmr.msra.gmra.mxu1 %vm89_vm0, %v4307_v48  ;;  %5452 = vmatmul.mubr.msk.f32.vlgmr.msra.gmra.mxu0 %vm89_vm0, %v4307_v48 }
0x4099   :  { %5455 = vmatpush3.msra.mxu1 %v6834_v50  ;;  %5466 = vmatpush3.msra.mxu0 %v6802_v6 }
0x409a   :  { %5456 = vmatprep.subr.mxu1 %v5743_v3  ;;  %5467 = vmatprep.subr.mxu0 %v5743_v3 }
0x409b   :  { %5457 = vmatpush3.msra.mxu1 %v6843_v54  ;;  %5468 = vmatpush3.msra.mxu0 %v6807_v7 }
0x409c   :  { %5458 = vmatprep.subr.mxu1 %v5743_v3  ;;  %5469 = vmatprep.subr.mxu0 %v5743_v3 }
0x409d   :  { %5459 = vmatpush3.msra.mxu1 %v6852_v9  ;;  %5470 = vmatpush3.msra.mxu0 %v6814_v39 }
0x409e   :  { %5460 = vmatprep.subr.mxu1 %v5743_v3  ;;  %5471 = vmatprep.subr.mxu0 %v5743_v3 }
0x409f   :  { %5472 = vmatpush3.msra.mxu0 %v6821_v10  ;;  %5473 = vmatprep.mubr.msk.f32.mxu0 %vm5745_vm2, %v5743_v3 }
0x40a0   :  { %5461 = vmatpush3.msra.mxu1 %v6864_v14  ;;  %5462 = vmatprep.mubr.msk.f32.mxu1 %vm5745_vm2, %v5743_v3 }
0x40a1   :  { %5476 = vmatprep.subr.mxu1 %v5743_v3 }
0x4158   :  { %v4376_v6 = vpop.f32.mrf.mxu1  ;;  %v4452_v7 = vpop.f32.mrf.mxu0 }
0x4159   :  { %v4377_v39 = vadd.f32 %v6908_v62, %v4376_v6  ;;  %v4456_v49 = vadd.f32 %v4452_v7, %v6441_v21 }
0x415a   :  { %v5442_v52 = vpop.f32.mrf.mxu1  ;;  %v5453_v16 = vpop.f32.mrf.mxu0 }
0x415b   :  { %4380 = vst [vmem:[%s7026_s21 + $0x34] sm:$0xf] %v4377_v39  ;;  %5722 = vtanh.f32 %v4456_v49  ;;  %v4835_v59 = vmul.f32 -1.442695, %v4456_v49 }
0x415d   :  { %5724 = vpow2.f32 %v4835_v59 }
0x4168   :  { %v5723_v10 = vpop.eup %5722 }
0x4169   :  { %4466 = vrot.lane.b32.xlu1 %v5723_v10, %s5749_s0 }
0x416a   :  { %v5725_v28 = vpop.eup %5724 }
0x416b   :  { %v4460_v51 = vadd.f32 1.0, %v5725_v28 }
0x416d   :  { %5726 = vrcp.f32 %v4460_v51 }
0x417a   :  { %v5727_v29 = vpop.eup %5726 }
0x417b   :  { %v4464_v21 = vmul.f32 %v5727_v29, %v4298_v19 }
0x41db   :  { %v4467_v30 = vpop.permute.xlu1 %4466 }
0x41dc   :  { %v4469_v32 = vmul.f32 %v5727_v29, %v4467_v30 }
0x41de   :  { %4471 = vrot.lane.b32.xlu0 %v4469_v32, %s5749_s0 }
0x4250   :  { %v4472_v15 = vpop.permute.xlu0 %4471 }
0x4251   :  { %v4474_v33 = vadd.f32 %v4472_v15, %v4464_v21 }
0x4253   :  { %5728 = vtanh.f32 %v4474_v33 }
0x4260   :  { %v5729_v35 = vpop.eup %5728 }
0x4261   :  { %4477 = vrot.lane.b32.xlu1 %v5729_v35, %s5749_s0 }
0x42d3   :  { %v4478_v23 = vpop.permute.xlu1 %4477 }
0x42d4   :  { %v4480_v36 = vmul.f32 %v5727_v29, %v4478_v23 }
0x42d6   :  { %4482 = vrot.lane.b32.xlu0 %v4480_v36, %s5744_s25 }
0x4348   :  { %v4483_v0 = vpop.permute.xlu0 %4482 }
0x4349   :  { %5463 = vmatmul.mubr.msk.f32.vlgmr.msra.gmra.mxu1 %vm89_vm0, %v4483_v0  ;;  %5474 = vmatmul.mubr.msk.f32.vlgmr.msra.gmra.mxu0 %vm89_vm0, %v4483_v0 }
0x434a   :  { %5477 = vmatpush3.msra.mxu1 %v6834_v50  ;;  %5484 = vmatprep.mubr.msk.f32.mxu1 %vm5745_vm2, %v5743_v3 }
0x434b   :  { %5478 = vmatprep.subr.mxu1 %v5743_v3 }
0x434c   :  { %5479 = vmatpush3.msra.mxu1 %v6843_v54 }
0x434d   :  { %5480 = vmatprep.subr.mxu1 %v5743_v3 }
0x434e   :  { %5481 = vmatpush3.msra.mxu1 %v6852_v9 }
0x434f   :  { %5482 = vmatprep.subr.mxu1 %v5743_v3 }
0x4350   :  { %5483 = vmatpush3.msra.mxu1 %v6864_v14 }
0x4409   :  { %v4552_v37 = vpop.f32.mrf.mxu1  ;;  %v4631_v43 = vpop.f32.mrf.mxu0 }
0x440a   :  { %v4553_v40 = vadd.f32 %v6908_v62, %v4552_v37  ;;  %v4635_v50 = vadd.f32 %v4631_v43, %v6450_v24 }
0x440b   :  { %v5464_v44 = vpop.f32.mrf.mxu1  ;;  %v5475_v38 = vpop.f32.mrf.mxu0 }
0x440c   :  { %4556 = vst [vmem:[%s7026_s21 + $0x38] sm:$0xf] %v4553_v40  ;;  %5730 = vtanh.f32 %v4635_v50  ;;  %v4838_v9 = vmul.f32 -1.442695, %v4635_v50 }
0x440e   :  { %5732 = vpow2.f32 %v4838_v9 }
0x4419   :  { %v5731_v54 = vpop.eup %5730 }
0x441a   :  { %4645 = vrot.lane.b32.xlu1 %v5731_v54, %s5749_s0 }
0x441b   :  { %v5733_v3 = vpop.eup %5732 }
0x441c   :  { %v4639_v14 = vadd.f32 1.0, %v5733_v3 }
0x441e   :  { %5734 = vrcp.f32 %v4639_v14 }
0x442b   :  { %v5735_v45 = vpop.eup %5734 }
0x442c   :  { %v4643_v24 = vmul.f32 %v5735_v45, %v4474_v33 }
0x448c   :  { %v4646_v53 = vpop.permute.xlu1 %4645 }
0x448d   :  { %v4648_v55 = vmul.f32 %v5735_v45, %v4646_v53 }
0x448f   :  { %4650 = vrot.lane.b32.xlu0 %v4648_v55, %s5749_s0 }
0x4501   :  { %v4651_v56 = vpop.permute.xlu0 %4650 }
0x4502   :  { %v4653_v57 = vadd.f32 %v4651_v56, %v4643_v24 }
0x4504   :  { %5736 = vtanh.f32 %v4653_v57 }
0x4511   :  { %v5737_v34 = vpop.eup %5736 }
0x4512   :  { %4656 = vrot.lane.b32.xlu1 %v5737_v34, %s5749_s0 }
0x4584   :  { %v4657_v41 = vpop.permute.xlu1 %4656 }
0x4585   :  { %v4659_v42 = vmul.f32 %v5735_v45, %v4657_v41 }
0x4587   :  { %4661 = vrot.lane.b32.xlu0 %v4659_v42, %s5744_s25 }
0x45f9   :  { %v4662_v2 = vpop.permute.xlu0 %4661 }
0x45fa   :  { %5485 = vmatmul.mubr.msk.f32.vlgmr.msra.gmra.mxu1 %vm89_vm0, %v4662_v2 }
0x46ba   :  { %v4731_v58 = vpop.f32.mrf.mxu1 }
0x46bb   :  { %v4732_v31 = vadd.f32 %v6908_v62, %v4731_v58 }
0x46bc   :  { %v5486_v61 = vpop.f32.mrf.mxu1 }
0x46bd   :  { %4735 = vst [vmem:[%s7026_s21 + $0x3c] sm:$0xf] %v4732_v31 }

</bundles_post_ra>
